<compile_context>
chip_gen: v7x
topology: tpu7x:2x2x1
jax: 0.10.0
libtpu: 0.0.40
codegen_flags: <defaults>
</compile_context>

<pallas_src>
import functools

import jax
import jax.numpy as jnp
from jax.experimental import pallas as pl
from jax.experimental.pallas import tpu as pltpu


# ------------------------------------------------------------------
# Kernel: one grid step = (one block of whole sequences, one layer)
# ------------------------------------------------------------------
def _encoder_kernel(
    x_ref, wqkv_ref, bqkv_ref, wo_ref, bo_ref, g1_ref, be1_ref,
    w1_ref, bf1_ref, w2_ref, bf2_ref, g2_ref, be2_ref,
    o_ref, xact_ref,
    *, seqs, seq, head, atten_dim, num_layers, eps,
):
    f32 = jnp.float32
    bf16 = jnp.bfloat16
    HD = head * atten_dim
    R = seqs * seq
    layer = pl.program_id(1)

    # Layer 0: load the residual stream into VMEM scratch; it stays resident
    # across the whole (inner) layer axis.
    @pl.when(layer == 0)
    def _():
        xact_ref[...] = x_ref[...].astype(f32)

    x = xact_ref[...]                          # (R, Dm) f32 residual stream
    x_bf = x.astype(bf16)

    # ---- fused Q/K/V projection (attention scale pre-folded into Q cols) ----
    qkv = (jnp.dot(x_bf, wqkv_ref[...], preferred_element_type=f32)
           + bqkv_ref[...]).astype(bf16)       # (R, 3*HD), single bf16 cast

    # ---- gather heads into a leading batch axis: (head*seqs, seq, D) ----
    # Only lane slices + a leading-axis stack/reshape (no sublane transposes).
    def gather_heads(base):
        parts = [qkv[:, base + n * atten_dim: base + (n + 1) * atten_dim]
                 for n in range(head)]
        return jnp.stack(parts, axis=0).reshape(head * seqs, seq, atten_dim)

    q = gather_heads(0)
    k = gather_heads(HD)
    v = gather_heads(2 * HD)

    # ---- batched attention over all (head, sequence) pairs ----
    # TODO(synk): optional attention mask (masked_fill) path not implemented.
    # TODO(synk): lane-dense (L, head*L) softmax layout not applied; moot for L >= 128.
    s = jnp.einsum("bld,bmd->blm", q, k, preferred_element_type=f32)
    m = jnp.max(s, axis=-1, keepdims=True)
    p = jnp.exp(s - m)
    p = p / jnp.sum(p, axis=-1, keepdims=True)            # exact softmax
    ctx = jnp.einsum("blm,bmd->bld", p.astype(bf16), v,
                     preferred_element_type=f32)           # (head*seqs, seq, D)

    # Back to (R, HD) in head-major '(n d)' lane order; wo was pre-permuted to
    # match, folding PyTorch's 'm n l d -> m l (d n)' merge into the weights.
    ctx = ctx.reshape(head, R, atten_dim)
    ctx2d = jnp.concatenate([ctx[n] for n in range(head)], axis=-1)   # (R, HD)

    # ---- single output projection: K = H*D (one MXU matmul, not 8) ----
    att = jnp.dot(ctx2d.astype(bf16), wo_ref[...],
                  preferred_element_type=f32) + bo_ref[...]

    # ---- add + LayerNorm 1 (f32 math) ----
    y = att + x
    mu = jnp.mean(y, axis=-1, keepdims=True)
    c = y - mu
    var = jnp.mean(c * c, axis=-1, keepdims=True)
    x1 = c * jax.lax.rsqrt(var + eps) * g1_ref[...] + be1_ref[...]

    # ---- FeedForward: w1 + ReLU -> w2 ----
    h = jnp.dot(x1.astype(bf16), w1_ref[...], preferred_element_type=f32) + bf1_ref[...]
    h = jnp.maximum(h, 0.0)
    h2 = jnp.dot(h.astype(bf16), w2_ref[...], preferred_element_type=f32) + bf2_ref[...]

    # ---- add + LayerNorm 2 ----
    y2 = h2 + x1
    mu2 = jnp.mean(y2, axis=-1, keepdims=True)
    c2 = y2 - mu2
    var2 = jnp.mean(c2 * c2, axis=-1, keepdims=True)
    out = c2 * jax.lax.rsqrt(var2 + eps) * g2_ref[...] + be2_ref[...]

    # Carry the activation to the next layer; write HBM only after last layer.
    xact_ref[...] = out

    @pl.when(layer == num_layers - 1)
    def _():
        o_ref[...] = out.astype(o_ref.dtype)


# ------------------------------------------------------------------
# pallas_call wrapper
# ------------------------------------------------------------------
def _stacked_spec(arr):
    # arr: (num_layers, A, B) -> kernel sees (A, B) for layer l.
    tail = arr.shape[1:]
    return pl.BlockSpec((None,) + tail, lambda b, l: (l, 0, 0))


def _pick_seqs_per_block(batch, seq, target_rows=256, max_rows=4096):
    divisors = [c for c in range(1, batch + 1) if batch % c == 0]
    fit = [c for c in divisors if c * seq <= max_rows]
    if not fit:
        return 1
    hit = [c for c in fit if c * seq >= target_rows]
    return min(hit) if hit else max(fit)


def encoder_pallas(params, x2d, *, batch, seq, head, atten_dim, eps=1e-5):
    BL, Dm = x2d.shape
    assert BL == batch * seq
    num_layers = params["wqkv_t"].shape[0]

    seqs = _pick_seqs_per_block(batch, seq)
    rows = seqs * seq
    if rows % 8 != 0 and rows != BL:     # keep sublane-tile-friendly blocks
        seqs, rows = batch, BL
    num_blocks = batch // seqs

    w_names = ("wqkv_t", "bqkv", "wo_t", "bo", "g1", "be1",
               "w1_t", "bf1", "w2_t", "bf2", "g2", "be2")
    w_args = tuple(params[n] for n in w_names)

    in_specs = [pl.BlockSpec((rows, Dm), lambda b, l: (b, 0))]
    in_specs += [_stacked_spec(a) for a in w_args]

    kernel = functools.partial(
        _encoder_kernel, seqs=seqs, seq=seq, head=head, atten_dim=atten_dim,
        num_layers=num_layers, eps=eps)

    return pl.pallas_call(
        kernel,
        out_shape=jax.ShapeDtypeStruct((BL, Dm), x2d.dtype),
        grid_spec=pltpu.PrefetchScalarGridSpec(
            num_scalar_prefetch=0,
            # Layer axis innermost: activation stays resident in VMEM scratch,
            # next layer's weights prefetch while the current layer computes.
            grid=(num_blocks, num_layers),
            in_specs=in_specs,
            out_specs=pl.BlockSpec((rows, Dm), lambda b, l: (b, 0)),
            scratch_shapes=[pltpu.VMEM((rows, Dm), jnp.float32)],
        ),
        compiler_params=pltpu.CompilerParams(
            dimension_semantics=("parallel", "arbitrary"),
            vmem_limit_bytes=48 * 1024 * 1024,
        ),
    )(x2d, *w_args)


@functools.partial(jax.jit, static_argnames=("head", "atten_dim"))
def encoder_forward(params, encode, head, atten_dim, mask=None):
    # TODO(synk): attention mask (masked_fill) and dropout are not implemented
    # (eval semantics: dropout = identity; mask path raises).
    if mask is not None:
        raise NotImplementedError("attention mask path not implemented")
    B, L, Dm = encode.shape
    x2d = encode.reshape(B * L, Dm)
    out2d = encoder_pallas(params, x2d, batch=B, seq=L, head=head, atten_dim=atten_dim)
    return out2d.reshape(B, L, Dm)


# ------------------------------------------------------------------
# One-time weight prep: fuse QKV, fold scale, permute wo, pre-transpose,
# cast to bf16, and stack across layers for the fused-layer grid axis.
# ------------------------------------------------------------------
def prepare_params(raw_params, head, atten_dim):
    scale = float(atten_dim) ** (-0.5)
    per_layer = []
    for p in raw_params:
        dim = p["wo"].shape[0]
        HD = head * atten_dim
        # Fold the attention scale into Q's weight AND bias (q' = scale * q).
        wqkv = jnp.concatenate([p["wq"] * scale, p["wk"], p["wv"]], axis=0)  # (3HD, dim)
        bqkv = jnp.concatenate([p["bq"] * scale, p["bk"], p["bv"]], axis=0)  # (3HD,)
        # Permute wo columns so the kernel's head-major '(n d)' layout matches
        # PyTorch's 'm l (d n)' fc input ordering.
        wo_perm = (p["wo"].reshape(dim, atten_dim, head)
                   .transpose(0, 2, 1).reshape(dim, HD))
        per_layer.append({
            "wqkv_t": wqkv.T.astype(jnp.bfloat16),              # (dim, 3HD)
            "bqkv": bqkv.reshape(1, 3 * HD).astype(jnp.float32),
            "wo_t": wo_perm.T.astype(jnp.bfloat16),             # (HD, dim)
            "bo": p["bo"].reshape(1, dim).astype(jnp.float32),
            "g1": p["g1"].reshape(1, dim).astype(jnp.float32),
            "be1": p["be1"].reshape(1, dim).astype(jnp.float32),
            "w1_t": p["w1"].T.astype(jnp.bfloat16),             # (dim, hide)
            "bf1": p["bf1"].reshape(1, -1).astype(jnp.float32),
            "w2_t": p["w2"].T.astype(jnp.bfloat16),             # (hide, dim)
            "bf2": p["bf2"].reshape(1, dim).astype(jnp.float32),
            "g2": p["g2"].reshape(1, dim).astype(jnp.float32),
            "be2": p["be2"].reshape(1, dim).astype(jnp.float32),
        })
    return {k: jnp.stack([lp[k] for lp in per_layer], axis=0) for k in per_layer[0]}


# ------------------------------------------------------------------
# Pure-JAX reference (PyTorch semantics).  mxu_bf16/fold_scale mirror the
# kernel's bf16 casts and scale-folding for a tight structural check.
# ------------------------------------------------------------------
def encoder_reference(raw_params, encode, head, atten_dim, *,
                      mxu_bf16=False, fold_scale=False, eps=1e-5):
    B, L, Dm = encode.shape
    scale = float(atten_dim) ** (-0.5)
    f32 = jnp.float32

    def mm(a, b):
        if mxu_bf16:
            a = a.astype(jnp.bfloat16)
            b = b.astype(jnp.bfloat16)
        return jnp.einsum("...ij,...jk->...ik", a, b, preferred_element_type=f32)

    def ln(y, g, b):
        mu = jnp.mean(y, axis=-1, keepdims=True)
        var = jnp.mean((y - mu) ** 2, axis=-1, keepdims=True)
        return (y - mu) * jax.lax.rsqrt(var + eps) * g + b

    x = encode.astype(f32)
    for lp in raw_params:
        if fold_scale:
            wq, bq, s_mul = lp["wq"] * scale, lp["bq"] * scale, 1.0
        else:
            wq, bq, s_mul = lp["wq"], lp["bq"], scale
        q = mm(x, wq.T) + bq
        k = mm(x, lp["wk"].T) + lp["bk"]
        v = mm(x, lp["wv"].T) + lp["bv"]

        def sh(t):
            return t.reshape(B, L, head, atten_dim).transpose(0, 2, 1, 3)

        qh, kh, vh = sh(q), sh(k), sh(v)
        s = mm(qh, jnp.swapaxes(kh, -1, -2)) * s_mul
        p = jax.nn.softmax(s, axis=-1)
        a = mm(p, vh)                                                # (B,H,L,D)
        a = a.transpose(0, 2, 3, 1).reshape(B, L, atten_dim * head)  # 'm l (d n)'
        a = mm(a, lp["wo"].T) + lp["bo"]
        x1 = ln(a + x, lp["g1"], lp["be1"])
        h = jnp.maximum(mm(x1, lp["w1"].T) + lp["bf1"], 0.0)
        h2 = mm(h, lp["w2"].T) + lp["bf2"]
        x = ln(h2 + x1, lp["g2"], lp["be2"])
    return x


def init_params(key, recycle, dim, atten_dim, head, hide_dim):
    layers = []
    for _ in range(recycle):
        keys = jax.random.split(key, 7)
        key = keys[0]
        hd = head * atten_dim
        layers.append({
            "wq": 0.02 * jax.random.normal(keys[1], (hd, dim), jnp.float32),
            "bq": jnp.zeros((hd,), jnp.float32),
            "wk": 0.02 * jax.random.normal(keys[2], (hd, dim), jnp.float32),
            "bk": jnp.zeros((hd,), jnp.float32),
            "wv": 0.02 * jax.random.normal(keys[3], (hd, dim), jnp.float32),
            "bv": jnp.zeros((hd,), jnp.float32),
            "wo": 0.02 * jax.random.normal(keys[4], (dim, hd), jnp.float32),
            "bo": jnp.zeros((dim,), jnp.float32),
            "g1": jnp.ones((dim,), jnp.float32),
            "be1": jnp.zeros((dim,), jnp.float32),
            "w1": 0.02 * jax.random.normal(keys[5], (hide_dim, dim), jnp.float32),
            "bf1": jnp.zeros((hide_dim,), jnp.float32),
            "w2": 0.02 * jax.random.normal(keys[6], (dim, hide_dim), jnp.float32),
            "bf2": jnp.zeros((dim,), jnp.float32),
            "g2": jnp.ones((dim,), jnp.float32),
            "be2": jnp.zeros((dim,), jnp.float32),
        })
    return layers


if __name__ == "__main__":
    # Small, TPU-tile-friendly shapes.
    B, L = 2, 16
    dim, atten_dim, head = 128, 32, 8
    hide_dim = 2048            # FeedForward default in the PyTorch module
    recycle = 2

    root = jax.random.PRNGKey(0)
    k_x, k_p = jax.random.split(root)
    x = jax.random.normal(k_x, (B, L, dim), jnp.float32)
    raw_params = init_params(k_p, recycle, dim, atten_dim, head, hide_dim)
    params = prepare_params(raw_params, head, atten_dim)   # one-time weight prep

    out = encoder_forward(params, x, head=head, atten_dim=atten_dim)
    out = jax.block_until_ready(out)
    assert out.shape == (B, L, dim)

    # Structural check vs a reference with the same bf16 casts + scale folding.
    ref_matched = encoder_reference(raw_params, x, head, atten_dim,
                                    mxu_bf16=True, fold_scale=True)
    err_m = float(jnp.max(jnp.abs(out - ref_matched)))
    assert jnp.allclose(out, ref_matched, rtol=2e-3, atol=2e-3), \
        f"mismatch vs matched-precision reference (max abs err {err_m})"

    # Sanity check vs the full-f32 (PyTorch-faithful) reference.
    ref_f32 = encoder_reference(raw_params, x, head, atten_dim)
    err_f = float(jnp.max(jnp.abs(out - ref_f32)))
    assert jnp.allclose(out, ref_f32, rtol=1e-2, atol=1e-2), \
        f"mismatch vs f32 reference (max abs err {err_f})"

    print("KERNEL_OK")
</pallas_src>

<mosaic_0001>
module attributes {stable_mosaic.version = 11 : i64} {
  func.func @_encoder_kernel(%arg0: i32, %arg1: i32, %arg2: memref<32x128xf32, #tpu.memory_space<vmem>>, %arg3: memref<1x128x768xbf16, #tpu.memory_space<vmem>>, %arg4: memref<1x1x768xf32, #tpu.memory_space<vmem>>, %arg5: memref<1x256x128xbf16, #tpu.memory_space<vmem>>, %arg6: memref<1x1x128xf32, #tpu.memory_space<vmem>>, %arg7: memref<1x1x128xf32, #tpu.memory_space<vmem>>, %arg8: memref<1x1x128xf32, #tpu.memory_space<vmem>>, %arg9: memref<1x128x2048xbf16, #tpu.memory_space<vmem>>, %arg10: memref<1x1x2048xf32, #tpu.memory_space<vmem>>, %arg11: memref<1x2048x128xbf16, #tpu.memory_space<vmem>>, %arg12: memref<1x1x128xf32, #tpu.memory_space<vmem>>, %arg13: memref<1x1x128xf32, #tpu.memory_space<vmem>>, %arg14: memref<1x1x128xf32, #tpu.memory_space<vmem>>, %arg15: memref<32x128xf32, #tpu.memory_space<vmem>>, %arg16: memref<32x128xf32, #tpu.memory_space<vmem>>) attributes {dimension_semantics = [#tpu.dimension_semantics<parallel>, #tpu.dimension_semantics<arbitrary>], iteration_bounds = array<i64: 1, 2>, scalar_prefetch = 0 : i64, scratch_operands = 1 : i64, tpu.core_type = #tpu.core_type<tc>, window_params = [{transform_indices = @transform_0, window_bounds = array<i64: 32, 128>}, {transform_indices = @transform_1, window_bounds = array<i64: 1, 128, 768>}, {transform_indices = @transform_2, window_bounds = array<i64: 1, 1, 768>}, {transform_indices = @transform_3, window_bounds = array<i64: 1, 256, 128>}, {transform_indices = @transform_4, window_bounds = array<i64: 1, 1, 128>}, {transform_indices = @transform_5, window_bounds = array<i64: 1, 1, 128>}, {transform_indices = @transform_6, window_bounds = array<i64: 1, 1, 128>}, {transform_indices = @transform_7, window_bounds = array<i64: 1, 128, 2048>}, {transform_indices = @transform_8, window_bounds = array<i64: 1, 1, 2048>}, {transform_indices = @transform_9, window_bounds = array<i64: 1, 2048, 128>}, {transform_indices = @transform_10, window_bounds = array<i64: 1, 1, 128>}, {transform_indices = @transform_11, window_bounds = array<i64: 1, 1, 128>}, {transform_indices = @transform_12, window_bounds = array<i64: 1, 1, 128>}, {transform_indices = @transform_13, window_bounds = array<i64: 32, 128>}]} {
    %c0_i32 = arith.constant 0 : i32
    %0 = arith.cmpi eq, %arg1, %c0_i32 : i32
    %1 = arith.extui %0 : i1 to i32
    %c0_i32_0 = arith.constant 0 : i32
    %2 = arith.cmpi ne, %1, %c0_i32_0 : i32
    scf.if %2 {
      %c0_59 = arith.constant 0 : index
      %c0_60 = arith.constant 0 : index
      %177 = vector.load %arg2[%c0_59, %c0_60] : memref<32x128xf32, #tpu.memory_space<vmem>>, vector<32x128xf32>
      %c0_61 = arith.constant 0 : index
      %c0_62 = arith.constant 0 : index
      %178 = vector.load %arg16[%c0_61, %c0_62] : memref<32x128xf32, #tpu.memory_space<vmem>>, vector<32x128xf32>
      tpu.vector_store %arg16[%c0_61, %c0_62], %177 {strides = array<i32>} : memref<32x128xf32, #tpu.memory_space<vmem>>, vector<32x128xf32>,
    } else {
    }
    %c0 = arith.constant 0 : index
    %c0_1 = arith.constant 0 : index
    %3 = vector.load %arg16[%c0, %c0_1] : memref<32x128xf32, #tpu.memory_space<vmem>>, vector<32x128xf32>
    %4 = arith.truncf %3 : vector<32x128xf32> to vector<32x128xbf16>
    %c0_2 = arith.constant 0 : index
    %c0_3 = arith.constant 0 : index
    %c0_4 = arith.constant 0 : index
    %5 = vector.load %arg3[%c0_2, %c0_3, %c0_4] : memref<1x128x768xbf16, #tpu.memory_space<vmem>>, vector<1x128x768xbf16>
    %6 = vector.shape_cast %5 : vector<1x128x768xbf16> to vector<128x768xbf16>
    %cst = arith.constant dense<0.000000e+00> : vector<32x768xf32>
    %7 = tpu.matmul %4, %6, %cst {dimension_numbers = #tpu.dot_dimension_numbers<[1], [0], [0], [1], [0, 0, 1, 1], [], []>} : vector<32x128xbf16>, vector<128x768xbf16>, vector<32x768xf32> -> vector<32x768xf32>
    %c0_5 = arith.constant 0 : index
    %c0_6 = arith.constant 0 : index
    %c0_7 = arith.constant 0 : index
    %8 = vector.load %arg4[%c0_5, %c0_6, %c0_7] : memref<1x1x768xf32, #tpu.memory_space<vmem>>, vector<1x1x768xf32>
    %9 = vector.shape_cast %8 : vector<1x1x768xf32> to vector<1x768xf32>
    %10 = vector.broadcast %9 : vector<1x768xf32> to vector<32x768xf32>
    %11 = arith.addf %7, %10 : vector<32x768xf32>
    %12 = arith.truncf %11 : vector<32x768xf32> to vector<32x768xbf16>
    %13 = vector.extract_strided_slice %12 {offsets = [0, 0], sizes = [32, 32], strides = [1, 1]} : vector<32x768xbf16> to vector<32x32xbf16>
    %14 = vector.extract_strided_slice %12 {offsets = [0, 32], sizes = [32, 32], strides = [1, 1]} : vector<32x768xbf16> to vector<32x32xbf16>
    %15 = vector.extract_strided_slice %12 {offsets = [0, 64], sizes = [32, 32], strides = [1, 1]} : vector<32x768xbf16> to vector<32x32xbf16>
    %16 = vector.extract_strided_slice %12 {offsets = [0, 96], sizes = [32, 32], strides = [1, 1]} : vector<32x768xbf16> to vector<32x32xbf16>
    %17 = vector.extract_strided_slice %12 {offsets = [0, 128], sizes = [32, 32], strides = [1, 1]} : vector<32x768xbf16> to vector<32x32xbf16>
    %18 = vector.extract_strided_slice %12 {offsets = [0, 160], sizes = [32, 32], strides = [1, 1]} : vector<32x768xbf16> to vector<32x32xbf16>
    %19 = vector.extract_strided_slice %12 {offsets = [0, 192], sizes = [32, 32], strides = [1, 1]} : vector<32x768xbf16> to vector<32x32xbf16>
    %20 = vector.extract_strided_slice %12 {offsets = [0, 224], sizes = [32, 32], strides = [1, 1]} : vector<32x768xbf16> to vector<32x32xbf16>
    %21 = vector.shape_cast %13 : vector<32x32xbf16> to vector<1x32x32xbf16>
    %22 = vector.shape_cast %14 : vector<32x32xbf16> to vector<1x32x32xbf16>
    %23 = vector.shape_cast %15 : vector<32x32xbf16> to vector<1x32x32xbf16>
    %24 = vector.shape_cast %16 : vector<32x32xbf16> to vector<1x32x32xbf16>
    %25 = vector.shape_cast %17 : vector<32x32xbf16> to vector<1x32x32xbf16>
    %26 = vector.shape_cast %18 : vector<32x32xbf16> to vector<1x32x32xbf16>
    %27 = vector.shape_cast %19 : vector<32x32xbf16> to vector<1x32x32xbf16>
    %28 = vector.shape_cast %20 : vector<32x32xbf16> to vector<1x32x32xbf16>
    %29 = tpu.concatenate %21, %22, %23, %24, %25, %26, %27, %28 in 0 : vector<1x32x32xbf16>, vector<1x32x32xbf16>, vector<1x32x32xbf16>, vector<1x32x32xbf16>, vector<1x32x32xbf16>, vector<1x32x32xbf16>, vector<1x32x32xbf16>, vector<1x32x32xbf16> -> vector<8x32x32xbf16>
    %30 = vector.shape_cast %29 : vector<8x32x32xbf16> to vector<16x16x32xbf16>
    %31 = vector.extract_strided_slice %12 {offsets = [0, 256], sizes = [32, 32], strides = [1, 1]} : vector<32x768xbf16> to vector<32x32xbf16>
    %32 = vector.extract_strided_slice %12 {offsets = [0, 288], sizes = [32, 32], strides = [1, 1]} : vector<32x768xbf16> to vector<32x32xbf16>
    %33 = vector.extract_strided_slice %12 {offsets = [0, 320], sizes = [32, 32], strides = [1, 1]} : vector<32x768xbf16> to vector<32x32xbf16>
    %34 = vector.extract_strided_slice %12 {offsets = [0, 352], sizes = [32, 32], strides = [1, 1]} : vector<32x768xbf16> to vector<32x32xbf16>
    %35 = vector.extract_strided_slice %12 {offsets = [0, 384], sizes = [32, 32], strides = [1, 1]} : vector<32x768xbf16> to vector<32x32xbf16>
    %36 = vector.extract_strided_slice %12 {offsets = [0, 416], sizes = [32, 32], strides = [1, 1]} : vector<32x768xbf16> to vector<32x32xbf16>
    %37 = vector.extract_strided_slice %12 {offsets = [0, 448], sizes = [32, 32], strides = [1, 1]} : vector<32x768xbf16> to vector<32x32xbf16>
    %38 = vector.extract_strided_slice %12 {offsets = [0, 480], sizes = [32, 32], strides = [1, 1]} : vector<32x768xbf16> to vector<32x32xbf16>
    %39 = vector.shape_cast %31 : vector<32x32xbf16> to vector<1x32x32xbf16>
    %40 = vector.shape_cast %32 : vector<32x32xbf16> to vector<1x32x32xbf16>
    %41 = vector.shape_cast %33 : vector<32x32xbf16> to vector<1x32x32xbf16>
    %42 = vector.shape_cast %34 : vector<32x32xbf16> to vector<1x32x32xbf16>
    %43 = vector.shape_cast %35 : vector<32x32xbf16> to vector<1x32x32xbf16>
    %44 = vector.shape_cast %36 : vector<32x32xbf16> to vector<1x32x32xbf16>
    %45 = vector.shape_cast %37 : vector<32x32xbf16> to vector<1x32x32xbf16>
    %46 = vector.shape_cast %38 : vector<32x32xbf16> to vector<1x32x32xbf16>
    %47 = tpu.concatenate %39, %40, %41, %42, %43, %44, %45, %46 in 0 : vector<1x32x32xbf16>, vector<1x32x32xbf16>, vector<1x32x32xbf16>, vector<1x32x32xbf16>, vector<1x32x32xbf16>, vector<1x32x32xbf16>, vector<1x32x32xbf16>, vector<1x32x32xbf16> -> vector<8x32x32xbf16>
    %48 = vector.shape_cast %47 : vector<8x32x32xbf16> to vector<16x16x32xbf16>
    %49 = vector.extract_strided_slice %12 {offsets = [0, 512], sizes = [32, 32], strides = [1, 1]} : vector<32x768xbf16> to vector<32x32xbf16>
    %50 = vector.extract_strided_slice %12 {offsets = [0, 544], sizes = [32, 32], strides = [1, 1]} : vector<32x768xbf16> to vector<32x32xbf16>
    %51 = vector.extract_strided_slice %12 {offsets = [0, 576], sizes = [32, 32], strides = [1, 1]} : vector<32x768xbf16> to vector<32x32xbf16>
    %52 = vector.extract_strided_slice %12 {offsets = [0, 608], sizes = [32, 32], strides = [1, 1]} : vector<32x768xbf16> to vector<32x32xbf16>
    %53 = vector.extract_strided_slice %12 {offsets = [0, 640], sizes = [32, 32], strides = [1, 1]} : vector<32x768xbf16> to vector<32x32xbf16>
    %54 = vector.extract_strided_slice %12 {offsets = [0, 672], sizes = [32, 32], strides = [1, 1]} : vector<32x768xbf16> to vector<32x32xbf16>
    %55 = vector.extract_strided_slice %12 {offsets = [0, 704], sizes = [32, 32], strides = [1, 1]} : vector<32x768xbf16> to vector<32x32xbf16>
    %56 = vector.extract_strided_slice %12 {offsets = [0, 736], sizes = [32, 32], strides = [1, 1]} : vector<32x768xbf16> to vector<32x32xbf16>
    %57 = vector.shape_cast %49 : vector<32x32xbf16> to vector<1x32x32xbf16>
    %58 = vector.shape_cast %50 : vector<32x32xbf16> to vector<1x32x32xbf16>
    %59 = vector.shape_cast %51 : vector<32x32xbf16> to vector<1x32x32xbf16>
    %60 = vector.shape_cast %52 : vector<32x32xbf16> to vector<1x32x32xbf16>
    %61 = vector.shape_cast %53 : vector<32x32xbf16> to vector<1x32x32xbf16>
    %62 = vector.shape_cast %54 : vector<32x32xbf16> to vector<1x32x32xbf16>
    %63 = vector.shape_cast %55 : vector<32x32xbf16> to vector<1x32x32xbf16>
    %64 = vector.shape_cast %56 : vector<32x32xbf16> to vector<1x32x32xbf16>
    %65 = tpu.concatenate %57, %58, %59, %60, %61, %62, %63, %64 in 0 : vector<1x32x32xbf16>, vector<1x32x32xbf16>, vector<1x32x32xbf16>, vector<1x32x32xbf16>, vector<1x32x32xbf16>, vector<1x32x32xbf16>, vector<1x32x32xbf16>, vector<1x32x32xbf16> -> vector<8x32x32xbf16>
    %66 = vector.shape_cast %65 : vector<8x32x32xbf16> to vector<16x16x32xbf16>
    "tpu.trace_start"() <{level = 10 : i32, message = "bld,bmd->blm"}> : () -> ()
    %cst_8 = arith.constant dense<0.000000e+00> : vector<16x16x16xf32>
    %67 = tpu.matmul %30, %48, %cst_8 {dimension_numbers = #tpu.dot_dimension_numbers<[2], [2], [1], [1], [0, 0, 0, 1, 1, 1], [0], [0]>} : vector<16x16x32xbf16>, vector<16x16x32xbf16>, vector<16x16x16xf32> -> vector<16x16x16xf32>
    "tpu.trace_stop"() : () -> ()
    %cst_9 = arith.constant dense<0xFF800000> : vector<16x16xf32>
    %68 = vector.multi_reduction <maximumf>, %67, %cst_9 [2] : vector<16x16x16xf32> to vector<16x16xf32>
    %69 = vector.shape_cast %68 : vector<16x16xf32> to vector<16x16x1xf32>
    %70 = vector.broadcast %69 : vector<16x16x1xf32> to vector<16x16x16xf32>
    %71 = arith.subf %67, %70 : vector<16x16x16xf32>
    %72 = math.exp %71 : vector<16x16x16xf32>
    %cst_10 = arith.constant dense<0.000000e+00> : vector<16x16xf32>
    %73 = vector.multi_reduction <add>, %72, %cst_10 [2] : vector<16x16x16xf32> to vector<16x16xf32>
    %74 = vector.shape_cast %73 : vector<16x16xf32> to vector<16x16x1xf32>
    %75 = vector.broadcast %74 : vector<16x16x1xf32> to vector<16x16x16xf32>
    %76 = arith.divf %72, %75 : vector<16x16x16xf32>
    %77 = arith.truncf %76 : vector<16x16x16xf32> to vector<16x16x16xbf16>
    "tpu.trace_start"() <{level = 10 : i32, message = "blm,bmd->bld"}> : () -> ()
    %cst_11 = arith.constant dense<0.000000e+00> : vector<16x16x32xf32>
    %78 = tpu.matmul %77, %66, %cst_11 {dimension_numbers = #tpu.dot_dimension_numbers<[2], [1], [1], [2], [0, 0, 0, 1, 1, 2], [0], [0]>} : vector<16x16x16xbf16>, vector<16x16x32xbf16>, vector<16x16x32xf32> -> vector<16x16x32xf32>
    "tpu.trace_stop"() : () -> ()
    %79 = vector.shape_cast %78 : vector<16x16x32xf32> to vector<8x32x32xf32>
    %80 = vector.extract_strided_slice %79 {offsets = [0, 0, 0], sizes = [1, 32, 32], strides = [1, 1, 1]} : vector<8x32x32xf32> to vector<1x32x32xf32>
    %81 = vector.shape_cast %80 : vector<1x32x32xf32> to vector<32x32xf32>
    %82 = vector.extract_strided_slice %79 {offsets = [1, 0, 0], sizes = [1, 32, 32], strides = [1, 1, 1]} : vector<8x32x32xf32> to vector<1x32x32xf32>
    %83 = vector.shape_cast %82 : vector<1x32x32xf32> to vector<32x32xf32>
    %84 = vector.extract_strided_slice %79 {offsets = [2, 0, 0], sizes = [1, 32, 32], strides = [1, 1, 1]} : vector<8x32x32xf32> to vector<1x32x32xf32>
    %85 = vector.shape_cast %84 : vector<1x32x32xf32> to vector<32x32xf32>
    %86 = vector.extract_strided_slice %79 {offsets = [3, 0, 0], sizes = [1, 32, 32], strides = [1, 1, 1]} : vector<8x32x32xf32> to vector<1x32x32xf32>
    %87 = vector.shape_cast %86 : vector<1x32x32xf32> to vector<32x32xf32>
    %88 = vector.extract_strided_slice %79 {offsets = [4, 0, 0], sizes = [1, 32, 32], strides = [1, 1, 1]} : vector<8x32x32xf32> to vector<1x32x32xf32>
    %89 = vector.shape_cast %88 : vector<1x32x32xf32> to vector<32x32xf32>
    %90 = vector.extract_strided_slice %79 {offsets = [5, 0, 0], sizes = [1, 32, 32], strides = [1, 1, 1]} : vector<8x32x32xf32> to vector<1x32x32xf32>
    %91 = vector.shape_cast %90 : vector<1x32x32xf32> to vector<32x32xf32>
    %92 = vector.extract_strided_slice %79 {offsets = [6, 0, 0], sizes = [1, 32, 32], strides = [1, 1, 1]} : vector<8x32x32xf32> to vector<1x32x32xf32>
    %93 = vector.shape_cast %92 : vector<1x32x32xf32> to vector<32x32xf32>
    %94 = vector.extract_strided_slice %79 {offsets = [7, 0, 0], sizes = [1, 32, 32], strides = [1, 1, 1]} : vector<8x32x32xf32> to vector<1x32x32xf32>
    %95 = vector.shape_cast %94 : vector<1x32x32xf32> to vector<32x32xf32>
    %96 = tpu.concatenate %81, %83, %85, %87, %89, %91, %93, %95 in 1 : vector<32x32xf32>, vector<32x32xf32>, vector<32x32xf32>, vector<32x32xf32>, vector<32x32xf32>, vector<32x32xf32>, vector<32x32xf32>, vector<32x32xf32> -> vector<32x256xf32>
    %97 = arith.truncf %96 : vector<32x256xf32> to vector<32x256xbf16>
    %c0_12 = arith.constant 0 : index
    %c0_13 = arith.constant 0 : index
    %c0_14 = arith.constant 0 : index
    %98 = vector.load %arg5[%c0_12, %c0_13, %c0_14] : memref<1x256x128xbf16, #tpu.memory_space<vmem>>, vector<1x256x128xbf16>
    %99 = vector.shape_cast %98 : vector<1x256x128xbf16> to vector<256x128xbf16>
    %cst_15 = arith.constant dense<0.000000e+00> : vector<32x128xf32>
    %100 = tpu.matmul %97, %99, %cst_15 {dimension_numbers = #tpu.dot_dimension_numbers<[1], [0], [0], [1], [0, 0, 1, 1], [], []>} : vector<32x256xbf16>, vector<256x128xbf16>, vector<32x128xf32> -> vector<32x128xf32>
    %c0_16 = arith.constant 0 : index
    %c0_17 = arith.constant 0 : index
    %c0_18 = arith.constant 0 : index
    %101 = vector.load %arg6[%c0_16, %c0_17, %c0_18] : memref<1x1x128xf32, #tpu.memory_space<vmem>>, vector<1x1x128xf32>
    %102 = vector.shape_cast %101 : vector<1x1x128xf32> to vector<1x128xf32>
    %103 = vector.broadcast %102 : vector<1x128xf32> to vector<32x128xf32>
    %104 = arith.addf %100, %103 : vector<32x128xf32>
    %105 = arith.addf %104, %3 : vector<32x128xf32>
    %cst_19 = arith.constant dense<0.000000e+00> : vector<32xf32>
    %106 = vector.multi_reduction <add>, %105, %cst_19 [1] : vector<32x128xf32> to vector<32xf32>
    %107 = vector.shape_cast %106 : vector<32xf32> to vector<32x1xf32>
    %cst_20 = arith.constant 1.280000e+02 : f32
    %108 = vector.broadcast %cst_20 : f32 to vector<32x1xf32>
    %109 = arith.divf %107, %108 : vector<32x1xf32>
    %110 = vector.broadcast %109 : vector<32x1xf32> to vector<32x128xf32>
    %111 = arith.subf %105, %110 : vector<32x128xf32>
    %112 = arith.mulf %111, %111 : vector<32x128xf32>
    %cst_21 = arith.constant dense<0.000000e+00> : vector<32xf32>
    %113 = vector.multi_reduction <add>, %112, %cst_21 [1] : vector<32x128xf32> to vector<32xf32>
    %114 = vector.shape_cast %113 : vector<32xf32> to vector<32x1xf32>
    %cst_22 = arith.constant 1.280000e+02 : f32
    %115 = vector.broadcast %cst_22 : f32 to vector<32x1xf32>
    %116 = arith.divf %114, %115 : vector<32x1xf32>
    %cst_23 = arith.constant 9.99999974E-6 : f32
    %117 = vector.broadcast %cst_23 : f32 to vector<32x1xf32>
    %118 = arith.addf %116, %117 : vector<32x1xf32>
    %119 = math.rsqrt %118 : vector<32x1xf32>
    %120 = vector.broadcast %119 : vector<32x1xf32> to vector<32x128xf32>
    %121 = arith.mulf %111, %120 : vector<32x128xf32>
    %c0_24 = arith.constant 0 : index
    %c0_25 = arith.constant 0 : index
    %c0_26 = arith.constant 0 : index
    %122 = vector.load %arg7[%c0_24, %c0_25, %c0_26] : memref<1x1x128xf32, #tpu.memory_space<vmem>>, vector<1x1x128xf32>
    %123 = vector.shape_cast %122 : vector<1x1x128xf32> to vector<1x128xf32>
    %124 = vector.broadcast %123 : vector<1x128xf32> to vector<32x128xf32>
    %125 = arith.mulf %121, %124 : vector<32x128xf32>
    %c0_27 = arith.constant 0 : index
    %c0_28 = arith.constant 0 : index
    %c0_29 = arith.constant 0 : index
    %126 = vector.load %arg8[%c0_27, %c0_28, %c0_29] : memref<1x1x128xf32, #tpu.memory_space<vmem>>, vector<1x1x128xf32>
    %127 = vector.shape_cast %126 : vector<1x1x128xf32> to vector<1x128xf32>
    %128 = vector.broadcast %127 : vector<1x128xf32> to vector<32x128xf32>
    %129 = arith.addf %125, %128 : vector<32x128xf32>
    %130 = arith.truncf %129 : vector<32x128xf32> to vector<32x128xbf16>
    %c0_30 = arith.constant 0 : index
    %c0_31 = arith.constant 0 : index
    %c0_32 = arith.constant 0 : index
    %131 = vector.load %arg9[%c0_30, %c0_31, %c0_32] : memref<1x128x2048xbf16, #tpu.memory_space<vmem>>, vector<1x128x2048xbf16>
    %132 = vector.shape_cast %131 : vector<1x128x2048xbf16> to vector<128x2048xbf16>
    %cst_33 = arith.constant dense<0.000000e+00> : vector<32x2048xf32>
    %133 = tpu.matmul %130, %132, %cst_33 {dimension_numbers = #tpu.dot_dimension_numbers<[1], [0], [0], [1], [0, 0, 1, 1], [], []>} : vector<32x128xbf16>, vector<128x2048xbf16>, vector<32x2048xf32> -> vector<32x2048xf32>
    %c0_34 = arith.constant 0 : index
    %c0_35 = arith.constant 0 : index
    %c0_36 = arith.constant 0 : index
    %134 = vector.load %arg10[%c0_34, %c0_35, %c0_36] : memref<1x1x2048xf32, #tpu.memory_space<vmem>>, vector<1x1x2048xf32>
    %135 = vector.shape_cast %134 : vector<1x1x2048xf32> to vector<1x2048xf32>
    %136 = vector.broadcast %135 : vector<1x2048xf32> to vector<32x2048xf32>
    %137 = arith.addf %133, %136 : vector<32x2048xf32>
    %cst_37 = arith.constant 0.000000e+00 : f32
    %138 = vector.broadcast %cst_37 : f32 to vector<32x2048xf32>
    %139 = arith.maximumf %137, %138 : vector<32x2048xf32>
    %140 = arith.truncf %139 : vector<32x2048xf32> to vector<32x2048xbf16>
    %c0_38 = arith.constant 0 : index
    %c0_39 = arith.constant 0 : index
    %c0_40 = arith.constant 0 : index
    %141 = vector.load %arg11[%c0_38, %c0_39, %c0_40] : memref<1x2048x128xbf16, #tpu.memory_space<vmem>>, vector<1x2048x128xbf16>
    %142 = vector.shape_cast %141 : vector<1x2048x128xbf16> to vector<2048x128xbf16>
    %cst_41 = arith.constant dense<0.000000e+00> : vector<32x128xf32>
    %143 = tpu.matmul %140, %142, %cst_41 {dimension_numbers = #tpu.dot_dimension_numbers<[1], [0], [0], [1], [0, 0, 1, 1], [], []>} : vector<32x2048xbf16>, vector<2048x128xbf16>, vector<32x128xf32> -> vector<32x128xf32>
    %c0_42 = arith.constant 0 : index
    %c0_43 = arith.constant 0 : index
    %c0_44 = arith.constant 0 : index
    %144 = vector.load %arg12[%c0_42, %c0_43, %c0_44] : memref<1x1x128xf32, #tpu.memory_space<vmem>>, vector<1x1x128xf32>
    %145 = vector.shape_cast %144 : vector<1x1x128xf32> to vector<1x128xf32>
    %146 = vector.broadcast %145 : vector<1x128xf32> to vector<32x128xf32>
    %147 = arith.addf %143, %146 : vector<32x128xf32>
    %148 = arith.addf %147, %129 : vector<32x128xf32>
    %cst_45 = arith.constant dense<0.000000e+00> : vector<32xf32>
    %149 = vector.multi_reduction <add>, %148, %cst_45 [1] : vector<32x128xf32> to vector<32xf32>
    %150 = vector.shape_cast %149 : vector<32xf32> to vector<32x1xf32>
    %cst_46 = arith.constant 1.280000e+02 : f32
    %151 = vector.broadcast %cst_46 : f32 to vector<32x1xf32>
    %152 = arith.divf %150, %151 : vector<32x1xf32>
    %153 = vector.broadcast %152 : vector<32x1xf32> to vector<32x128xf32>
    %154 = arith.subf %148, %153 : vector<32x128xf32>
    %155 = arith.mulf %154, %154 : vector<32x128xf32>
    %cst_47 = arith.constant dense<0.000000e+00> : vector<32xf32>
    %156 = vector.multi_reduction <add>, %155, %cst_47 [1] : vector<32x128xf32> to vector<32xf32>
    %157 = vector.shape_cast %156 : vector<32xf32> to vector<32x1xf32>
    %cst_48 = arith.constant 1.280000e+02 : f32
    %158 = vector.broadcast %cst_48 : f32 to vector<32x1xf32>
    %159 = arith.divf %157, %158 : vector<32x1xf32>
    %cst_49 = arith.constant 9.99999974E-6 : f32
    %160 = vector.broadcast %cst_49 : f32 to vector<32x1xf32>
    %161 = arith.addf %159, %160 : vector<32x1xf32>
    %162 = math.rsqrt %161 : vector<32x1xf32>
    %163 = vector.broadcast %162 : vector<32x1xf32> to vector<32x128xf32>
    %164 = arith.mulf %154, %163 : vector<32x128xf32>
    %c0_50 = arith.constant 0 : index
    %c0_51 = arith.constant 0 : index
    %c0_52 = arith.constant 0 : index
    %165 = vector.load %arg13[%c0_50, %c0_51, %c0_52] : memref<1x1x128xf32, #tpu.memory_space<vmem>>, vector<1x1x128xf32>
    %166 = vector.shape_cast %165 : vector<1x1x128xf32> to vector<1x128xf32>
    %167 = vector.broadcast %166 : vector<1x128xf32> to vector<32x128xf32>
    %168 = arith.mulf %164, %167 : vector<32x128xf32>
    %c0_53 = arith.constant 0 : index
    %c0_54 = arith.constant 0 : index
    %c0_55 = arith.constant 0 : index
    %169 = vector.load %arg14[%c0_53, %c0_54, %c0_55] : memref<1x1x128xf32, #tpu.memory_space<vmem>>, vector<1x1x128xf32>
    %170 = vector.shape_cast %169 : vector<1x1x128xf32> to vector<1x128xf32>
    %171 = vector.broadcast %170 : vector<1x128xf32> to vector<32x128xf32>
    %172 = arith.addf %168, %171 : vector<32x128xf32>
    %c0_56 = arith.constant 0 : index
    %c0_57 = arith.constant 0 : index
    %173 = vector.load %arg16[%c0_56, %c0_57] : memref<32x128xf32, #tpu.memory_space<vmem>>, vector<32x128xf32>
    tpu.vector_store %arg16[%c0_56, %c0_57], %172 {strides = array<i32>} : memref<32x128xf32, #tpu.memory_space<vmem>>, vector<32x128xf32>,
    %c1_i32 = arith.constant 1 : i32
    %174 = arith.cmpi eq, %arg1, %c1_i32 : i32
    %175 = arith.extui %174 : i1 to i32
    %c0_i32_58 = arith.constant 0 : i32
    %176 = arith.cmpi ne, %175, %c0_i32_58 : i32
    scf.if %176 {
      %c0_59 = arith.constant 0 : index
      %c0_60 = arith.constant 0 : index
      %177 = vector.load %arg15[%c0_59, %c0_60] : memref<32x128xf32, #tpu.memory_space<vmem>>, vector<32x128xf32>
      tpu.vector_store %arg15[%c0_59, %c0_60], %172 {strides = array<i32>} : memref<32x128xf32, #tpu.memory_space<vmem>>, vector<32x128xf32>,
    } else {
    }
    return
  }
  func.func @transform_0(%arg0: i32, %arg1: i32) -> (i32, i32) {
    %c0_i32 = arith.constant 0 : i32
    %c0_i32_0 = arith.constant 0 : i32
    return %arg0, %c0_i32 : i32, i32
  }
  func.func @transform_1(%arg0: i32, %arg1: i32) -> (i32, i32, i32) {
    %c0_i32 = arith.constant 0 : i32
    %c0_i32_0 = arith.constant 0 : i32
    %c0_i32_1 = arith.constant 0 : i32
    return %arg1, %c0_i32, %c0_i32_0 : i32, i32, i32
  }
  func.func @transform_2(%arg0: i32, %arg1: i32) -> (i32, i32, i32) {
    %c0_i32 = arith.constant 0 : i32
    %c0_i32_0 = arith.constant 0 : i32
    %c0_i32_1 = arith.constant 0 : i32
    return %arg1, %c0_i32, %c0_i32_0 : i32, i32, i32
  }
  func.func @transform_3(%arg0: i32, %arg1: i32) -> (i32, i32, i32) {
    %c0_i32 = arith.constant 0 : i32
    %c0_i32_0 = arith.constant 0 : i32
    %c0_i32_1 = arith.constant 0 : i32
    return %arg1, %c0_i32, %c0_i32_0 : i32, i32, i32
  }
  func.func @transform_4(%arg0: i32, %arg1: i32) -> (i32, i32, i32) {
    %c0_i32 = arith.constant 0 : i32
    %c0_i32_0 = arith.constant 0 : i32
    %c0_i32_1 = arith.constant 0 : i32
    return %arg1, %c0_i32, %c0_i32_0 : i32, i32, i32
  }
  func.func @transform_5(%arg0: i32, %arg1: i32) -> (i32, i32, i32) {
    %c0_i32 = arith.constant 0 : i32
    %c0_i32_0 = arith.constant 0 : i32
    %c0_i32_1 = arith.constant 0 : i32
    return %arg1, %c0_i32, %c0_i32_0 : i32, i32, i32
  }
  func.func @transform_6(%arg0: i32, %arg1: i32) -> (i32, i32, i32) {
    %c0_i32 = arith.constant 0 : i32
    %c0_i32_0 = arith.constant 0 : i32
    %c0_i32_1 = arith.constant 0 : i32
    return %arg1, %c0_i32, %c0_i32_0 : i32, i32, i32
  }
  func.func @transform_7(%arg0: i32, %arg1: i32) -> (i32, i32, i32) {
    %c0_i32 = arith.constant 0 : i32
    %c0_i32_0 = arith.constant 0 : i32
    %c0_i32_1 = arith.constant 0 : i32
    return %arg1, %c0_i32, %c0_i32_0 : i32, i32, i32
  }
  func.func @transform_8(%arg0: i32, %arg1: i32) -> (i32, i32, i32) {
    %c0_i32 = arith.constant 0 : i32
    %c0_i32_0 = arith.constant 0 : i32
    %c0_i32_1 = arith.constant 0 : i32
    return %arg1, %c0_i32, %c0_i32_0 : i32, i32, i32
  }
  func.func @transform_9(%arg0: i32, %arg1: i32) -> (i32, i32, i32) {
    %c0_i32 = arith.constant 0 : i32
    %c0_i32_0 = arith.constant 0 : i32
    %c0_i32_1 = arith.constant 0 : i32
    return %arg1, %c0_i32, %c0_i32_0 : i32, i32, i32
  }
  func.func @transform_10(%arg0: i32, %arg1: i32) -> (i32, i32, i32) {
    %c0_i32 = arith.constant 0 : i32
    %c0_i32_0 = arith.constant 0 : i32
    %c0_i32_1 = arith.constant 0 : i32
    return %arg1, %c0_i32, %c0_i32_0 : i32, i32, i32
  }
  func.func @transform_11(%arg0: i32, %arg1: i32) -> (i32, i32, i32) {
    %c0_i32 = arith.constant 0 : i32
    %c0_i32_0 = arith.constant 0 : i32
    %c0_i32_1 = arith.constant 0 : i32
    return %arg1, %c0_i32, %c0_i32_0 : i32, i32, i32
  }
  func.func @transform_12(%arg0: i32, %arg1: i32) -> (i32, i32, i32) {
    %c0_i32 = arith.constant 0 : i32
    %c0_i32_0 = arith.constant 0 : i32
    %c0_i32_1 = arith.constant 0 : i32
    return %arg1, %c0_i32, %c0_i32_0 : i32, i32, i32
  }
  func.func @transform_13(%arg0: i32, %arg1: i32) -> (i32, i32) {
    %c0_i32 = arith.constant 0 : i32
    %c0_i32_0 = arith.constant 0 : i32
    return %arg0, %c0_i32 : i32, i32
  }
}

</mosaic_0001>

<bundles_post_ra>
// kernel: encoder_forward.1
= control target key start
LH: loop header
LB: loop body
LE: loop exit
PB: predicated region body
PF: predicated region fallthrough
CT: control target
= control target key end

     0   :  { %s10430_s0 = inlined_call_operand.vmem [shape: f32[32,128], index: 0, kind: input, shape index: {}]   ;;  %s10431_s1 = inlined_call_operand.hbm [shape: bf16[2,128,768], index: 1, kind: input, shape index: {}]   ;;  %s10432_s2 = inlined_call_operand.vmem [shape: f32[2,1,768], index: 2, kind: input, shape index: {}]   ;;  %s10433_s3 = inlined_call_operand.hbm [shape: bf16[2,256,128], index: 3, kind: input, shape index: {}]   ;;  %s10434_s4 = inlined_call_operand.vmem [shape: f32[2,1,128], index: 4, kind: input, shape index: {}]   ;;  %s10435_s5 = inlined_call_operand.vmem [shape: f32[2,1,128], index: 5, kind: input, shape index: {}]   ;;  %s10436_s6 = inlined_call_operand.hbm [shape: f32[2,1,128], index: 6, kind: input, shape index: {}]   ;;  %s10437_s7 = inlined_call_operand.hbm [shape: bf16[2,128,2048], index: 7, kind: input, shape index: {}]   ;;  %s10438_s8 = inlined_call_operand.hbm [shape: f32[2,1,2048], index: 8, kind: input, shape index: {}]   ;;  %s10439_s9 = inlined_call_operand.hbm [shape: bf16[2,2048,128], index: 9, kind: input, shape index: {}]   ;;  %s10440_s10 = inlined_call_operand.hbm [shape: f32[2,1,128], index: 10, kind: input, shape index: {}]   ;;  %s10441_s11 = inlined_call_operand.hbm [shape: f32[2,1,128], index: 11, kind: input, shape index: {}]   ;;  %s10442_s12 = inlined_call_operand.hbm [shape: f32[2,1,128], index: 12, kind: input, shape index: {}]   ;;  %s10443_s13 = inlined_call_operand.hbm [shape: f32[32,128], index: 13, kind: output, shape index: {}]  }
   0x1   :  { %10461 = sst [smem:[#allocation30_spill]] %s10430_s0 }
   0x2   :  { %10462 = sst [smem:[#allocation31_spill]] %s10431_s1 }
   0x3   :  { %10463 = sst [smem:[#allocation32_spill]] %s10432_s2 }
   0x4   :  { %10464 = sst [smem:[#allocation33_spill]] %s10433_s3 }
   0x5   :  { %10465 = sst [smem:[#allocation34_spill]] %s10434_s4 }
   0x6   :  { %10466 = sst [smem:[#allocation35_spill]] %s10435_s5 }
   0x7   :  { %10467 = sst [smem:[#allocation36_spill]] %s10436_s6 }
   0x8   :  { %10468 = sst [smem:[#allocation37_spill]] %s10437_s7 }
   0x9   :  { %10469 = sst [smem:[#allocation38_spill]] %s10438_s8 }
   0xa   :  { %10470 = sst [smem:[#allocation39_spill]] %s10439_s9 }
   0xb   :  { %10471 = sst [smem:[#allocation40_spill]] %s10440_s10 }
   0xc   :  { %10472 = sst [smem:[#allocation41_spill]] %s10443_s13 }
   0xd   :  { %18 = vsyncpa [#allocation4], 0 }
   0xe   :  { %20 = vsyncpa [#allocation4 + $0x1], 0 }
   0xf   :  { %21 = vsyncpa [#allocation7], 0 }
  0x10   :  { %23 = vsyncpa [#allocation7 + $0x1], 0 }
  0x11   :  { %24 = vsyncpa [#allocation10], 0 }
  0x12   :  { %26 = vsyncpa [#allocation10 + $0x1], 0 }
  0x13   :  { %27 = vsyncpa [#allocation13], 0 }
  0x14   :  { %29 = vsyncpa [#allocation13 + $0x1], 0 }
  0x15   :  { %30 = vsyncpa [#allocation16], 0 }
  0x16   :  { %32 = vsyncpa [#allocation16 + $0x1], 0 }
  0x17   :  { %33 = vsyncpa [#allocation5], 0  ;;  %s8706_s25 = smov 0   ;;  %s8708_s26 = smov 0  }
  0x18   :  { %s8710_s27 = smov 0   ;;  %s8712_s28 = smov 0  }
  0x19   :  { %s8714_s29 = smov 0   ;;  %s8716_s30 = smov 0  }
  0x1a LB: > { %10473 = sst [smem:[#allocation25_spill]] %s8599_s27  ;;  %s8735_s14 = sadd.s32 4294967295, %s8611_s30   ;;  %s8611_s30 = sphi %s8716_s30, %s39_s30   ;;  %s8607_s29 = sphi %s8714_s29, %s10524_s29   ;;  %s8603_s28 = sphi %s8712_s28, %s10523_s28   ;;  %s8599_s27 = sphi %s8710_s27, %s10519_s27   ;;  %s8595_s26 = sphi %s8708_s26, %s10522_s26   ;;  %s8591_s25 = sphi %s8706_s25, %s10521_s25  }
  0x1b   : > { %10474 = sst [smem:[#allocation26_spill]] %s8603_s28  ;;  %s48_s15 = sadd.s32 1, %s8607_s29 }
  0x1c   : > { %10475 = sst [smem:[#allocation27_spill]] %s8611_s30  ;;  %p49_p0 = scmp.ge.s32.totalorder %s48_s15, 2 }
  0x1d   : > { %s84_s16 = sadd.s32 1, %s8599_s27  ;;  %p91_p1 = scmp.ne.s32.totalorder %s8599_s27, %s8595_s26 }
  0x1e   : > { %p92_p2 = scmp.eq.s32.totalorder %s8611_s30, 0  ;;  %s10526_s15 = smov (%p49_p0, %s48_s15), 0 }
  0x1f   : > { %10476 = sst [smem:[#allocation28_spill]] %s10526_s15  ;;  %p97_p4 = scmp.ne.s32.totalorder %s8595_s26, %s8591_s25 }
  0x20   : > { %p93_p3 = por %p92_p2, %p91_p1  ;;  %s81_s17 = ssub.s32 %s8607_s29, %s10526_s15 }
  0x21   : > { %p98_p5 = scmp.eq.s32.totalorder %s8735_s14, 0  ;;  %p82_p6 = scmp.eq.s32.totalorder %s81_s17, 0 }
  0x22   : > { %p7756_p8 = scmp.lt.s32.totalorder %s8611_s30, 2  ;;  %s8757_s20 = sand.u32 1, %s8599_s27  }
  0x23   : > { %p8748_p7 = por %p98_p5, %p97_p4  ;;  %s8764_s22 = sand.u32 1, %s8611_s30  }
  0x24   : > { %s8754_s19 = scalar_select %p82_p6, %s8599_s27, %s84_s16  }
  0x25   : > { %s10477_s18 = scalar_select %p8748_p7, 1, 0 }
  0x26   : > { %10478 = sst [smem:[#allocation29_spill]] %s8754_s19  ;;  %p8759_p9 = pnand %p7756_p8, %p93_p3 }
  0x27   : > { %s6789_s23 = sshll.u32 %s8757_s20, 7  ;;  %s7174_s24 = sshll.u32 %s8607_s29, 11 }
  0x28   : > { %s10479_s21 = scalar_select %p8759_p9, 1, 0 }
  0x29   : > { %s10480_s3 = sld [smem:[#allocation33_spill]]  ;;  %s474_s16 = scalar_lea.vmem [#allocation6], %s6789_s23 }
  0x2a   : > { %s481_s19 = sshll.u32 %s474_s16, 4  ;;  %p8781_p12 = pneg %p8759_p9  ;;  %s8773_s19 = int_to_ptr.vmem [resolvable:$true] %s481_s19 }
  0x2f   : > { %s8771_s15 = scalar_lea.hbm %s10480_s3, %s7174_s24  ;;  %s8250_s23 = scalar_lea.hbm %s10480_s3, 4096 }
  0x30   : > { %s8245_s13 = scalar_lea.hbm %s8771_s15, 2048  ;;  %p8251_p1 = scmp.lt.u32.totalorder %s8771_s15, %s10480_s3 }
  0x31   : > { %p8246_p11 = scmp.ne.s32.totalorder %s8771_s15, %s8245_s13  ;;  %p8252_p2 = scmp.lt.u32.totalorder %s8250_s23, %s8245_s13 }
  0x32   : > { %p8254_p4 = scmp.lt.u32.totalorder %s8245_s13, %s8771_s15 }
  0x33   : > { %p8248_p13 = pnand %p8781_p12, %p8246_p11  ;;  %p8253_p3 = por %p8252_p2, %p8251_p1 }
  0x35   : > { %p8249_p0 = pneg %p8248_p13  ;;  %p8255_p5 = por %p8254_p4, %p8253_p3 }
  0x37   : > { %p8256_p6 = pnand %p8255_p5, %p8249_p0 }
  0x39   : > { %8259 = shalt.err (!%p8256_p6)
}
  0x3a   : > { %s8260_s27 = scalar_lea.vmem %s8773_s19, 2048  ;;  %s8613_s24 = smov [#allocation6]  }
  0x3b   : > { %p8261_p8 = scmp.ne.s32.totalorder %s8773_s19, %s8260_s27  ;;  %s8265_s25 = sshll.u32 %s8613_s24, 4  ;;  %s8266_s25 = int_to_ptr.vmem [resolvable:$false] %s8265_s25 }
  0x3c   : > { %s8267_s17 = scalar_lea.vmem %s8266_s25, 4096  ;;  %p8268_p10 = scmp.lt.s32.totalorder %s8773_s19, %s8266_s25 }
  0x3d   : > { %p8263_p11 = pnand %p8261_p8, %p8781_p12  ;;  %p8269_p7 = scmp.lt.s32.totalorder %s8267_s17, %s8260_s27 }
  0x3f   : > { %p8264_p13 = pneg %p8263_p11  ;;  %p8270_p1 = por %p8269_p7, %p8268_p10 }
  0x41   : > { %p8271_p2 = pnand %p8270_p1, %p8264_p13 }
  0x43   : > { %8274 = shalt.err (!%p8271_p2)
}
  0x44   : > { %s10450_s13 = smov 64   ;;  %s10449_s23 = smov 4  }
  0x45   : > { %s10482_s27 = scalar_lea.sflag [#allocation7], %s8764_s22  ;;  %p630_p7 = scmp.lt.s32.totalorder %s8611_s30, 3 }
  0x46   : > { %7734 = dma.hbm_to_vmem [thread:$0]  (!%p8759_p9), %s8771_s15, 2048, %s8773_s19, %s10482_s27, %s10450_s13, %s10450_s13, %s10449_s23  }
  0x47   : > { %s6793_s16 = sshll.u32 %s8757_s20, 10  ;;  %s10453_s24 = sshll.u32 %s8607_s29, 14 }
  0x48   : > { %p10483_p10 = scmp.ge.s32.totalorder %s8611_s30, 1  ;;  %s10485_s7 = sld [smem:[#allocation37_spill]] }
  0x49   : > { %s524_s15 = scalar_lea.vmem [#allocation9], %s6793_s16  ;;  %s10459_s27 = scalar_lea.sflag [#allocation10], %s8764_s22 }
  0x4a   : > { %p8814_p0 = pnand %p10483_p10, %p630_p7  ;;  %s531_s19 = sshll.u32 %s524_s15, 4  ;;  %s8827_s19 = int_to_ptr.vmem [resolvable:$true] %s531_s19 }
  0x4c   : > { %s10484_s25 = scalar_select %p8814_p0, 1, 0 }
  0x4e   : > { %s8823_s2 = scalar_lea.hbm %s10485_s7, %s10453_s24  ;;  %s8280_s3 = scalar_lea.hbm %s10485_s7, 32768 }
  0x4f   : > { %s8275_s23 = scalar_lea.hbm %s8823_s2, 16384  ;;  %p8281_p6 = scmp.lt.u32.totalorder %s8823_s2, %s10485_s7 }
  0x50   : > { %p8276_p3 = scmp.ne.s32.totalorder %s8823_s2, %s8275_s23  ;;  %p8282_p8 = scmp.lt.u32.totalorder %s8280_s3, %s8275_s23 }
  0x51   : > { %p8284_p13 = scmp.lt.u32.totalorder %s8275_s23, %s8823_s2 }
  0x52   : > { %p8278_p4 = pnand %p8276_p3, %p8781_p12  ;;  %p8283_p11 = por %p8282_p8, %p8281_p6 }
  0x54   : > { %p8279_p5 = pneg %p8278_p4  ;;  %p8285_p1 = por %p8284_p13, %p8283_p11 }
  0x56   : > { %p8286_p2 = pnand %p8285_p1, %p8279_p5 }
  0x58   : > { %8289 = shalt.err (!%p8286_p2)
}
  0x59   : > { %s8290_s15 = scalar_lea.vmem %s8827_s19, 16384  ;;  %s8616_s30 = smov [#allocation9]  }
  0x5a   : > { %p8291_p7 = scmp.ne.s32.totalorder %s8827_s19, %s8290_s15  ;;  %s8295_s13 = sshll.u32 %s8616_s30, 4  ;;  %s8296_s13 = int_to_ptr.vmem [resolvable:$false] %s8295_s13 }
  0x5b   : > { %s8297_s24 = scalar_lea.vmem %s8296_s13, 32768  ;;  %p8298_p4 = scmp.lt.s32.totalorder %s8827_s19, %s8296_s13 }
  0x5c   : > { %p8293_p10 = pnand %p8291_p7, %p8781_p12  ;;  %p8299_p0 = scmp.lt.s32.totalorder %s8297_s24, %s8290_s15 }
  0x5e   : > { %p8294_p3 = pneg %p8293_p10  ;;  %p8300_p6 = por %p8299_p0, %p8298_p4 }
  0x60   : > { %p8301_p8 = pnand %p8300_p6, %p8294_p3 }
  0x62   : > { %8304 = shalt.err (!%p8301_p8)
}
  0x63   : > { %s8617_s23 = smov 1024   ;;  %s10486_s3 = smov 64  }
  0x64   : > { %7740 = dma.hbm_to_vmem [thread:$0]  (!%p8759_p9), %s8823_s2, 16384, %s8827_s19, %s10459_s27, %s8617_s23, %s8617_s23, %s10486_s3  }
  0x65   : > { %s10487_s17 = sshll.u32 %s8607_s29, 14  ;;  %s10488_s9 = sld [smem:[#allocation39_spill]] }
  0x66   : > { %s564_s24 = scalar_lea.vmem [#allocation12], %s6793_s16  ;;  %s8866_s5 = sshll.u32 %s8607_s29, 4 }
  0x67   : > { %s571_s7 = sshll.u32 %s564_s24, 4  ;;  %s10457_s4 = scalar_lea.sflag [#allocation13], %s8764_s22  ;;  %s8863_s7 = int_to_ptr.vmem [resolvable:$true] %s571_s7 }
  0x6b   : > { %s8859_s13 = scalar_lea.hbm %s10488_s9, %s10487_s17  ;;  %s8310_s23 = scalar_lea.hbm %s10488_s9, 32768 }
  0x6c   : > { %s8305_s28 = scalar_lea.hbm %s8859_s13, 16384  ;;  %p8311_p13 = scmp.lt.u32.totalorder %s8859_s13, %s10488_s9 }
  0x6d   : > { %p8306_p0 = scmp.ne.s32.totalorder %s8859_s13, %s8305_s28  ;;  %p8312_p1 = scmp.lt.u32.totalorder %s8310_s23, %s8305_s28 }
  0x6e   : > { %p8314_p7 = scmp.lt.u32.totalorder %s8305_s28, %s8859_s13 }
  0x6f   : > { %p8308_p5 = pnand %p8306_p0, %p8781_p12  ;;  %p8313_p2 = por %p8312_p1, %p8311_p13 }
  0x71   : > { %p8309_p11 = pneg %p8308_p5  ;;  %p8315_p10 = por %p8314_p7, %p8313_p2 }
  0x73   : > { %p8316_p3 = pnand %p8315_p10, %p8309_p11 }
  0x75   : > { %8319 = shalt.err (!%p8316_p3)
}
  0x76   : > { %s8320_s16 = scalar_lea.vmem %s8863_s7, 16384  ;;  %s8618_s15 = smov [#allocation12]  }
  0x77   : > { %p8321_p4 = scmp.ne.s32.totalorder %s8863_s7, %s8320_s16  ;;  %s8325_s24 = sshll.u32 %s8618_s15, 4  ;;  %s8326_s24 = int_to_ptr.vmem [resolvable:$false] %s8325_s24 }
  0x78   : > { %s8327_s2 = scalar_lea.vmem %s8326_s24, 32768  ;;  %p8328_p0 = scmp.lt.s32.totalorder %s8863_s7, %s8326_s24 }
  0x79   : > { %p8323_p6 = pnand %p8321_p4, %p8781_p12  ;;  %p8329_p5 = scmp.lt.s32.totalorder %s8327_s2, %s8320_s16 }
  0x7b   : > { %p8324_p8 = pneg %p8323_p6  ;;  %p8330_p13 = por %p8329_p5, %p8328_p0 }
  0x7d   : > { %p8331_p1 = pnand %p8330_p13, %p8324_p8 }
  0x7f   : > { %8334 = shalt.err (!%p8331_p1)
}
  0x80   : > { %s10489_s28 = smov 4   ;;  %s8899_s17 = scalar_lea.hbm %s10441_s11, %s8866_s5 }
  0x81   : > { %7746 = dma.hbm_to_vmem [thread:$0]  (!%p8759_p9), %s8859_s13, 16384, %s8863_s7, %s10457_s4, %s10486_s3, %s10486_s3, %s10489_s28  }
  0x82   : > { %s601_s30 = scalar_lea.vmem [#allocation15], %s8757_s20  ;;  %s10458_s15 = scalar_lea.sflag [#allocation16], %s8764_s22 }
  0x83   : > { %s608_s16 = sshll.u32 %s601_s30, 4  ;;  %s8335_s24 = scalar_lea.hbm %s8899_s17, 16  ;;  %s609_s16 = int_to_ptr.vmem [resolvable:$true] %s608_s16 }
  0x84   : > { %p8336_p11 = scmp.ne.s32.totalorder %s8899_s17, %s8335_s24  ;;  %s8340_s3 = scalar_lea.hbm %s10441_s11, 32 }
  0x85   : > { %p8341_p10 = scmp.lt.u32.totalorder %s8899_s17, %s10441_s11  ;;  %p8342_p3 = scmp.lt.u32.totalorder %s8340_s3, %s8335_s24 }
  0x86   : > { %p8338_p2 = pnand %p8336_p11, %p8781_p12  ;;  %p8344_p6 = scmp.lt.u32.totalorder %s8335_s24, %s8899_s17 }
  0x87   : > { %p8343_p4 = por %p8342_p3, %p8341_p10 }
  0x88   : > { %p8339_p7 = pneg %p8338_p2 }
  0x89   : > { %p8345_p8 = por %p8344_p6, %p8343_p4 }
  0x8b   : > { %p8346_p0 = pnand %p8345_p8, %p8339_p7 }
  0x8d   : > { %8349 = shalt.err (!%p8346_p0)
}
  0x8e   : > { %s8350_s19 = scalar_lea.vmem %s609_s16, 16  ;;  %s8619_s23 = smov [#allocation15]  }
  0x8f   : > { %p8351_p5 = scmp.ne.s32.totalorder %s609_s16, %s8350_s19  ;;  %s8355_s30 = sshll.u32 %s8619_s23, 4  ;;  %s8356_s30 = int_to_ptr.vmem [resolvable:$false] %s8355_s30 }
  0x90   : > { %s8357_s2 = scalar_lea.vmem %s8356_s30, 32  ;;  %p8358_p11 = scmp.lt.s32.totalorder %s609_s16, %s8356_s30 }
  0x91   : > { %p8353_p13 = pnand %p8351_p5, %p8781_p12  ;;  %p8359_p2 = scmp.lt.s32.totalorder %s8357_s2, %s8350_s19 }
  0x93   : > { %p8354_p1 = pneg %p8353_p13  ;;  %p8360_p9 = por %p8359_p2, %p8358_p11 }
  0x95   : > { %p8361_p3 = pnand %p8360_p9, %p8354_p1 }
  0x97   : > { %8364 = shalt.err (!%p8361_p3)
}
  0x98   : > { %p10490_p10 = scmp.ne.s32.totalorder %s10479_s21, 0  ;;  %s7702_s24 = smul.u32 384, %s8757_s20 }
  0x99   : > { %s7703_s7 = smul.u32 6144, %s8607_s29  ;;  %s10491_s1 = sld [smem:[#allocation31_spill]] }
  0x9a   : > { %7752 = dma.hbm_to_vmem [thread:$0]  (!%p10490_p10), %s8899_s17, 16, %s609_s16, %s10458_s15  }
  0x9b   : > { %s446_s19 = scalar_lea.vmem [#allocation3], %s7702_s24  ;;  %s10492_s6 = sld [smem:[#allocation36_spill]] }
  0x9c   : > { %s453_s23 = sshll.u32 %s446_s19, 4  ;;  %s443_s17 = scalar_lea.sflag [#allocation4], %s8757_s20  ;;  %s8929_s23 = int_to_ptr.vmem [resolvable:$true] %s453_s23 }
  0x9f   : > { %s8927_s28 = scalar_lea.hbm %s10491_s1, %s7703_s7  ;;  %s8370_s13 = scalar_lea.hbm %s10491_s1, 12288 }
  0xa0   : > { %s8365_s16 = scalar_lea.hbm %s8927_s28, 6144  ;;  %p8371_p6 = scmp.lt.u32.totalorder %s8927_s28, %s10491_s1 }
  0xa1   : > { %s8935_s4 = scalar_lea.hbm %s10492_s6, %s8866_s5  ;;  %p8366_p9 = scmp.ne.s32.totalorder %s8927_s28, %s8365_s16 }
  0xa2   : > { %p8372_p8 = scmp.lt.u32.totalorder %s8370_s13, %s8365_s16  ;;  %p8374_p5 = scmp.lt.u32.totalorder %s8365_s16, %s8927_s28 }
  0xa3   : > { %p8368_p7 = pnand %p8366_p9, %p8781_p12 }
  0xa4   : > { %p8373_p0 = por %p8372_p8, %p8371_p6 }
  0xa5   : > { %p8369_p4 = pneg %p8368_p7 }
  0xa6   : > { %p8375_p13 = por %p8374_p5, %p8373_p0 }
  0xa8   : > { %p8376_p1 = pnand %p8375_p13, %p8369_p4 }
  0xaa   : > { %8379 = shalt.err (!%p8376_p1)
}
  0xab   : > { %s8380_s19 = scalar_lea.vmem %s8929_s23, 6144  ;;  %s8620_s30 = smov [#allocation3]  }
  0xac   : > { %p8381_p11 = scmp.ne.s32.totalorder %s8929_s23, %s8380_s19  ;;  %s8385_s2 = sshll.u32 %s8620_s30, 4  ;;  %s8386_s2 = int_to_ptr.vmem [resolvable:$false] %s8385_s2 }
  0xad   : > { %s8387_s15 = scalar_lea.vmem %s8386_s2, 12288  ;;  %p8388_p9 = scmp.lt.s32.totalorder %s8929_s23, %s8386_s2 }
  0xae   : > { %p8383_p2 = pnand %p8381_p11, %p8781_p12  ;;  %p8389_p7 = scmp.lt.s32.totalorder %s8387_s15, %s8380_s19 }
  0xb0   : > { %p8384_p3 = pneg %p8383_p2  ;;  %p8390_p6 = por %p8389_p7, %p8388_p9 }
  0xb2   : > { %p8391_p8 = pnand %p8390_p6, %p8384_p3 }
  0xb4   : > { %8394 = shalt.err (!%p8391_p8)
}
  0xb5   : > { %s8621_s16 = smov 384   ;;  %s8622_s7 = smov 24  }
  0xb6   : > { %7731 = dma.hbm_to_vmem [thread:$0]  (!%p10490_p10), %s8927_s28, 6144, %s8929_s23, %s443_s17, %s8621_s16, %s8621_s16, %s8622_s7  }
  0xb7   : > { %s506_s3 = scalar_lea.vmem [#allocation8], %s8757_s20  ;;  %s6796_s24 = sshll.u32 %s8757_s20, 4 }
  0xb8   : > { %s513_s13 = sshll.u32 %s506_s3, 4  ;;  %s8395_s19 = scalar_lea.hbm %s8935_s4, 16  ;;  %s514_s13 = int_to_ptr.vmem [resolvable:$true] %s513_s13 }
  0xb9   : > { %p8396_p4 = scmp.ne.s32.totalorder %s8935_s4, %s8395_s19  ;;  %s8400_s15 = scalar_lea.hbm %s10492_s6, 32 }
  0xba   : > { %p8401_p13 = scmp.lt.u32.totalorder %s8935_s4, %s10492_s6  ;;  %p8402_p1 = scmp.lt.u32.totalorder %s8400_s15, %s8395_s19 }
  0xbb   : > { %p8398_p0 = pnand %p8396_p4, %p8781_p12  ;;  %p8404_p2 = scmp.lt.u32.totalorder %s8395_s19, %s8935_s4 }
  0xbc   : > { %p8403_p11 = por %p8402_p1, %p8401_p13 }
  0xbd   : > { %p8399_p5 = pneg %p8398_p0 }
  0xbe   : > { %p8405_p3 = por %p8404_p2, %p8403_p11 }
  0xc0   : > { %p8406_p9 = pnand %p8405_p3, %p8399_p5 }
  0xc2   : > { %8409 = shalt.err (!%p8406_p9)
}
  0xc3   : > { %s8410_s28 = scalar_lea.vmem %s514_s13, 16  ;;  %s8623_s23 = smov [#allocation8]  }
  0xc4   : > { %p8411_p7 = scmp.ne.s32.totalorder %s514_s13, %s8410_s28  ;;  %s8415_s17 = sshll.u32 %s8623_s23, 4  ;;  %s8416_s17 = int_to_ptr.vmem [resolvable:$false] %s8415_s17 }
  0xc5   : > { %s8417_s16 = scalar_lea.vmem %s8416_s17, 32  ;;  %p8418_p4 = scmp.lt.s32.totalorder %s514_s13, %s8416_s17 }
  0xc6   : > { %p8413_p6 = pnand %p8411_p7, %p8781_p12  ;;  %p8419_p0 = scmp.lt.s32.totalorder %s8417_s16, %s8410_s28 }
  0xc8   : > { %p8414_p8 = pneg %p8413_p6  ;;  %p8420_p10 = por %p8419_p0, %p8418_p4 }
  0xca   : > { %p8421_p1 = pnand %p8420_p10, %p8414_p8 }
  0xcc   : > { %8424 = shalt.err (!%p8421_p1)
}
  0xcd   : > { %p10493_p13 = scmp.ne.s32.totalorder %s10479_s21, 0  ;;  %s10494_s1 = scalar_lea.sflag [#allocation7], %s8764_s22 }
  0xce   : > { %s7176_s27 = sshll.u32 %s8607_s29, 8  ;;  %s545_s7 = scalar_lea.vmem [#allocation11], %s6796_s24 }
  0xcf   : > { %7737 = dma.hbm_to_vmem [thread:$0]  (!%p10493_p13), %s8935_s4, 16, %s514_s13, %s10494_s1  }
  0xd0   : > { %s553_s3 = sshll.u32 %s545_s7, 4  ;;  %s10495_s8 = sld [smem:[#allocation38_spill]]  ;;  %s554_s3 = int_to_ptr.vmem [resolvable:$true] %s553_s3 }
  0xd6   : > { %s551_s2 = scalar_lea.hbm %s10495_s8, %s7176_s27  ;;  %s8430_s17 = scalar_lea.hbm %s10495_s8, 512 }
  0xd7   : > { %s8425_s15 = scalar_lea.hbm %s551_s2, 256  ;;  %p8431_p2 = scmp.lt.u32.totalorder %s551_s2, %s10495_s8 }
  0xd8   : > { %p8426_p10 = scmp.ne.s32.totalorder %s551_s2, %s8425_s15  ;;  %p8432_p3 = scmp.lt.u32.totalorder %s8430_s17, %s8425_s15 }
  0xd9   : > { %p8434_p7 = scmp.lt.u32.totalorder %s8425_s15, %s551_s2 }
  0xda   : > { %p8428_p5 = pnand %p8426_p10, %p8781_p12  ;;  %p8433_p9 = por %p8432_p3, %p8431_p2 }
  0xdc   : > { %p8429_p11 = pneg %p8428_p5  ;;  %p8435_p6 = por %p8434_p7, %p8433_p9 }
  0xde   : > { %p8436_p8 = pnand %p8435_p6, %p8429_p11 }
  0xe0   : > { %8439 = shalt.err (!%p8436_p8)
}
  0xe1   : > { %s8440_s13 = scalar_lea.vmem %s554_s3, 256  ;;  %s8624_s24 = smov [#allocation11]  }
  0xe2   : > { %p8441_p4 = scmp.ne.s32.totalorder %s554_s3, %s8440_s13  ;;  %s8445_s1 = sshll.u32 %s8624_s24, 4  ;;  %s8446_s1 = int_to_ptr.vmem [resolvable:$false] %s8445_s1 }
  0xe3   : > { %s8447_s27 = scalar_lea.vmem %s8446_s1, 512  ;;  %p8448_p10 = scmp.lt.s32.totalorder %s554_s3, %s8446_s1 }
  0xe4   : > { %p8443_p0 = pnand %p8441_p4, %p8781_p12  ;;  %p8449_p5 = scmp.lt.s32.totalorder %s8447_s27, %s8440_s13 }
  0xe6   : > { %p8444_p1 = pneg %p8443_p0  ;;  %p8450_p13 = por %p8449_p5, %p8448_p10 }
  0xe8   : > { %p8451_p2 = pnand %p8450_p13, %p8444_p1 }
  0xea   : > { %8454 = shalt.err (!%p8451_p2)
}
  0xeb   : > { %p10496_p3 = scmp.ne.s32.totalorder %s10479_s21, 0  ;;  %s10497_s7 = scalar_lea.sflag [#allocation10], %s8764_s22 }
  0xec   : > { %s10498_s10 = sld [smem:[#allocation40_spill]]  ;;  %s584_s28 = scalar_lea.vmem [#allocation14], %s8757_s20 }
  0xed   : > { %7743 = dma.hbm_to_vmem [thread:$0]  (!%p10496_p3), %s551_s2, 256, %s554_s3, %s10497_s7  }
  0xee   : > { %s591_s23 = sshll.u32 %s584_s28, 4  ;;  %s9013_s4 = scalar_lea.hbm %s10442_s12, %s8866_s5  ;;  %s592_s23 = int_to_ptr.vmem [resolvable:$true] %s591_s23 }
  0xf2   : > { %s9006_s15 = scalar_lea.hbm %s10498_s10, %s8866_s5  ;;  %s8460_s24 = scalar_lea.hbm %s10498_s10, 32 }
  0xf3   : > { %s8455_s13 = scalar_lea.hbm %s9006_s15, 16  ;;  %p8461_p7 = scmp.lt.u32.totalorder %s9006_s15, %s10498_s10 }
  0xf4   : > { %p8456_p13 = scmp.ne.s32.totalorder %s9006_s15, %s8455_s13  ;;  %p8462_p6 = scmp.lt.u32.totalorder %s8460_s24, %s8455_s13 }
  0xf5   : > { %p8464_p4 = scmp.lt.u32.totalorder %s8455_s13, %s9006_s15 }
  0xf6   : > { %p8458_p11 = pnand %p8456_p13, %p8781_p12  ;;  %p8463_p8 = por %p8462_p6, %p8461_p7 }
  0xf8   : > { %p8459_p9 = pneg %p8458_p11  ;;  %p8465_p0 = por %p8464_p4, %p8463_p8 }
  0xfa   : > { %p8466_p1 = pnand %p8465_p0, %p8459_p9 }
  0xfc   : > { %8469 = shalt.err (!%p8466_p1)
}
  0xfd   : > { %s8470_s5 = scalar_lea.vmem %s592_s23, 16  ;;  %s8625_s7 = smov [#allocation14]  }
  0xfe   : > { %p8471_p10 = scmp.ne.s32.totalorder %s592_s23, %s8470_s5  ;;  %s8475_s19 = sshll.u32 %s8625_s7, 4  ;;  %s8476_s19 = int_to_ptr.vmem [resolvable:$false] %s8475_s19 }
  0xff   : > { %s8477_s30 = scalar_lea.vmem %s8476_s19, 32  ;;  %p8478_p13 = scmp.lt.s32.totalorder %s592_s23, %s8476_s19 }
 0x100   : > { %p8473_p5 = pnand %p8471_p10, %p8781_p12  ;;  %p8479_p11 = scmp.lt.s32.totalorder %s8477_s30, %s8470_s5 }
 0x102   : > { %p8474_p2 = pneg %p8473_p5  ;;  %p8480_p3 = por %p8479_p11, %p8478_p13 }
 0x104   : > { %p8481_p6 = pnand %p8480_p3, %p8474_p2 }
 0x106   : > { %8484 = shalt.err (!%p8481_p6)
}
 0x107   : > { %p10499_p7 = scmp.ne.s32.totalorder %s10479_s21, 0  ;;  %s10500_s28 = scalar_lea.sflag [#allocation13], %s8764_s22 }
 0x108   : > { %s618_s17 = scalar_lea.vmem [#allocation17], %s8757_s20  ;;  %s8485_s13 = scalar_lea.hbm %s9013_s4, 16 }
 0x109   : > { %7749 = dma.hbm_to_vmem [thread:$0]  (!%p10499_p7), %s9006_s15, 16, %s592_s23, %s10500_s28  }
 0x10a   : > { %s625_s16 = sshll.u32 %s618_s17, 4  ;;  %p8486_p9 = scmp.ne.s32.totalorder %s9013_s4, %s8485_s13  ;;  %s626_s16 = int_to_ptr.vmem [resolvable:$true] %s625_s16 }
 0x10b   : > { %s8490_s24 = scalar_lea.hbm %s10442_s12, 32  ;;  %p8491_p4 = scmp.lt.u32.totalorder %s9013_s4, %s10442_s12 }
 0x10c   : > { %p8488_p3 = pnand %p8486_p9, %p8781_p12  ;;  %p8492_p0 = scmp.lt.u32.totalorder %s8490_s24, %s8485_s13 }
 0x10d   : > { %p8494_p10 = scmp.lt.u32.totalorder %s8485_s13, %s9013_s4 }
 0x10e   : > { %p8489_p8 = pneg %p8488_p3  ;;  %p8493_p1 = por %p8492_p0, %p8491_p4 }
 0x110   : > { %p8495_p5 = por %p8494_p10, %p8493_p1 }
 0x112   : > { %p8496_p2 = pnand %p8495_p5, %p8489_p8 }
 0x114   : > { %8499 = shalt.err (!%p8496_p2)
}
 0x115   : > { %s8500_s20 = scalar_lea.vmem %s626_s16, 16  ;;  %s8626_s15 = smov [#allocation17]  }
 0x116   : > { %p8501_p13 = scmp.ne.s32.totalorder %s626_s16, %s8500_s20  ;;  %s8505_s23 = sshll.u32 %s8626_s15, 4  ;;  %s8506_s23 = int_to_ptr.vmem [resolvable:$false] %s8505_s23 }
 0x117   : > { %s8507_s5 = scalar_lea.vmem %s8506_s23, 32  ;;  %p8508_p9 = scmp.lt.s32.totalorder %s626_s16, %s8506_s23 }
 0x118   : > { %p8503_p11 = pnand %p8501_p13, %p8781_p12  ;;  %p8509_p3 = scmp.lt.s32.totalorder %s8507_s5, %s8500_s20 }
 0x11a   : > { %p8504_p6 = pneg %p8503_p11  ;;  %p8510_p7 = por %p8509_p3, %p8508_p9 }
 0x11c   : > { %p8511_p0 = pnand %p8510_p7, %p8504_p6 }
 0x11e   : > { %8514 = shalt.err (!%p8511_p0)
}
 0x11f   : > { %p10501_p4 = scmp.ne.s32.totalorder %s10479_s21, 0  ;;  %s10502_s7 = scalar_lea.sflag [#allocation16], %s8764_s22 }
 0x120   : > { %p10503_p8 = scmp.ne.s32.totalorder %s10484_s25, 0 }
 0x121   : > { %7755 = dma.hbm_to_vmem [thread:$0]  (!%p10501_p4), %s9013_s4, 16, %s626_s16, %s10502_s7  }
 0x122   : > { %634 = sbr.rel (%p10503_p8) target bundleno = 3126 (0xc36), region = 72  ;;  %s9057_s0 = sand.u32 (!%p10503_p8), 1, %s8595_s26  }
 0x123   : > { %s7704_s19 = smul.u32 (!%p10503_p8), 384, %s9057_s0  ;;  %s637_s30 = scalar_lea.sflag (!%p10503_p8), [#allocation4], %s9057_s0 }
 0x124   : > { %p10504_p12 = scmp.ne.s32.totalorder (!%p10503_p8), %s10477_s18, 0 }
 0x125   : > { %s9061_s28 = scalar_lea.vmem (!%p10503_p8), [#allocation3], %s7704_s19 }
 0x129   : > { %8566 = dma.done.wait (%p10504_p12), %s637_s30, 6144  }
 0x12a   : > { %8568 = vsyncadd (%p10504_p12), %s637_s30, 4294961152  ;;  %s645_s21 = sand.u32 1, %s8735_s14   ;;  %s6806_s22 = sshll.u32 %s9057_s0, 7 }
 0x12b   : > { %s646_s25 = scalar_lea.sflag [#allocation7], %s645_s21  ;;  %s9069_s4 = scalar_lea.vmem [#allocation6], %s6806_s22 }
 0x12c   : > { %8570 = dma.done.wait (%p10504_p12), %s646_s25, 2064  }
 0x12d   : > { %8572 = vsyncadd (%p10504_p12), %s646_s25, 4294965232  ;;  %s6807_s17 = sshll.u32 %s9057_s0, 10  ;;  %s663_s13 = scalar_lea.sflag [#allocation10], %s645_s21 }
 0x12e   : > { %s9077_s3 = scalar_lea.vmem [#allocation9], %s6807_s17 }
 0x12f   : > { %8574 = dma.done.wait (%p10504_p12), %s663_s13, 16640  }
 0x130   : > { %8576 = vsyncadd (%p10504_p12), %s663_s13, 4294950656  ;;  %s6808_s2 = sshll.u32 %s9057_s0, 4  ;;  %s681_s1 = scalar_lea.sflag [#allocation13], %s645_s21 }
 0x131   : > { %s9084_s24 = scalar_lea.vmem [#allocation11], %s6808_s2  ;;  %s9086_s27 = scalar_lea.vmem [#allocation12], %s6807_s17 }
 0x132   : > { %8578 = dma.done.wait (%p10504_p12), %s681_s1, 16400  }
 0x133   : > { %8580 = vsyncadd (%p10504_p12), %s681_s1, 4294950896  ;;  %s698_s15 = scalar_lea.sflag [#allocation16], %s645_s21 }
 0x134   : > { %8582 = dma.done.wait (%p10504_p12), %s698_s15, 32  }
 0x135   : > { %8584 = vsyncadd (%p10504_p12), %s698_s15, 4294967264  ;;  %s10505_s5 = sld [smem:[#allocation26_spill]]  ;;  %s10506_s25 = sld [smem:[#allocation34_spill]] }
 0x136   : > { %s10507_s2 = sld [smem:[#allocation35_spill]]  ;;  %s10508_s23 = sld [smem:[#allocation32_spill]] }
 0x137   : > { %s708_s16 = scalar_lea.vmem [#allocation17], %s9057_s0 }
 0x13b   : > { %p803_p7 = scmp.lt.s32.totalorder %s10505_s5, 1  ;;  %p6810_p1 = scmp.ne.s32.totalorder %s10505_s5, 0 }
 0x13c   : > { %s10509_s9 = sld [smem:[#allocation30_spill]] (!%p6810_p1) }
 0x13d   : > { %s9100_s7 = scalar_select %p803_p7, %s10505_s5, 1 }
 0x13e   : > { %818 = sbr.rel (%p6810_p1) target bundleno = 325 (0x145), region = 112 }
 0x13f   : > { %s7705_s19 = smul.u32 6, %s9100_s7  ;;  %s809_s21 = scalar_lea.vmem %s10506_s25, %s9100_s7 }
 0x140   : > { %s812_s1 = scalar_lea.vmem %s10507_s2, %s9100_s7 }
 0x141   : > { %s9114_s20 = scalar_lea.vmem %s10508_s23, %s7705_s19 }
 0x142   : > { %v819_v0 = vld [vmem:[%s10509_s9] sm:$0xff] (!%p6810_p1)  ;;  %v820_v1 = vld [vmem:[%s10509_s9 + $0x8] sm:$0xff] (!%p6810_p1)  ;;  %v821_v2 = vld [vmem:[%s10509_s9 + $0x10] sm:$0xff] (!%p6810_p1) }
 0x143   : > { %823 = vst [vmem:[#allocation2] sm:$0xff] (!%p6810_p1), %v819_v0  ;;  %824 = vst [vmem:[#allocation2 + $0x8] sm:$0xff] (!%p6810_p1), %v820_v1  ;;  %v822_v3 = vld [vmem:[%s10509_s9 + $0x18] sm:$0xff] (!%p6810_p1) }
 0x144   : > { %825 = vst [vmem:[#allocation2 + $0x10] sm:$0xff] (!%p6810_p1), %v821_v2  ;;  %826 = vst [vmem:[#allocation2 + $0x18] sm:$0xff] (!%p6810_p1), %v822_v3 }
 0x145 PF: > { %v7881_v4 = vld [vmem:[%s9061_s28 + $0xc] ss:$24 sps:$4 sm:$0xff]   ;;  %v7883_v5 = vld [vmem:[%s9061_s28 + $0x8] ss:$24 sps:$4 sm:$0xff]   ;;  %v8627_v6 = vmov 0   ;;  %v8628_v59 = vmov 0.0   ;;  %v883_v60 = vlaneseq }
 0x146   : > { %1238 = vmatprep.mubr.bf16.mxu1 %v8627_v6  ;;  %1185 = vmatprep.mubr.bf16.mxu0 %v8627_v6  ;;  %v7884_v7 = vld [vmem:[%s9061_s28 + $0x4] ss:$24 sps:$4 sm:$0xff]   ;;  %v7888_v9 = vld [vmem:[%s9061_s28] ss:$24 sps:$4 sm:$0xff]   ;;  %v7890_v11 = vld [vmem:[%s9061_s28 + $0x34] ss:$24 sps:$4 sm:$0xff]  }
 0x147   : > { %1206 = vmatprep.subr.bf16.mxu1 %v7881_v4  ;;  %v7886_v8 = vld [vmem:[%s9061_s28 + $0x3c] ss:$24 sps:$4 sm:$0xff]   ;;  %v7889_v10 = vld [vmem:[%s9061_s28 + $0x38] ss:$24 sps:$4 sm:$0xff]   ;;  %1153 = vmatprep.subr.bf16.mxu0 %v7884_v7  ;;  %v7892_v12 = vld [vmem:[%s9061_s28 + $0x6c] ss:$24 sps:$4 sm:$0xff]  }
 0x148   : > { %1207 = vmatpush1.bf16.msra.mxu1 %v7883_v5  ;;  %1154 = vmatpush1.bf16.msra.mxu0 %v7888_v9  ;;  %v7894_v13 = vld [vmem:[%s9061_s28 + $0x30] ss:$24 sps:$4 sm:$0xff]   ;;  %v7896_v15 = vld [vmem:[%s9061_s28 + $0x64] ss:$24 sps:$4 sm:$0xff]   ;;  %v7900_v17 = vld [vmem:[%s9061_s28 + $0x60] ss:$24 sps:$4 sm:$0xff]  }
 0x149   : > { %1208 = vmatprep.subr.bf16.mxu1 %v7886_v8  ;;  %1155 = vmatprep.subr.bf16.mxu0 %v7890_v11  ;;  %v7895_v14 = vld [vmem:[%s9061_s28 + $0x68] ss:$24 sps:$4 sm:$0xff]   ;;  %v7898_v16 = vld [vmem:[%s9061_s28 + $0x9c] ss:$24 sps:$4 sm:$0xff]   ;;  %v7901_v19 = vld [vmem:[%s9061_s28 + $0x98] ss:$24 sps:$4 sm:$0xff]  }
 0x14a   : > { %v7902_v18 = vld [vmem:[%s9061_s28 + $0x94] ss:$24 sps:$4 sm:$0xff]   ;;  %v7906_v21 = vld [vmem:[%s9061_s28 + $0x90] ss:$24 sps:$4 sm:$0xff]   ;;  %v7908_v22 = vld [vmem:[%s9061_s28 + $0xc4] ss:$24 sps:$4 sm:$0xff]  }
 0x14b   : > { %v7904_v20 = vld [vmem:[%s9061_s28 + $0xcc] ss:$24 sps:$4 sm:$0xff]   ;;  %v7907_v23 = vld [vmem:[%s9061_s28 + $0xc8] ss:$24 sps:$4 sm:$0xff]   ;;  %v7910_v24 = vld [vmem:[%s9061_s28 + $0xfc] ss:$24 sps:$4 sm:$0xff]  }
 0x14c   : > { %1209 = vmatpush1.bf16.msra.mxu1 %v7889_v10  ;;  %1156 = vmatpush1.bf16.msra.mxu0 %v7894_v13  ;;  %v7912_v25 = vld [vmem:[%s9061_s28 + $0xc0] ss:$24 sps:$4 sm:$0xff]   ;;  %v7914_v26 = vld [vmem:[%s9061_s28 + $0xf4] ss:$24 sps:$4 sm:$0xff]   ;;  %v7918_v29 = vld [vmem:[%s9061_s28 + $0xf0] ss:$24 sps:$4 sm:$0xff]  }
 0x14d   : > { %1210 = vmatprep.subr.bf16.mxu1 %v7892_v12  ;;  %1157 = vmatprep.subr.bf16.mxu0 %v7896_v15  ;;  %v7913_v27 = vld [vmem:[%s9061_s28 + $0xf8] ss:$24 sps:$4 sm:$0xff]   ;;  %v7916_v28 = vld [vmem:[%s9061_s28 + $0x12c] ss:$24 sps:$4 sm:$0xff]   ;;  %v7919_v31 = vld [vmem:[%s9061_s28 + $0x128] ss:$24 sps:$4 sm:$0xff]  }
 0x14e   : > { %v7920_v30 = vld [vmem:[%s9061_s28 + $0x124] ss:$24 sps:$4 sm:$0xff]   ;;  %v7924_v33 = vld [vmem:[%s9061_s28 + $0x120] ss:$24 sps:$4 sm:$0xff]   ;;  %v7926_v35 = vld [vmem:[%s9061_s28 + $0x154] ss:$24 sps:$4 sm:$0xff]  }
 0x14f   : > { %v7922_v32 = vld [vmem:[%s9061_s28 + $0x15c] ss:$24 sps:$4 sm:$0xff]   ;;  %v7925_v34 = vld [vmem:[%s9061_s28 + $0x158] ss:$24 sps:$4 sm:$0xff]   ;;  %v827_v36 = vld [vmem:[#allocation2] sm:$0xff]  ;;  %vm8629_vm0 = vmmov 0  }
 0x150   : > { %1211 = vmatpush1.bf16.msra.mxu1 %v7895_v14  ;;  %1158 = vmatpush1.bf16.msra.mxu0 %v7900_v17  ;;  %v828_v37 = vld [vmem:[#allocation2 + $0x8] sm:$0xff]  ;;  %v829_v41 = vld [vmem:[#allocation2 + $0x10] sm:$0xff]  ;;  %v830_v42 = vld [vmem:[#allocation2 + $0x18] sm:$0xff]  ;;  %v9190_v61 = vshrl.u32 %v883_v60, 7  ;;  %vm1420_vm1 = vcmask 261120   ;;  %s8630_s6 = smov 64  }
 0x151   : > { %1212 = vmatprep.subr.bf16.mxu1 %v7898_v16  ;;  %1159 = vmatprep.subr.bf16.mxu0 %v7902_v18  ;;  %v7928_v38 = vld [vmem:[%s9061_s28 + $0x150] ss:$24 sps:$4 sm:$0xff]   ;;  %v831_v39 = vpack.c.bf16 %v828_v37, %v827_v36  ;;  %v7931_v40 = vld [vmem:[%s9061_s28 + $0x14] ss:$24 sps:$4 sm:$0xff]   ;;  %v7934_v44 = vld [vmem:[%s9061_s28 + $0x44] ss:$24 sps:$4 sm:$0xff]   ;;  %v832_v47 = vpack.c.bf16 %v830_v42, %v829_v41 }
 0x152   : > { %v7929_v43 = vld [vmem:[%s9061_s28 + $0x10] ss:$24 sps:$4 sm:$0xff]   ;;  %v7932_v45 = vld [vmem:[%s9061_s28 + $0x40] ss:$24 sps:$4 sm:$0xff]   ;;  %v7937_v46 = vld [vmem:[%s9061_s28 + $0x74] ss:$24 sps:$4 sm:$0xff]  }
 0x153   : > { %v7935_v48 = vld [vmem:[%s9061_s28 + $0x70] ss:$24 sps:$4 sm:$0xff]   ;;  %v7940_v49 = vld [vmem:[%s9061_s28 + $0xa4] ss:$24 sps:$4 sm:$0xff]   ;;  %v7938_v50 = vld [vmem:[%s9061_s28 + $0xa0] ss:$24 sps:$4 sm:$0xff]  }
 0x154   : > { %1213 = vmatpush1.bf16.msra.mxu1 %v7901_v19  ;;  %1160 = vmatpush1.bf16.msra.mxu0 %v7906_v21  ;;  %v7943_v51 = vld [vmem:[%s9061_s28 + $0xd4] ss:$24 sps:$4 sm:$0xff]   ;;  %v7941_v52 = vld [vmem:[%s9061_s28 + $0xd0] ss:$24 sps:$4 sm:$0xff]   ;;  %v7946_v53 = vld [vmem:[%s9061_s28 + $0x104] ss:$24 sps:$4 sm:$0xff]  }
 0x155   : > { %1214 = vmatprep.subr.bf16.mxu1 %v7904_v20  ;;  %1161 = vmatprep.subr.bf16.mxu0 %v7908_v22  ;;  %v7944_v54 = vld [vmem:[%s9061_s28 + $0x100] ss:$24 sps:$4 sm:$0xff]   ;;  %v7949_v55 = vld [vmem:[%s9061_s28 + $0x134] ss:$24 sps:$4 sm:$0xff]   ;;  %v7947_v56 = vld [vmem:[%s9061_s28 + $0x130] ss:$24 sps:$4 sm:$0xff]  }
 0x156   : > { %v7952_v57 = vld [vmem:[%s9061_s28 + $0x164] ss:$24 sps:$4 sm:$0xff]   ;;  %v7950_v58 = vld [vmem:[%s9061_s28 + $0x160] ss:$24 sps:$4 sm:$0xff]   ;;  %v9193_v62 = vsub.s32 2, %v9190_v61  ;;  %v9196_v63 = vsub.s32 0, %v9190_v61 }
 0x157   : > { %v9199_v0 = vld [vmem:[%s9114_s20] sm:$0x3f]  ;;  %v9202_v1 = vsub.s32 3, %v9190_v61  ;;  %v9205_v2 = vsub.s32 1, %v9190_v61  ;;  %s8631_s8 = smov 96   ;;  %s8632_s10 = smov 32  }
 0x158   : > { %1215 = vmatpush1.bf16.msra.mxu1 %v7907_v23  ;;  %1162 = vmatpush1.bf16.msra.mxu0 %v7912_v25  ;;  %v894_v3 = vrot.slane %v9199_v0, %v9193_v62  ;;  %v886_v4 = vrot.slane %v9199_v0, %v9196_v63  ;;  %vm2173_vm2 = vcmask 130048   ;;  %vm3346_vm3 = vcmask 523264   ;;  %s10512_s13 = scalar_lea.vmem [#allocation8], %s9057_s0 }
 0x159   : > { %1216 = vmatprep.subr.bf16.mxu1 %v7910_v24  ;;  %1163 = vmatprep.subr.bf16.mxu0 %v7914_v26  ;;  %v898_v7 = vrot.slane %v9199_v0, %v9202_v1  ;;  %v890_v8 = vrot.slane %v9199_v0, %v9205_v2  ;;  %vm3351_vm4 = vcmask 785408  }
 0x15c   : > { %1217 = vmatpush1.bf16.msra.mxu1 %v7913_v27  ;;  %1164 = vmatpush1.bf16.msra.mxu0 %v7918_v29 }
 0x15d   : > { %1218 = vmatprep.subr.bf16.mxu1 %v7916_v28  ;;  %1165 = vmatprep.subr.bf16.mxu0 %v7920_v30 }
 0x160   : > { %1219 = vmatpush1.bf16.msra.mxu1 %v7919_v31  ;;  %1166 = vmatpush1.bf16.msra.mxu0 %v7924_v33 }
 0x161   : > { %1220 = vmatprep.subr.bf16.mxu1 %v7922_v32  ;;  %1167 = vmatprep.subr.bf16.mxu0 %v7926_v35 }
 0x164   : > { %1221 = vmatpush1.bf16.msra.mxu1 %v7925_v34  ;;  %1168 = vmatpush1.bf16.msra.mxu0 %v7928_v38 }
 0x165   : > { %7686 = vmatprep.subr.bf16.mxu1 %v7931_v40  ;;  %1259 = vmatprep.subr.bf16.mxu0 %v7931_v40 }
 0x167   : > { %1239 = vmatmul.mubr.bf16.vlgmr.msra.gmra.mrb[0].mxu1 %v831_v39  ;;  %1186 = vmatmul.mubr.bf16.vlgmr.msra.gmra.mrb[0].mxu0 %v831_v39 }
 0x168   : > { %1248 = vmatprep.mubr.bf16.mxu1 %v8627_v6  ;;  %7694 = vmatpush1.bf16.msra.mxu1 %v7929_v43 }
 0x169   : > { %7687 = vmatprep.subr.bf16.mxu1 %v7934_v44  ;;  %1195 = vmatprep.mubr.bf16.mxu0 %v8627_v6 }
 0x16a   : > { %1260 = vmatpush1.bf16.msra.mxu0 %v7929_v43 }
 0x16b   : > { %1261 = vmatprep.subr.bf16.mxu0 %v7934_v44 }
 0x16c   : > { %7695 = vmatpush1.bf16.msra.mxu1 %v7932_v45 }
 0x16d   : > { %7688 = vmatprep.subr.bf16.mxu1 %v7937_v46 }
 0x16e   : > { %1262 = vmatpush1.bf16.msra.mxu0 %v7932_v45 }
 0x16f   : > { %1249 = vmatmul.mubr.bf16.gmra.mrb[4].mxu1 %v832_v47  ;;  %1263 = vmatprep.subr.bf16.mxu0 %v7937_v46 }
 0x170   : > { %7696 = vmatpush1.bf16.msra.mxu1 %v7935_v48  ;;  %1301 = vmatprep.mubr.bf16.mxu1 %v8627_v6 }
 0x171   : > { %1196 = vmatmul.mubr.bf16.gmra.mrb[4].mxu0 %v832_v47  ;;  %7689 = vmatprep.subr.bf16.mxu1 %v7940_v49 }
 0x172   : > { %1264 = vmatpush1.bf16.msra.mxu0 %v7935_v48  ;;  %1291 = vmatprep.mubr.bf16.mxu0 %v8627_v6 }
 0x173   : > { %1265 = vmatprep.subr.bf16.mxu0 %v7940_v49 }
 0x174   : > { %7697 = vmatpush1.bf16.msra.mxu1 %v7938_v50 }
 0x175   : > { %7690 = vmatprep.subr.bf16.mxu1 %v7943_v51 }
 0x176   : > { %1266 = vmatpush1.bf16.msra.mxu0 %v7938_v50  ;;  %v9266_v50 = vsub.s32 4, %v9190_v61 }
 0x177   : > { %1267 = vmatprep.subr.bf16.mxu0 %v7943_v51 }
 0x178   : > { %7698 = vmatpush1.bf16.msra.mxu1 %v7941_v52 }
 0x179   : > { %7691 = vmatprep.subr.bf16.mxu1 %v7946_v53 }
 0x17a   : > { %1268 = vmatpush1.bf16.msra.mxu0 %v7941_v52 }
 0x17b   : > { %1269 = vmatprep.subr.bf16.mxu0 %v7946_v53  ;;  %v902_v53 = vrot.slane %v9199_v0, %v9266_v50 }
 0x17c   : > { %7699 = vmatpush1.bf16.msra.mxu1 %v7944_v54 }
 0x17d   : > { %7692 = vmatprep.subr.bf16.mxu1 %v7949_v55 }
 0x17e   : > { %1270 = vmatpush1.bf16.msra.mxu0 %v7944_v54 }
 0x17f   : > { %1271 = vmatprep.subr.bf16.mxu0 %v7949_v55 }
 0x180   : > { %7700 = vmatpush1.bf16.msra.mxu1 %v7947_v56 }
 0x181   : > { %7693 = vmatprep.subr.bf16.mxu1 %v7952_v57 }
 0x182   : > { %1272 = vmatpush1.bf16.msra.mxu0 %v7947_v56  ;;  %v9275_v56 = vsub.s32 5, %v9190_v61 }
 0x183   : > { %1273 = vmatprep.subr.bf16.mxu0 %v7952_v57 }
 0x184   : > { %7701 = vmatpush1.bf16.msra.mxu1 %v7950_v58  ;;  %v906_v60 = vrot.slane %v9199_v0, %v9275_v56 }
 0x185   : > { %7494 = vmatprep.subr.bf16.mxu1 %v8628_v59 }
 0x186   : > { %1274 = vmatpush1.bf16.msra.mxu0 %v7950_v58 }
 0x187   : > { %1302 = vmatmul.mubr.bf16.vlgmr.msra.gmra.mrb[8].mxu1 %v832_v47  ;;  %7518 = vmatprep.subr.bf16.mxu0 %v8628_v59 }
 0x188   : > { %7496 = vmatprep.mubr.msk.bf16.mxu1 %vm8629_vm0, %v8628_v59 }
 0x189   : > { %1292 = vmatmul.mubr.bf16.vlgmr.msra.gmra.mrb[8].mxu0 %v831_v39 }
 0x18a   : > { %7520 = vmatprep.mubr.msk.bf16.mxu0 %vm8629_vm0, %v8628_v59 }
 0x23a   : > { %v1240_v5 = vpop.f32.mrb[0].mxu1  ;;  %v1187_v11 = vpop.f32.mrb[0].mxu0 }
 0x23b   : > { %v1242_v9 = vpop.f32.mrb[1].mxu1  ;;  %v1241_v12 = vadd.f32 %v1240_v5, %v894_v3  ;;  %v1188_v15 = vadd.f32 %v1187_v11, %v886_v4  ;;  %v1189_v16 = vpop.f32.mrb[1].mxu0 }
 0x23c   : > { %v1244_v10 = vpop.f32.mrb[2].mxu1  ;;  %v1243_v17 = vadd.f32 %v1242_v9, %v898_v7  ;;  %v1190_v19 = vadd.f32 %v1189_v16, %v890_v8  ;;  %v1191_v20 = vpop.f32.mrb[2].mxu0 }
 0x23d   : > { %v1245_v13 = vadd.f32 %v1244_v10, %v894_v3  ;;  %v1246_v14 = vpop.f32.mrb[3].mxu1  ;;  %v1192_v22 = vadd.f32 %v1191_v20, %v886_v4  ;;  %v1193_v23 = vpop.f32.mrb[3].mxu0 }
 0x23e   : > { %v1247_v18 = vadd.f32 %v1246_v14, %v898_v7  ;;  %v1194_v25 = vadd.f32 %v1193_v23, %v890_v8 }
 0x23f   : > { %v1314_v21 = vpack.c.bf16 %v1245_v13, %v1241_v12  ;;  %v1312_v26 = vpack.c.bf16 %v1192_v22, %v1188_v15 }
 0x240   : > { %v9215_v24 = vpack.c.bf16 %v1247_v18, %v1243_v17  ;;  %v9220_v29 = vpack.c.bf16 %v1194_v25, %v1190_v19 }
 0x241   : > { %1358 = vrot.lane.b32.xlu1 %v1314_v21, %s8630_s6  ;;  %1354 = vrot.lane.b32.xlu0 %v1314_v21, %s8631_s8  ;;  %v1425_v27 = vsel %vm1420_vm1, %v1314_v21, 0 }
 0x242   : > { %v1250_v28 = vpop.f32.mrb[4].mxu1  ;;  %7495 = vmatpush3.bf16.xpose.msra.mxu1 %v1425_v27 }
 0x243   : > { %v1251_v30 = vadd.f32 %v1250_v28, %v894_v3  ;;  %v1252_v31 = vpop.f32.mrb[5].mxu1  ;;  %7500 = vmatprep.subr.bf16.mxu1 %v8628_v59 }
 0x244   : > { %v1253_v32 = vadd.f32 %v1252_v31, %v898_v7  ;;  %v1254_v33 = vpop.f32.mrb[6].mxu1  ;;  %v1197_v34 = vpop.f32.mrb[4].mxu0 }
 0x245   : > { %v1255_v35 = vadd.f32 %v1254_v33, %v894_v3  ;;  %1330 = vrot.lane.b32.xlu1 %v1312_v26, %s8630_s6  ;;  %1326 = vrot.lane.b32.xlu0 %v1312_v26, %s8631_s8  ;;  %v1198_v36 = vadd.f32 %v1197_v34, %v886_v4  ;;  %v1199_v37 = vpop.f32.mrb[5].mxu0  ;;  %v1256_v38 = vpop.f32.mrb[7].mxu1 }
 0x246   : > { %v1200_v39 = vadd.f32 %v1199_v37, %v890_v8  ;;  %v1201_v40 = vpop.f32.mrb[6].mxu0  ;;  %v1257_v41 = vadd.f32 %v1256_v38, %v898_v7 }
 0x247   : > { %v1320_v42 = vpack.c.bf16 %v1255_v35, %v1251_v30  ;;  %v1202_v43 = vadd.f32 %v1201_v40, %v886_v4  ;;  %v1203_v44 = vpop.f32.mrb[7].mxu0 }
 0x248   : > { %v9225_v45 = vpack.c.bf16 %v1257_v41, %v1253_v32  ;;  %v1204_v46 = vadd.f32 %v1203_v44, %v890_v8  ;;  %v1801_v32 = vsel %vm1420_vm1, %v9215_v24, 0 }
 0x249   : > { %1334 = vrot.lane.b32.xlu1 %v1312_v26, %s8632_s10  ;;  %1362 = vrot.lane.b32.xlu0 %v1314_v21, %s8632_s10  ;;  %v1472_v47 = vsel %vm1420_vm1, %v1320_v42, 0  ;;  %v1318_v48 = vpack.c.bf16 %v1202_v43, %v1198_v36 }
 0x24a   : > { %7497 = vmatmul.mubr.msk.bf16.vlgmr.msra.gmra.mrb[12].mxu1 %vm1420_vm1, %v1312_v26  ;;  %v9231_v49 = vpack.c.bf16 %v1204_v46, %v1200_v39 }
 0x24b   : > { %7501 = vmatpush3.bf16.xpose.msra.mxu1 %v1472_v47  ;;  %7502 = vmatprep.mubr.msk.bf16.mxu1 %vm8629_vm0, %v8628_v59 }
 0x24c   : > { %7506 = vmatprep.subr.bf16.mxu1 %v8628_v59 }
 0x24d   : > { %1368 = vrot.lane.b32.xlu1 %v9215_v24, %s8631_s8  ;;  %1356 = vrot.lane.b32.xlu0 %v1320_v42, %s8631_s8 }
 0x251   : > { %1328 = vrot.lane.b32.xlu1 %v1318_v48, %s8631_s8  ;;  %1360 = vrot.lane.b32.xlu0 %v1320_v42, %s8630_s6 }
 0x252   : > { %7503 = vmatmul.mubr.msk.bf16.vlgmr.msra.gmra.mrb[16].mxu1 %vm1420_vm1, %v1318_v48 }
 0x253   : > { %7508 = vmatprep.mubr.msk.bf16.mxu1 %vm8629_vm0, %v8628_v59 }
 0x255   : > { %1340 = vrot.lane.b32.xlu1 %v9220_v29, %s8631_s8  ;;  %1332 = vrot.lane.b32.xlu0 %v1318_v48, %s8630_s6 }
 0x259   : > { %1372 = vrot.lane.b32.xlu1 %v9215_v24, %s8630_s6  ;;  %1364 = vrot.lane.b32.xlu0 %v1320_v42, %s8632_s10  ;;  %v1848_v42 = vsel %vm1420_vm1, %v9225_v45, 0 }
 0x25a   : > { %v1303_v3 = vpop.f32.mrb[8].mxu1 }
 0x25b   : > { %v1304_v4 = vadd.f32 %v1303_v3, %v902_v53  ;;  %v1305_v5 = vpop.f32.mrb[9].mxu1 }
 0x25c   : > { %v1293_v51 = vpop.f32.mrb[8].mxu0  ;;  %v1306_v7 = vadd.f32 %v1305_v5, %v906_v60  ;;  %v1307_v8 = vpop.f32.mrb[10].mxu1 }
 0x25d   : > { %1344 = vrot.lane.b32.xlu1 %v9220_v29, %s8630_s6  ;;  %1336 = vrot.lane.b32.xlu0 %v1318_v48, %s8632_s10  ;;  %v1295_v52 = vpop.f32.mrb[9].mxu0  ;;  %v1294_v55 = vadd.f32 %v1293_v51, %v902_v53  ;;  %v1308_v9 = vadd.f32 %v1307_v8, %v902_v53  ;;  %v1309_v0 = vpop.f32.mrb[11].mxu1 }
 0x25e   : > { %v1297_v54 = vpop.f32.mrb[10].mxu0  ;;  %v1310_v11 = vadd.f32 %v1309_v0, %v906_v60  ;;  %v1296_v13 = vadd.f32 %v1295_v52, %v906_v60 }
 0x25f   : > { %v1298_v57 = vadd.f32 %v1297_v54, %v902_v53  ;;  %v9287_v10 = vpack.c.bf16 %v1308_v9, %v1304_v4  ;;  %v1299_v14 = vpop.f32.mrb[11].mxu0 }
 0x260   : > { %v9293_v12 = vpack.c.bf16 %v1310_v11, %v1306_v7  ;;  %v1300_v15 = vadd.f32 %v1299_v14, %v906_v60 }
 0x261   : > { %1348 = vrot.lane.b32.xlu1 %v9220_v29, %s8632_s10  ;;  %1376 = vrot.lane.b32.xlu0 %v9215_v24, %s8632_s10  ;;  %v9277_v58 = vpack.c.bf16 %v1298_v57, %v1294_v55 }
 0x262   : > { %v9295_v16 = vpack.c.bf16 %v1300_v15, %v1296_v13 }
 0x265   : > { %1370 = vrot.lane.b32.xlu0 %v9225_v45, %s8631_s8  ;;  %1342 = vrot.lane.b32.xlu1 %v9231_v49, %s8631_s8 }
 0x269   : > { %1374 = vrot.lane.b32.xlu0 %v9225_v45, %s8630_s6  ;;  %1346 = vrot.lane.b32.xlu1 %v9231_v49, %s8630_s6 }
 0x26d   : > { %1378 = vrot.lane.b32.xlu0 %v9225_v45, %s8632_s10  ;;  %1350 = vrot.lane.b32.xlu1 %v9231_v49, %s8632_s10 }
 0x271   : > { %1382 = vrot.lane.b32.xlu1 %v9277_v58, %s8631_s8  ;;  %1394 = vrot.lane.b32.xlu0 %v9277_v58, %s8632_s10 }
 0x275   : > { %1388 = vrot.lane.b32.xlu1 %v9277_v58, %s8630_s6  ;;  %1390 = vrot.lane.b32.xlu0 %v9287_v10, %s8630_s6 }
 0x279   : > { %1384 = vrot.lane.b32.xlu1 %v9287_v10, %s8631_s8 }
 0x2b3   : > { %v1359_v17 = vpop.permute.xlu1 %1358  ;;  %v1355_v18 = vpop.permute.xlu0 %1354 }
 0x2b4   : > { %v1613_v19 = vsel %vm1420_vm1, %v1359_v17, 0  ;;  %v1519_v20 = vsel %vm1420_vm1, %v1355_v18, 0 }
 0x2b5   : > { %7507 = vmatpush3.bf16.xpose.msra.mxu1 %v1519_v20  ;;  %7519 = vmatpush3.bf16.xpose.msra.mxu0 %v1613_v19 }
 0x2b6   : > { %7530 = vmatprep.subr.bf16.mxu0 %v8628_v59  ;;  %7512 = vmatprep.subr.bf16.mxu1 %v8628_v59 }
 0x2b7   : > { %v1331_v21 = vpop.permute.xlu1 %1330  ;;  %v1327_v22 = vpop.permute.xlu0 %1326 }
 0x2bb   : > { %v1335_v23 = vpop.permute.xlu1 %1334  ;;  %v1363_v25 = vpop.permute.xlu0 %1362 }
 0x2bc   : > { %v1707_v26 = vsel %vm1420_vm1, %v1363_v25, 0  ;;  %7509 = vmatmul.mubr.msk.bf16.vlgmr.msra.gmra.mrb[20].mxu1 %vm1420_vm1, %v1327_v22  ;;  %7521 = vmatmul.mubr.msk.bf16.vlgmr.msra.gmra.mrb[12].mxu0 %vm1420_vm1, %v1331_v21 }
 0x2bd   : > { %7531 = vmatpush3.bf16.xpose.msra.mxu0 %v1707_v26  ;;  %7532 = vmatprep.mubr.msk.bf16.mxu0 %vm8629_vm0, %v8628_v59 }
 0x2be   : > { %7542 = vmatprep.subr.bf16.mxu0 %v8628_v59  ;;  %7514 = vmatprep.mubr.msk.bf16.mxu1 %vm8629_vm0, %v8628_v59 }
 0x2bf   : > { %v1369_v27 = vpop.permute.xlu1 %1368  ;;  %v1357_v28 = vpop.permute.xlu0 %1356 }
 0x2c0   : > { %v1566_v30 = vsel %vm1420_vm1, %v1357_v28, 0  ;;  %v1895_v37 = vsel %vm1420_vm1, %v1369_v27, 0 }
 0x2c1   : > { %7513 = vmatpush3.bf16.xpose.msra.mxu1 %v1566_v30 }
 0x2c2   : > { %7524 = vmatprep.subr.bf16.mxu1 %v8628_v59 }
 0x2c3   : > { %v1361_v31 = vpop.permute.xlu0 %1360  ;;  %v1329_v33 = vpop.permute.xlu1 %1328 }
 0x2c4   : > { %7533 = vmatmul.mubr.msk.bf16.vlgmr.msra.gmra.mrb[16].mxu0 %vm1420_vm1, %v1335_v23  ;;  %v1660_v34 = vsel %vm1420_vm1, %v1361_v31, 0 }
 0x2c5   : > { %7543 = vmatpush3.bf16.xpose.msra.mxu0 %v1801_v32  ;;  %7544 = vmatprep.mubr.msk.bf16.mxu0 %vm8629_vm0, %v8628_v59 }
 0x2c6   : > { %7554 = vmatprep.subr.bf16.mxu0 %v8628_v59 }
 0x2c7   : > { %v1333_v35 = vpop.permute.xlu0 %1332  ;;  %v1341_v36 = vpop.permute.xlu1 %1340 }
 0x2c8   : > { %7515 = vmatmul.mubr.msk.bf16.vlgmr.msra.gmra.mrb[24].mxu1 %vm1420_vm1, %v1329_v33 }
 0x2c9   : > { %7525 = vmatpush3.bf16.xpose.msra.mxu1 %v1660_v34  ;;  %7526 = vmatprep.mubr.msk.bf16.mxu1 %vm8629_vm0, %v8628_v59 }
 0x2ca   : > { %7536 = vmatprep.subr.bf16.mxu1 %v8628_v59 }
 0x2cb   : > { %v1365_v24 = vpop.permute.xlu0 %1364  ;;  %v1373_v39 = vpop.permute.xlu1 %1372 }
 0x2cc   : > { %7545 = vmatmul.mubr.msk.bf16.vlgmr.msra.gmra.mrb[20].mxu0 %vm1420_vm1, %v9220_v29  ;;  %v1754_v38 = vsel %vm1420_vm1, %v1365_v24, 0  ;;  %v1989_v29 = vsel %vm1420_vm1, %v1373_v39, 0 }
 0x2cd   : > { %7555 = vmatpush3.bf16.xpose.msra.mxu0 %v1895_v37  ;;  %7556 = vmatprep.mubr.msk.bf16.mxu0 %vm8629_vm0, %v8628_v59 }
 0x2ce   : > { %7566 = vmatprep.subr.bf16.mxu0 %v8628_v59 }
 0x2cf   : > { %v1337_v40 = vpop.permute.xlu0 %1336  ;;  %v1345_v43 = vpop.permute.xlu1 %1344 }
 0x2d0   : > { %7527 = vmatmul.mubr.msk.bf16.vlgmr.msra.gmra.mrb[28].mxu1 %vm1420_vm1, %v1333_v35 }
 0x2d1   : > { %7537 = vmatpush3.bf16.xpose.msra.mxu1 %v1754_v38  ;;  %7538 = vmatprep.mubr.msk.bf16.mxu1 %vm8629_vm0, %v8628_v59 }
 0x2d2   : > { %7548 = vmatprep.subr.bf16.mxu1 %v8628_v59 }
 0x2d3   : > { %v1377_v41 = vpop.permute.xlu0 %1376  ;;  %v1349_v45 = vpop.permute.xlu1 %1348 }
 0x2d4   : > { %7557 = vmatmul.mubr.msk.bf16.vlgmr.msra.gmra.mrb[24].mxu0 %vm1420_vm1, %v1341_v36  ;;  %v2083_v46 = vsel %vm1420_vm1, %v1377_v41, 0 }
 0x2d5   : > { %7567 = vmatpush3.bf16.xpose.msra.mxu0 %v1989_v29  ;;  %7568 = vmatprep.mubr.msk.bf16.mxu0 %vm8629_vm0, %v8628_v59 }
 0x2d6   : > { %7578 = vmatprep.subr.bf16.mxu0 %v8628_v59 }
 0x2d7   : > { %v1371_v44 = vpop.permute.xlu0 %1370  ;;  %v1343_v51 = vpop.permute.xlu1 %1342 }
 0x2d8   : > { %7539 = vmatmul.mubr.msk.bf16.vlgmr.msra.gmra.mrb[32].mxu1 %vm1420_vm1, %v1337_v40  ;;  %v1942_v47 = vsel %vm1420_vm1, %v1371_v44, 0 }
 0x2d9   : > { %7549 = vmatpush3.bf16.xpose.msra.mxu1 %v1848_v42  ;;  %7550 = vmatprep.mubr.msk.bf16.mxu1 %vm8629_vm0, %v8628_v59 }
 0x2da   : > { %7560 = vmatprep.subr.bf16.mxu1 %v8628_v59 }
 0x2db   : > { %v1375_v48 = vpop.permute.xlu0 %1374  ;;  %v1347_v53 = vpop.permute.xlu1 %1346 }
 0x2dc   : > { %7569 = vmatmul.mubr.msk.bf16.vlgmr.msra.gmra.mrb[28].mxu0 %vm1420_vm1, %v1345_v43  ;;  %v2036_v52 = vsel %vm1420_vm1, %v1375_v48, 0 }
 0x2dd   : > { %7579 = vmatpush3.bf16.xpose.msra.mxu0 %v2083_v46  ;;  %7580 = vmatprep.mubr.msk.bf16.mxu0 %vm8629_vm0, %v8628_v59 }
 0x2de   : > { %7590 = vmatprep.subr.bf16.mxu0 %v8628_v59 }
 0x2df   : > { %v1351_v55 = vpop.permute.xlu1 %1350 }
 0x2e0   : > { %7551 = vmatmul.mubr.msk.bf16.vlgmr.msra.gmra.mrb[36].mxu1 %vm1420_vm1, %v9231_v49  ;;  %v1379_v49 = vpop.permute.xlu0 %1378 }
 0x2e1   : > { %7561 = vmatpush3.bf16.xpose.msra.mxu1 %v1942_v47  ;;  %7562 = vmatprep.mubr.msk.bf16.mxu1 %vm8629_vm0, %v8628_v59  ;;  %v2130_v54 = vsel %vm1420_vm1, %v1379_v49, 0 }
 0x2e2   : > { %7572 = vmatprep.subr.bf16.mxu1 %v8628_v59 }
 0x2e4   : > { %7581 = vmatmul.mubr.msk.bf16.vlgmr.msra.gmra.mrb[32].mxu0 %vm1420_vm1, %v1349_v45 }
 0x2e5   : > { %7591 = vmatpush3.bf16.msra.mxu0 %v9277_v58  ;;  %7592 = vmatprep.mubr.msk.bf16.mxu0 %vm8629_vm0, %v8628_v59 }
 0x2e6   : > { %7602 = vmatprep.subr.bf16.mxu0 %v8628_v59 }
 0x2e8   : > { %7563 = vmatmul.mubr.msk.bf16.vlgmr.msra.gmra.mrb[40].mxu1 %vm1420_vm1, %v1343_v51 }
 0x2e9   : > { %7573 = vmatpush3.bf16.xpose.msra.mxu1 %v2036_v52  ;;  %7574 = vmatprep.mubr.msk.bf16.mxu1 %vm8629_vm0, %v8628_v59 }
 0x2ea   : > { %7584 = vmatprep.subr.bf16.mxu1 %v8628_v59 }
 0x2f0   : > { %7575 = vmatmul.mubr.msk.bf16.vlgmr.msra.gmra.mrb[44].mxu1 %vm1420_vm1, %v1347_v53 }
 0x2f1   : > { %7585 = vmatpush3.bf16.xpose.msra.mxu1 %v2130_v54  ;;  %7586 = vmatprep.mubr.msk.bf16.mxu1 %vm8629_vm0, %v8628_v59 }
 0x2f2   : > { %7596 = vmatprep.subr.bf16.mxu1 %v8628_v59 }
 0x2f8   : > { %7587 = vmatmul.mubr.msk.bf16.vlgmr.msra.gmra.mrb[48].mxu1 %vm1420_vm1, %v1351_v55 }
 0x2f9   : > { %7597 = vmatpush3.bf16.msra.mxu1 %v9287_v10  ;;  %7598 = vmatprep.mubr.msk.bf16.mxu1 %vm8629_vm0, %v8628_v59 }
 0x2fa   : > { %7608 = vmatprep.subr.bf16.mxu1 %v8628_v59 }
 0x31d   : > { %v9375_v57 = vpop.f32.mrb[12].mxu1 }
 0x31e   : > { %v7498_v58 = vpop.f32.mrb[13].mxu1  ;;  %v2174_v60 = vsel %vm2173_vm2, %v9375_v57, -inf }
 0x31f   : > { %2175 = vmax.xlane.f32.xlu0 %v2174_v60  ;;  %v9379_v3 = vpop.f32.mrb[14].mxu1 }
 0x320   : > { %v7499_v4 = vpop.f32.mrb[15].mxu1  ;;  %v2177_v5 = vsel %vm2173_vm2, %v9379_v3, -inf }
 0x321   : > { %2178 = vmax.xlane.f32.xlu1 %v2177_v5 }
 0x325   : > { %v9383_v7 = vpop.f32.mrb[16].mxu1 }
 0x326   : > { %v7504_v8 = vpop.f32.mrb[17].mxu1  ;;  %v2180_v9 = vsel %vm2173_vm2, %v9383_v7, -inf }
 0x327   : > { %2181 = vmax.xlane.f32.xlu1 %v2180_v9  ;;  %v9387_v0 = vpop.f32.mrb[18].mxu1 }
 0x328   : > { %v2183_v11 = vsel %vm2173_vm2, %v9387_v0, -inf  ;;  %v7505_v13 = vpop.f32.mrb[19].mxu1 }
 0x329   : > { %2184 = vmax.xlane.f32.xlu0 %v2183_v11 }
 0x38f   : > { %v9391_v14 = vpop.f32.mrb[20].mxu1  ;;  %v9393_v15 = vpop.f32.mrb[12].mxu0 }
 0x390   : > { %v7510_v17 = vpop.f32.mrb[21].mxu1  ;;  %v7522_v18 = vpop.f32.mrb[13].mxu0  ;;  %v2198_v19 = vsel %vm2173_vm2, %v9393_v15, -inf  ;;  %v2186_v20 = vsel %vm2173_vm2, %v9391_v14, -inf }
 0x391   : > { %v9399_v21 = vpop.f32.mrb[14].mxu0  ;;  %2199 = vmax.xlane.f32.xlu1 %v2198_v19  ;;  %2187 = vmax.xlane.f32.xlu0 %v2186_v20  ;;  %v9401_v22 = vpop.f32.mrb[22].mxu1 }
 0x392   : > { %v7511_v23 = vpop.f32.mrb[23].mxu1  ;;  %v7523_v25 = vpop.f32.mrb[15].mxu0  ;;  %v2189_v26 = vsel %vm2173_vm2, %v9401_v22, -inf  ;;  %v2201_v30 = vsel %vm2173_vm2, %v9399_v21, -inf }
 0x395   : > { %2190 = vmax.xlane.f32.xlu0 %v2189_v26 }
 0x397   : > { %v9405_v27 = vpop.f32.mrb[16].mxu0 }
 0x398   : > { %v7534_v28 = vpop.f32.mrb[17].mxu0  ;;  %v2210_v25 = vsel %vm2173_vm2, %v9405_v27, -inf }
 0x399   : > { %v9409_v31 = vpop.f32.mrb[18].mxu0  ;;  %2202 = vmax.xlane.f32.xlu0 %v2201_v30 }
 0x39a   : > { %v7535_v32 = vpop.f32.mrb[19].mxu0 }
 0x39b   : > { %v9411_v33 = vpop.f32.mrb[24].mxu1  ;;  %v9459_v32 = vpop.permute.xlu1 %1382 }
 0x39c   : > { %v7516_v34 = vpop.f32.mrb[25].mxu1  ;;  %v2192_v30 = vsel %vm2173_vm2, %v9411_v33, -inf }
 0x39d   : > { %v9413_v35 = vpop.f32.mrb[26].mxu1 }
 0x39e   : > { %v7517_v36 = vpop.f32.mrb[27].mxu1 }
 0x39f   : > { %v9415_v24 = vpop.f32.mrb[20].mxu0 }
 0x3a0   : > { %v7546_v37 = vpop.f32.mrb[21].mxu0 }
 0x3a1   : > { %v9417_v38 = vpop.f32.mrb[22].mxu0  ;;  %v9463_v37 = vpop.permute.xlu0 %1394 }
 0x3a2   : > { %v7547_v39 = vpop.f32.mrb[23].mxu0  ;;  %1396 = vrot.lane.b32.xlu1 %v9287_v10, %s8632_s10 }
 0x3a3   : > { %v9421_v40 = vpop.f32.mrb[28].mxu1 }
 0x3a4   : > { %v7528_v29 = vpop.f32.mrb[29].mxu1 }
 0x3a5   : > { %v9423_v41 = vpop.f32.mrb[30].mxu1  ;;  %v2213_v29 = vsel %vm2173_vm2, %v9409_v31, -inf }
 0x3a6   : > { %v7529_v42 = vpop.f32.mrb[31].mxu1 }
 0x3a7   : > { %v9425_v43 = vpop.f32.mrb[24].mxu0  ;;  %v2222_v42 = vsel %vm2173_vm2, %v9415_v24, -inf }
 0x3a8   : > { %v7558_v44 = vpop.f32.mrb[25].mxu0 }
 0x3a9   : > { %v9427_v46 = vpop.f32.mrb[26].mxu0 }
 0x3aa   : > { %v7559_v47 = vpop.f32.mrb[27].mxu0 }
 0x3ab   : > { %v9429_v45 = vpop.f32.mrb[32].mxu1  ;;  %v9471_v47 = vpop.permute.xlu1 %1388 }
 0x3ac   : > { %v7540_v48 = vpop.f32.mrb[33].mxu1 }
 0x3ad   : > { %v9431_v51 = vpop.f32.mrb[34].mxu1  ;;  %v9473_v48 = vpop.permute.xlu0 %1390 }
 0x3ae   : > { %v7541_v52 = vpop.f32.mrb[35].mxu1 }
 0x3af   : > { %v9433_v49 = vpop.f32.mrb[28].mxu0  ;;  %1402 = vrot.lane.b32.xlu0 %v9295_v16, %s8631_s8  ;;  %v2195_v52 = vsel %vm2173_vm2, %v9413_v35, -inf }
 0x3b0   : > { %v7570_v10 = vpop.f32.mrb[29].mxu0 }
 0x3b1   : > { %v9437_v53 = vpop.f32.mrb[30].mxu0  ;;  %v2204_v10 = vsel %vm2173_vm2, %v9421_v40, -inf }
 0x3b2   : > { %v7571_v54 = vpop.f32.mrb[31].mxu0 }
 0x3b3   : > { %v9439_v55 = vpop.f32.mrb[36].mxu1  ;;  %v9479_v54 = vpop.permute.xlu1 %1384 }
 0x3b4   : > { %v7552_v58 = vpop.f32.mrb[37].mxu1 }
 0x3b5   : > { %v9441_v60 = vpop.f32.mrb[38].mxu1  ;;  %v2176_v58 = vpop.xlane.xlu0 %2175 }
 0x3b6   : > { %v7553_v4 = vpop.f32.mrb[39].mxu1 }
 0x3b7   : > { %v9443_v5 = vpop.f32.mrb[32].mxu0  ;;  %v2225_v4 = vsel %vm2173_vm2, %v9417_v38, -inf }
 0x3b8   : > { %v7582_v8 = vpop.f32.mrb[33].mxu0 }
 0x3b9   : > { %v9445_v9 = vpop.f32.mrb[34].mxu0  ;;  %v2234_v8 = vsel %vm2173_vm2, %v9425_v43, -inf }
 0x3ba   : > { %v7583_v11 = vpop.f32.mrb[35].mxu0 }
 0x3bb   : > { %v9447_v13 = vpop.f32.mrb[40].mxu1  ;;  %v2270_v11 = vsub.f32 %v9375_v57, %v2176_v58  ;;  %v2185_v58 = vpop.xlane.xlu0 %2184 }
 0x3bc   : > { %v7564_v17 = vpop.f32.mrb[41].mxu1 }
 0x3bd   : > { %v9449_v18 = vpop.f32.mrb[42].mxu1  ;;  %v2179_v17 = vpop.xlane.xlu1 %2178 }
 0x3be   : > { %v7565_v19 = vpop.f32.mrb[43].mxu1  ;;  %v2271_v57 = vsub.f32 %v9379_v3, %v2179_v17  ;;  %v2258_v3 = vsel %vm2173_vm2, %v9443_v5, -inf }
 0x3bf   : > { %v2207_v19 = vsel %vm2173_vm2, %v9423_v41, -inf }
 0x3c3   : > { %v9451_v20 = vpop.f32.mrb[44].mxu1 }
 0x3c4   : > { %v7576_v23 = vpop.f32.mrb[45].mxu1 }
 0x3c5   : > { %v9455_v26 = vpop.f32.mrb[46].mxu1  ;;  %v2216_v23 = vsel %vm2173_vm2, %v9429_v45, -inf }
 0x3c6   : > { %2211 = vmax.xlane.f32.xlu1 %v2210_v25  ;;  %v7577_v28 = vpop.f32.mrb[47].mxu1  ;;  %v2302_v25 = vmul.f32 1.442695, %v2270_v11  ;;  %v2240_v11 = vsel %vm2173_vm2, %v9447_v13, -inf }
 0x3c7   : > { %v2182_v28 = vpop.xlane.xlu1 %2181 }
 0x3c8   : > { %8097 = vpow2.f32 %v2302_v25 }
 0x3ca   : > { %2193 = vmax.xlane.f32.xlu1 %v2192_v30  ;;  %v2237_v30 = vsel %vm2173_vm2, %v9427_v46, -inf }
 0x3cb   : > { %v9461_v34 = vpop.f32.mrb[48].mxu1 }
 0x3cc   : > { %v7588_v36 = vpop.f32.mrb[49].mxu1 }
 0x3cd   : > { %v9465_v39 = vpop.f32.mrb[50].mxu1  ;;  %v2246_v36 = vsel %vm2173_vm2, %v9433_v49, -inf }
 0x3ce   : > { %2214 = vmax.xlane.f32.xlu0 %v2213_v29  ;;  %2223 = vmax.xlane.f32.xlu1 %v2222_v42  ;;  %v7589_v44 = vpop.f32.mrb[51].mxu1  ;;  %v2272_v29 = vsub.f32 %v9383_v7, %v2182_v28  ;;  %v2219_v42 = vsel %vm2173_vm2, %v9431_v51, -inf  ;;  %v2273_v7 = vsub.f32 %v9387_v0, %v2185_v58  ;;  %v2243_v28 = vsel %vm2173_vm2, %v9449_v18, -inf }
 0x3cf   : > { %v2228_v44 = vsel %vm2173_vm2, %v9439_v55, -inf  ;;  %v2267_v58 = vsel %vm2173_vm2, %v9465_v39, -inf }
 0x3d2   : > { %2196 = vmax.xlane.f32.xlu0 %v2195_v52  ;;  %2205 = vmax.xlane.f32.xlu1 %v2204_v10  ;;  %v2304_v52 = vmul.f32 1.442695, %v2271_v57  ;;  %v2306_v10 = vmul.f32 1.442695, %v2272_v29  ;;  %v9509_v17 = vpop.eup %8097 }
 0x3d3   : > { %v2366_v25 = vsel %vm2173_vm2, %v9509_v17, 0.0 }
 0x3d4   : > { %8099 = vpow2.f32 %v2304_v52 }
 0x3d5   : > { %8101 = vpow2.f32 %v2306_v10 }
 0x3d6   : > { %2226 = vmax.xlane.f32.xlu0 %v2225_v4  ;;  %2235 = vmax.xlane.f32.xlu1 %v2234_v8  ;;  %v2249_v4 = vsel %vm2173_vm2, %v9437_v53, -inf  ;;  %v2231_v8 = vsel %vm2173_vm2, %v9441_v60, -inf }
 0x3da   : > { %2208 = vmax.xlane.f32.xlu0 %v2207_v19  ;;  %2217 = vmax.xlane.f32.xlu1 %v2216_v23  ;;  %v2308_v19 = vmul.f32 1.442695, %v2273_v7  ;;  %v2261_v23 = vsel %vm2173_vm2, %v9445_v9, -inf }
 0x3dc   : > { %8103 = vpow2.f32 %v2308_v19 }
 0x3de   : > { %2238 = vmax.xlane.f32.xlu0 %v2237_v30  ;;  %2247 = vmax.xlane.f32.xlu1 %v2246_v36  ;;  %v9515_v0 = vpop.eup %8099  ;;  %v2252_v30 = vsel %vm2173_vm2, %v9451_v20, -inf }
 0x3df   : > { %v9521_v36 = vpop.eup %8101  ;;  %v2369_v57 = vsel %vm2173_vm2, %v9515_v0, 0.0 }
 0x3e0   : > { %v2372_v29 = vsel %vm2173_vm2, %v9521_v36, 0.0 }
 0x3e2   : > { %2220 = vmax.xlane.f32.xlu0 %v2219_v42  ;;  %2229 = vmax.xlane.f32.xlu1 %v2228_v44  ;;  %v2255_v42 = vsel %vm2173_vm2, %v9455_v26, -inf  ;;  %v2264_v44 = vsel %vm2173_vm2, %v9461_v34, -inf }
 0x3e6   : > { %2250 = vmax.xlane.f32.xlu0 %v2249_v4  ;;  %2259 = vmax.xlane.f32.xlu1 %v2258_v3  ;;  %v9531_v52 = vpop.eup %8103 }
 0x3e7   : > { %v2375_v10 = vsel %vm2173_vm2, %v9531_v52, 0.0 }
 0x3ea   : > { %2232 = vmax.xlane.f32.xlu0 %v2231_v8  ;;  %2241 = vmax.xlane.f32.xlu1 %v2240_v11 }
 0x3ee   : > { %2262 = vmax.xlane.f32.xlu0 %v2261_v23  ;;  %2367 = vadd.xlane.f32.xlu1 %v2366_v25 }
 0x3f2   : > { %2244 = vmax.xlane.f32.xlu0 %v2243_v28  ;;  %2253 = vmax.xlane.f32.xlu1 %v2252_v30 }
 0x3f6   : > { %2370 = vadd.xlane.f32.xlu0 %v2369_v57  ;;  %2373 = vadd.xlane.f32.xlu1 %v2372_v29 }
 0x3fa   : > { %2256 = vmax.xlane.f32.xlu0 %v2255_v42  ;;  %2265 = vmax.xlane.f32.xlu1 %v2264_v44 }
 0x3fe   : > { %2376 = vadd.xlane.f32.xlu0 %v2375_v10 }
 0x402   : > { %2268 = vmax.xlane.f32.xlu0 %v2267_v58 }
 0x41e   : > { %v2200_v4 = vpop.xlane.xlu1 %2199  ;;  %v2188_v3 = vpop.xlane.xlu0 %2187 }
 0x41f   : > { %v2278_v7 = vsub.f32 %v9393_v15, %v2200_v4  ;;  %v2274_v8 = vsub.f32 %v9391_v14, %v2188_v3 }
 0x421   : > { %v2310_v11 = vmul.f32 1.442695, %v2274_v8  ;;  %v2318_v19 = vmul.f32 1.442695, %v2278_v7 }
 0x422   : > { %v2191_v23 = vpop.xlane.xlu0 %2190  ;;  %v9557_v4 = vpop.permute.xlu1 %1396 }
 0x423   : > { %v2275_v25 = vsub.f32 %v9401_v22, %v2191_v23  ;;  %8105 = vpow2.f32 %v2310_v11 }
 0x424   : > { %8107 = vpow2.f32 %v2318_v19 }
 0x425   : > { %v2312_v28 = vmul.f32 1.442695, %v2275_v25 }
 0x426   : > { %v2203_v30 = vpop.xlane.xlu0 %2202 }
 0x427   : > { %8109 = vpow2.f32 %v2312_v28  ;;  %v2279_v57 = vsub.f32 %v9399_v21, %v2203_v30 }
 0x429   : > { %v2320_v29 = vmul.f32 1.442695, %v2279_v57 }
 0x42a   : > { %v9560_v11 = vpop.permute.xlu0 %1402 }
 0x42b   : > { %8111 = vpow2.f32 %v2320_v29 }
 0x42d   : > { %v9541_v42 = vpop.eup %8105 }
 0x42e   : > { %v2378_v15 = vsel %vm2173_vm2, %v9541_v42, 0.0  ;;  %v9545_v14 = vpop.eup %8107 }
 0x42f   : > { %2379 = vadd.xlane.f32.xlu1 %v2378_v15  ;;  %v2390_v10 = vsel %vm2173_vm2, %v9545_v14, 0.0 }
 0x431   : > { %v9547_v44 = vpop.eup %8109 }
 0x432   : > { %v2381_v22 = vsel %vm2173_vm2, %v9547_v44, 0.0 }
 0x433   : > { %2382 = vadd.xlane.f32.xlu0 %v2381_v22  ;;  %2391 = vadd.xlane.f32.xlu1 %v2390_v10 }
 0x435   : > { %v9553_v21 = vpop.eup %8111 }
 0x436   : > { %v2393_v58 = vsel %vm2173_vm2, %v9553_v21, 0.0 }
 0x437   : > { %2394 = vadd.xlane.f32.xlu0 %v2393_v58 }
 0x453   : > { %v2212_v3 = vpop.xlane.xlu1 %2211 }
 0x454   : > { %v2282_v7 = vsub.f32 %v9405_v27, %v2212_v3 }
 0x456   : > { %v2326_v8 = vmul.f32 1.442695, %v2282_v7 }
 0x457   : > { %v2194_v19 = vpop.xlane.xlu1 %2193 }
 0x458   : > { %8113 = vpow2.f32 %v2326_v8  ;;  %v2276_v23 = vsub.f32 %v9411_v33, %v2194_v19 }
 0x45a   : > { %v2314_v25 = vmul.f32 1.442695, %v2276_v23 }
 0x45b   : > { %v2215_v28 = vpop.xlane.xlu0 %2214  ;;  %v2224_v30 = vpop.xlane.xlu1 %2223 }
 0x45c   : > { %8115 = vpow2.f32 %v2314_v25  ;;  %v2283_v57 = vsub.f32 %v9409_v31, %v2215_v28  ;;  %v2286_v29 = vsub.f32 %v9415_v24, %v2224_v30 }
 0x45e   : > { %v2328_v15 = vmul.f32 1.442695, %v2283_v57  ;;  %v2334_v22 = vmul.f32 1.442695, %v2286_v29 }
 0x45f   : > { %v2197_v10 = vpop.xlane.xlu0 %2196  ;;  %v2206_v58 = vpop.xlane.xlu1 %2205 }
 0x460   : > { %8117 = vpow2.f32 %v2328_v15  ;;  %v2277_v27 = vsub.f32 %v9413_v35, %v2197_v10  ;;  %v2280_v3 = vsub.f32 %v9421_v40, %v2206_v58 }
 0x461   : > { %8119 = vpow2.f32 %v2334_v22 }
 0x462   : > { %v9567_v7 = vpop.eup %8113  ;;  %v2316_v33 = vmul.f32 1.442695, %v2277_v27  ;;  %v2322_v8 = vmul.f32 1.442695, %v2280_v3 }
 0x463   : > { %v2227_v19 = vpop.xlane.xlu0 %2226  ;;  %v2236_v23 = vpop.xlane.xlu1 %2235  ;;  %v2402_v31 = vsel %vm2173_vm2, %v9567_v7, 0.0 }
 0x464   : > { %8121 = vpow2.f32 %v2316_v33  ;;  %v2287_v24 = vsub.f32 %v9417_v38, %v2227_v19  ;;  %2403 = vadd.xlane.f32.xlu1 %v2402_v31  ;;  %v2290_v15 = vsub.f32 %v9425_v43, %v2236_v23 }
 0x465   : > { %8123 = vpow2.f32 %v2322_v8 }
 0x466   : > { %v9572_v25 = vpop.eup %8115  ;;  %v2336_v35 = vmul.f32 1.442695, %v2287_v24  ;;  %v2342_v33 = vmul.f32 1.442695, %v2290_v15 }
 0x467   : > { %v2209_v28 = vpop.xlane.xlu0 %2208  ;;  %v2218_v40 = vpop.xlane.xlu1 %2217  ;;  %v2384_v30 = vsel %vm2173_vm2, %v9572_v25, 0.0 }
 0x468   : > { %v2281_v57 = vsub.f32 %v9423_v41, %v2209_v28  ;;  %2385 = vadd.xlane.f32.xlu1 %v2384_v30  ;;  %8125 = vpow2.f32 %v2336_v35  ;;  %v2284_v8 = vsub.f32 %v9429_v45, %v2218_v40 }
 0x46a   : > { %v9577_v29 = vpop.eup %8117  ;;  %v2324_v22 = vmul.f32 1.442695, %v2281_v57  ;;  %v2330_v35 = vmul.f32 1.442695, %v2284_v8 }
 0x46b   : > { %v9580_v38 = vpop.eup %8119  ;;  %v2239_v10 = vpop.xlane.xlu0 %2238  ;;  %v2405_v27 = vsel %vm2173_vm2, %v9577_v29, 0.0 }
 0x46c   : > { %v2248_v58 = vpop.xlane.xlu1 %2247  ;;  %v2414_v3 = vsel %vm2173_vm2, %v9580_v38, 0.0  ;;  %2406 = vadd.xlane.f32.xlu0 %v2405_v27  ;;  %8127 = vpow2.f32 %v2324_v22  ;;  %v2291_v28 = vsub.f32 %v9427_v46, %v2239_v10 }
 0x46d   : > { %2415 = vadd.xlane.f32.xlu1 %v2414_v3  ;;  %8129 = vpow2.f32 %v2342_v33  ;;  %v2294_v22 = vsub.f32 %v9433_v49, %v2248_v58 }
 0x46e   : > { %v9586_v41 = vpop.eup %8121  ;;  %v2344_v27 = vmul.f32 1.442695, %v2291_v28 }
 0x46f   : > { %v2221_v43 = vpop.xlane.xlu0 %2220  ;;  %v2387_v23 = vsel %vm2173_vm2, %v9586_v41, 0.0  ;;  %v9591_v31 = vpop.eup %8123 }
 0x470   : > { %v2230_v19 = vpop.xlane.xlu1 %2229  ;;  %v2285_v24 = vsub.f32 %v9431_v51, %v2221_v43  ;;  %2388 = vadd.xlane.f32.xlu0 %v2387_v23  ;;  %v2396_v45 = vsel %vm2173_vm2, %v9591_v31, 0.0  ;;  %v2350_v43 = vmul.f32 1.442695, %v2294_v22 }
 0x471   : > { %v2288_v23 = vsub.f32 %v9439_v55, %v2230_v19 }
 0x472   : > { %v2332_v30 = vmul.f32 1.442695, %v2285_v24  ;;  %v9597_v40 = vpop.eup %8125 }
 0x473   : > { %v2251_v57 = vpop.xlane.xlu0 %2250  ;;  %v2417_v46 = vsel %vm2173_vm2, %v9597_v40, 0.0 }
 0x474   : > { %v2260_v15 = vpop.xlane.xlu1 %2259  ;;  %8131 = vpow2.f32 %v2332_v30  ;;  %2397 = vadd.xlane.f32.xlu0 %v2396_v45  ;;  %v2295_v58 = vsub.f32 %v9437_v53, %v2251_v57 }
 0x475   : > { %8133 = vpow2.f32 %v2330_v35  ;;  %v2298_v51 = vsub.f32 %v9443_v5, %v2260_v15 }
 0x476   : > { %v9603_v10 = vpop.eup %8127  ;;  %8135 = vpow2.f32 %v2344_v27  ;;  %v2352_v19 = vmul.f32 1.442695, %v2295_v58 }
 0x477   : > { %v2233_v3 = vpop.xlane.xlu0 %2232  ;;  %v2358_v24 = vmul.f32 1.442695, %v2298_v51  ;;  %v2399_v28 = vsel %vm2173_vm2, %v9603_v10, 0.0  ;;  %v9610_v30 = vpop.eup %8129 }
 0x478   : > { %v2242_v33 = vpop.xlane.xlu1 %2241  ;;  %v2289_v8 = vsub.f32 %v9441_v60, %v2233_v3  ;;  %2418 = vadd.xlane.f32.xlu0 %v2417_v46  ;;  %v2338_v60 = vmul.f32 1.442695, %v2288_v23  ;;  %v2426_v27 = vsel %vm2173_vm2, %v9610_v30, 0.0 }
 0x479   : > { %v2292_v3 = vsub.f32 %v9447_v13, %v2242_v33 }
 0x47a   : > { %v2340_v49 = vmul.f32 1.442695, %v2289_v8 }
 0x47b   : > { %v2263_v35 = vpop.xlane.xlu0 %2262  ;;  %v2346_v58 = vmul.f32 1.442695, %v2292_v3 }
 0x47c   : > { %v2368_v5 = vpop.xlane.xlu1 %2367  ;;  %8137 = vpow2.f32 %v2340_v49  ;;  %v2299_v15 = vsub.f32 %v9445_v9, %v2263_v35  ;;  %2400 = vadd.xlane.f32.xlu0 %v2399_v28 }
 0x47d   : > { %8139 = vpow2.f32 %v2350_v43 }
 0x47e   : > { %v9613_v45 = vpop.eup %8131  ;;  %8141 = vpow2.f32 %v2358_v24  ;;  %v2360_v55 = vmul.f32 1.442695, %v2299_v15 }
 0x47f   : > { %v2245_v22 = vpop.xlane.xlu0 %2244  ;;  %v2411_v57 = vsel %vm2173_vm2, %v9613_v45, 0.0  ;;  %v9619_v51 = vpop.eup %8133  ;;  %8143 = vpow2.f32 %v2338_v60 }
 0x480   : > { %v2254_v53 = vpop.xlane.xlu1 %2253  ;;  %v2293_v9 = vsub.f32 %v9449_v18, %v2245_v22  ;;  %2412 = vadd.xlane.f32.xlu1 %v2411_v57  ;;  %2427 = vadd.xlane.f32.xlu0 %v2426_v27  ;;  %8145 = vpow2.f32 %v2360_v55  ;;  %v2408_v23 = vsel %vm2173_vm2, %v9619_v51, 0.0  ;;  %v9625_v24 = vpop.eup %8135 }
 0x481   : > { %8147 = vpow2.f32 %v2352_v19  ;;  %v2296_v18 = vsub.f32 %v9451_v20, %v2254_v53  ;;  %v2429_v15 = vsel %vm2173_vm2, %v9625_v24, 0.0 }
 0x482   : > { %v2348_v46 = vmul.f32 1.442695, %v2293_v9  ;;  %8149 = vrcp.f32 %v2368_v5 }
 0x483   : > { %v2371_v8 = vpop.xlane.xlu0 %2370  ;;  %v2354_v20 = vmul.f32 1.442695, %v2296_v18 }
 0x484   : > { %v2374_v43 = vpop.xlane.xlu1 %2373  ;;  %2409 = vadd.xlane.f32.xlu0 %v2408_v23  ;;  %8151 = vpow2.f32 %v2348_v46 }
 0x485   : > { %8153 = vrcp.f32 %v2371_v8 }
 0x486   : > { %v9628_v49 = vpop.eup %8137  ;;  %8155 = vpow2.f32 %v2346_v58 }
 0x487   : > { %v9630_v13 = vpop.eup %8139  ;;  %v2257_v33 = vpop.xlane.xlu0 %2256  ;;  %v2423_v28 = vsel %vm2173_vm2, %v9628_v49, 0.0  ;;  %8157 = vrcp.f32 %v2374_v43 }
 0x488   : > { %v2266_v35 = vpop.xlane.xlu1 %2265  ;;  %v9636_v60 = vpop.eup %8141  ;;  %v2297_v5 = vsub.f32 %v9455_v26, %v2257_v33  ;;  %2424 = vadd.xlane.f32.xlu1 %v2423_v28  ;;  %2430 = vadd.xlane.f32.xlu0 %v2429_v15  ;;  %v2438_v27 = vsel %vm2173_vm2, %v9630_v13, 0.0 }
 0x489   : > { %v2300_v19 = vsub.f32 %v9461_v34, %v2266_v35  ;;  %v9640_v22 = vpop.eup %8143  ;;  %v2450_v57 = vsel %vm2173_vm2, %v9636_v60, 0.0 }
 0x48a   : > { %v2356_v55 = vmul.f32 1.442695, %v2297_v5  ;;  %v9646_v9 = vpop.eup %8145  ;;  %v2420_v43 = vsel %vm2173_vm2, %v9640_v22, 0.0 }
 0x48b   : > { %v2377_v53 = vpop.xlane.xlu0 %2376  ;;  %v9648_v26 = vpop.eup %8147  ;;  %v2362_v34 = vmul.f32 1.442695, %v2300_v19  ;;  %v2453_v8 = vsel %vm2173_vm2, %v9646_v9, 0.0 }
 0x48c   : > { %8159 = vpow2.f32 %v2356_v55  ;;  %2451 = vadd.xlane.f32.xlu1 %v2450_v57  ;;  %2439 = vadd.xlane.f32.xlu0 %v2438_v27  ;;  %v8150_v3 = vpop.eup %8149  ;;  %v2441_v28 = vsel %vm2173_vm2, %v9648_v26, 0.0 }
 0x48d   : > { %8161 = vpow2.f32 %v2354_v20  ;;  %v2463_v18 = vmul.f32 %v8150_v3, %v9509_v17 }
 0x48e   : > { %8163 = vrcp.f32 %v2377_v53  ;;  %v9650_v46 = vpop.eup %8151 }
 0x48f   : > { %v8154_v23 = vpop.eup %8153  ;;  %8165 = vpow2.f32 %v2362_v34  ;;  %v2435_v35 = vsel %vm2173_vm2, %v9650_v46, 0.0 }
 0x490   : > { %2454 = vadd.xlane.f32.xlu1 %v2453_v8  ;;  %2421 = vadd.xlane.f32.xlu0 %v2420_v43  ;;  %v2465_v58 = vmul.f32 %v8154_v23, %v9515_v0  ;;  %v9662_v15 = vpop.eup %8155 }
 0x491   : > { %v8158_v5 = vpop.eup %8157  ;;  %v2432_v55 = vsel %vm2173_vm2, %v9662_v15, 0.0 }
 0x492   : > { %v2526_v33 = vpack.c.bf16 %v2465_v58, %v2463_v18  ;;  %v2467_v53 = vmul.f32 %v8158_v5, %v9521_v36  ;;  %v2269_v36 = vpop.xlane.xlu0 %2268 }
 0x494   : > { %2436 = vadd.xlane.f32.xlu1 %v2435_v35  ;;  %2442 = vadd.xlane.f32.xlu0 %v2441_v28 }
 0x495   : > { %7593 = vmatmul.mubr.msk.bf16.vlgmr.msra.gmra.mrb[36].mxu0 %vm2173_vm2, %v2526_v33 }
 0x496   : > { %v9665_v20 = vpop.eup %8159  ;;  %7603 = vmatpush3.bf16.msra.mxu0 %v9459_v32  ;;  %7604 = vmatprep.mubr.msk.bf16.mxu0 %vm8629_vm0, %v8628_v59 }
 0x497   : > { %v9670_v17 = vpop.eup %8161  ;;  %v2447_v0 = vsel %vm2173_vm2, %v9665_v20, 0.0  ;;  %7614 = vmatprep.subr.bf16.mxu0 %v8628_v59 }
 0x498   : > { %v8164_v19 = vpop.eup %8163  ;;  %2448 = vadd.xlane.f32.xlu1 %v2447_v0  ;;  %2433 = vadd.xlane.f32.xlu0 %v2432_v55  ;;  %v2444_v27 = vsel %vm2173_vm2, %v9670_v17, 0.0 }
 0x499   : > { %v2469_v32 = vmul.f32 %v8164_v19, %v9531_v52  ;;  %v9681_v3 = vpop.eup %8165  ;;  %v2301_v52 = vsub.f32 %v9465_v39, %v2269_v36 }
 0x49a   : > { %v2456_v34 = vsel %vm2173_vm2, %v9681_v3, 0.0 }
 0x49b   : > { %v2527_v57 = vpack.c.bf16 %v2469_v32, %v2467_v53  ;;  %v2364_v8 = vmul.f32 1.442695, %v2301_v52 }
 0x49c   : > { %2445 = vadd.xlane.f32.xlu0 %v2444_v27 }
 0x49d   : > { %7599 = vmatmul.mubr.msk.bf16.vlgmr.msra.gmra.mrb[52].mxu1 %vm2173_vm2, %v2527_v57  ;;  %8167 = vpow2.f32 %v2364_v8 }
 0x49e   : > { %7609 = vmatpush3.bf16.msra.mxu1 %v9479_v54  ;;  %7610 = vmatprep.mubr.msk.bf16.mxu1 %vm8629_vm0, %v8628_v59 }
 0x49f   : > { %7620 = vmatprep.subr.bf16.mxu1 %v8628_v59 }
 0x4a0   : > { %2457 = vadd.xlane.f32.xlu0 %v2456_v34 }
 0x4a7   : > { %v9701_v18 = vpop.eup %8167 }
 0x4a8   : > { %v2459_v5 = vsel %vm2173_vm2, %v9701_v18, 0.0 }
 0x4a9   : > { %1408 = vrot.lane.b32.xlu1 %v9295_v16, %s8630_s6 }
 0x4b6   : > { %1414 = vrot.lane.b32.xlu0 %v9295_v16, %s8632_s10 }
 0x4ba   : > { %1404 = vrot.lane.b32.xlu0 %v9293_v12, %s8631_s8 }
 0x4bc   : > { %v2380_v54 = vpop.xlane.xlu1 %2379 }
 0x4bd   : > { %8169 = vrcp.f32 %v2380_v54 }
 0x4be   : > { %1410 = vrot.lane.b32.xlu0 %v9293_v12, %s8630_s6 }
 0x4c0   : > { %v2383_v43 = vpop.xlane.xlu0 %2382  ;;  %v2392_v23 = vpop.xlane.xlu1 %2391 }
 0x4c1   : > { %8171 = vrcp.f32 %v2383_v43 }
 0x4c2   : > { %1416 = vrot.lane.b32.xlu0 %v9293_v12, %s8632_s10 }
 0x4c4   : > { %v2395_v39 = vpop.xlane.xlu0 %2394 }
 0x4c5   : > { %8173 = vrcp.f32 %v2395_v39 }
 0x4c6   : > { %8175 = vrcp.f32 %v2392_v23 }
 0x4c7   : > { %v8170_v58 = vpop.eup %8169 }
 0x4c8   : > { %v2471_v35 = vmul.f32 %v8170_v58, %v9541_v42 }
 0x4cb   : > { %v8172_v33 = vpop.eup %8171 }
 0x4cc   : > { %v2473_v28 = vmul.f32 %v8172_v33, %v9547_v44 }
 0x4cd   : > { %2460 = vadd.xlane.f32.xlu1 %v2459_v5 }
 0x4ce   : > { %v2528_v0 = vpack.c.bf16 %v2473_v28, %v2471_v35 }
 0x4cf   : > { %v8174_v55 = vpop.eup %8173 }
 0x4d0   : > { %7605 = vmatmul.mubr.msk.bf16.vlgmr.msra.gmra.mrb[40].mxu0 %vm2173_vm2, %v2528_v0  ;;  %v8176_v19 = vpop.eup %8175  ;;  %v2481_v53 = vmul.f32 %v8174_v55, %v9553_v21 }
 0x4d1   : > { %7615 = vmatpush3.bf16.msra.mxu0 %v9471_v47  ;;  %7616 = vmatprep.mubr.msk.bf16.mxu0 %vm8629_vm0, %v8628_v59  ;;  %v2479_v42 = vmul.f32 %v8176_v19, %v9545_v14 }
 0x4d2   : > { %7626 = vmatprep.subr.bf16.mxu0 %v8628_v59 }
 0x4d3   : > { %v2530_v44 = vpack.c.bf16 %v2481_v53, %v2479_v42 }
 0x4d8   : > { %7617 = vmatmul.mubr.msk.bf16.vlgmr.msra.gmra.mrb[44].mxu0 %vm2173_vm2, %v2530_v44 }
 0x4d9   : > { %7627 = vmatpush3.bf16.msra.mxu0 %v9463_v37  ;;  %7628 = vmatprep.mubr.msk.bf16.mxu0 %vm8629_vm0, %v8628_v59 }
 0x4da   : > { %7638 = vmatprep.subr.bf16.mxu0 %v8628_v59 }
 0x4f1   : > { %v2404_v47 = vpop.xlane.xlu1 %2403 }
 0x4f2   : > { %8177 = vrcp.f32 %v2404_v47 }
 0x4f5   : > { %v2386_v32 = vpop.xlane.xlu1 %2385 }
 0x4f9   : > { %v2407_v57 = vpop.xlane.xlu0 %2406 }
 0x4fa   : > { %8179 = vrcp.f32 %v2407_v57  ;;  %v2416_v27 = vpop.xlane.xlu1 %2415 }
 0x4fb   : > { %8181 = vrcp.f32 %v2386_v32 }
 0x4fc   : > { %v8178_v34 = vpop.eup %8177 }
 0x4fd   : > { %v2389_v21 = vpop.xlane.xlu0 %2388  ;;  %v2487_v37 = vmul.f32 %v8178_v34, %v9567_v7 }
 0x4fe   : > { %8183 = vrcp.f32 %v2389_v21 }
 0x4ff   : > { %8185 = vrcp.f32 %v2416_v27 }
 0x501   : > { %v2398_v14 = vpop.xlane.xlu0 %2397 }
 0x504   : > { %v8180_v36 = vpop.eup %8179 }
 0x505   : > { %v2489_v52 = vmul.f32 %v8180_v36, %v9577_v29  ;;  %v2419_v8 = vpop.xlane.xlu0 %2418  ;;  %v8182_v54 = vpop.eup %8181 }
 0x506   : > { %8187 = vrcp.f32 %v2419_v8  ;;  %v2475_v39 = vmul.f32 %v8182_v54, %v9572_v25 }
 0x507   : > { %v2532_v43 = vpack.c.bf16 %v2489_v52, %v2487_v37  ;;  %8189 = vrcp.f32 %v2398_v14 }
 0x508   : > { %v8184_v23 = vpop.eup %8183 }
 0x509   : > { %v2477_v58 = vmul.f32 %v8184_v23, %v9586_v41  ;;  %7629 = vmatmul.mubr.msk.bf16.vlgmr.msra.gmra.mrb[48].mxu0 %vm2173_vm2, %v2532_v43  ;;  %v2401_v33 = vpop.xlane.xlu0 %2400  ;;  %v8186_v28 = vpop.eup %8185 }
 0x50a   : > { %7639 = vmatpush3.bf16.msra.mxu0 %v9295_v16  ;;  %8191 = vrcp.f32 %v2401_v33  ;;  %7640 = vmatprep.mubr.msk.bf16.mxu0 %vm8629_vm0, %v8628_v59  ;;  %v2495_v25 = vmul.f32 %v8186_v28, %v9580_v38 }
 0x50b   : > { %v2529_v7 = vpack.c.bf16 %v2477_v58, %v2475_v39  ;;  %7650 = vmatprep.subr.bf16.mxu0 %v8628_v59 }
 0x50d   : > { %v2413_v29 = vpop.xlane.xlu1 %2412  ;;  %7611 = vmatmul.mubr.msk.bf16.vlgmr.msra.gmra.mrb[56].mxu1 %vm2173_vm2, %v2529_v7  ;;  %v2428_v35 = vpop.xlane.xlu0 %2427 }
 0x50e   : > { %7621 = vmatpush3.bf16.msra.mxu1 %v9473_v48  ;;  %7622 = vmatprep.mubr.msk.bf16.mxu1 %vm8629_vm0, %v8628_v59  ;;  %8193 = vrcp.f32 %v2413_v29 }
 0x50f   : > { %7632 = vmatprep.subr.bf16.mxu1 %v8628_v59 }
 0x510   : > { %v8188_v16 = vpop.eup %8187 }
 0x511   : > { %v2497_v41 = vmul.f32 %v8188_v16, %v9597_v40  ;;  %v2410_v5 = vpop.xlane.xlu0 %2409  ;;  %v8190_v0 = vpop.eup %8189 }
 0x512   : > { %8195 = vrcp.f32 %v2410_v5  ;;  %v2483_v53 = vmul.f32 %v8190_v0, %v9591_v31 }
 0x513   : > { %v2534_v55 = vpack.c.bf16 %v2497_v41, %v2495_v25  ;;  %8197 = vrcp.f32 %v2428_v35 }
 0x514   : > { %v8192_v19 = vpop.eup %8191 }
 0x515   : > { %v2485_v48 = vmul.f32 %v8192_v19, %v9603_v10  ;;  %v2425_v42 = vpop.xlane.xlu1 %2424  ;;  %7641 = vmatmul.mubr.msk.bf16.vlgmr.msra.gmra.mrb[52].mxu0 %vm2173_vm2, %v2534_v55  ;;  %v2431_v44 = vpop.xlane.xlu0 %2430 }
 0x516   : > { %7651 = vmatpush3.bf16.msra.mxu0 %v9560_v11  ;;  %7652 = vmatprep.mubr.msk.bf16.mxu0 %vm8629_vm0, %v8628_v59  ;;  %8199 = vrcp.f32 %v2431_v44 }
 0x517   : > { %v2531_v38 = vpack.c.bf16 %v2485_v48, %v2483_v53  ;;  %7662 = vmatprep.subr.bf16.mxu0 %v8628_v59  ;;  %8201 = vrcp.f32 %v2425_v42 }
 0x518   : > { %v8194_v47 = vpop.eup %8193 }
 0x519   : > { %v2452_v40 = vpop.xlane.xlu1 %2451  ;;  %7623 = vmatmul.mubr.msk.bf16.vlgmr.msra.gmra.mrb[60].mxu1 %vm2173_vm2, %v2531_v38  ;;  %v2440_v31 = vpop.xlane.xlu0 %2439  ;;  %v2493_v10 = vmul.f32 %v8194_v47, %v9613_v45 }
 0x51a   : > { %7633 = vmatpush3.bf16.msra.mxu1 %v9557_v4  ;;  %7634 = vmatprep.mubr.msk.bf16.mxu1 %vm8629_vm0, %v8628_v59 }
 0x51b   : > { %7644 = vmatprep.subr.bf16.mxu1 %v8628_v59 }
 0x51c   : > { %v8196_v11 = vpop.eup %8195 }
 0x51d   : > { %v2491_v32 = vmul.f32 %v8196_v11, %v9619_v51  ;;  %v2455_v57 = vpop.xlane.xlu1 %2454  ;;  %v2422_v21 = vpop.xlane.xlu0 %2421 }
 0x51e   : > { %v8198_v27 = vpop.eup %8197  ;;  %8203 = vrcp.f32 %v2422_v21 }
 0x51f   : > { %v2533_v14 = vpack.c.bf16 %v2493_v10, %v2491_v32  ;;  %8205 = vrcp.f32 %v2440_v31  ;;  %v2503_v37 = vmul.f32 %v8198_v27, %v9610_v30 }
 0x520   : > { %v8200_v34 = vpop.eup %8199 }
 0x521   : > { %v2437_v36 = vpop.xlane.xlu1 %2436  ;;  %7635 = vmatmul.mubr.msk.bf16.vlgmr.msra.gmra.mrb[64].mxu1 %vm2173_vm2, %v2533_v14  ;;  %v2443_v4 = vpop.xlane.xlu0 %2442  ;;  %v2505_v52 = vmul.f32 %v8200_v34, %v9625_v24 }
 0x522   : > { %7645 = vmatpush3.bf16.msra.mxu1 %v9293_v12  ;;  %7646 = vmatprep.mubr.msk.bf16.mxu1 %vm8629_vm0, %v8628_v59  ;;  %8207 = vrcp.f32 %v2443_v4  ;;  %v8202_v54 = vpop.eup %8201 }
 0x523   : > { %7656 = vmatprep.subr.bf16.mxu1 %v8628_v59  ;;  %v2536_v45 = vpack.c.bf16 %v2505_v52, %v2503_v37  ;;  %8209 = vrcp.f32 %v2455_v57  ;;  %v2501_v43 = vmul.f32 %v8202_v54, %v9628_v49  ;;  %v7953_v54 = vld [vmem:[%s9069_s4 + $0x40] sm:$0xff]  }
 0x525   : > { %v2449_v51 = vpop.xlane.xlu1 %2448  ;;  %v2434_v8 = vpop.xlane.xlu0 %2433  ;;  %7653 = vmatmul.mubr.msk.bf16.vlgmr.msra.gmra.mrb[56].mxu0 %vm2173_vm2, %v2536_v45 }
 0x526   : > { %8211 = vrcp.f32 %v2434_v8  ;;  %7664 = vmatprep.mubr.msk.bf16.mxu0 %vm8629_vm0, %v8628_v59 }
 0x527   : > { %8213 = vrcp.f32 %v2437_v36 }
 0x528   : > { %v8204_v30 = vpop.eup %8203  ;;  %8215 = vrcp.f32 %v2452_v40 }
 0x529   : > { %v1409_v12 = vpop.permute.xlu1 %1408  ;;  %v2446_v24 = vpop.xlane.xlu0 %2445  ;;  %v2499_v23 = vmul.f32 %v8204_v30, %v9640_v22  ;;  %v7954_v30 = vld [vmem:[%s9069_s4] sm:$0xff]  }
 0x52a   : > { %7663 = vmatpush3.bf16.msra.mxu0 %v1409_v12  ;;  %v8206_v39 = vpop.eup %8205  ;;  %8217 = vrcp.f32 %v2446_v24 }
 0x52b   : > { %7674 = vmatprep.subr.bf16.mxu0 %v8628_v59  ;;  %v2535_v58 = vpack.c.bf16 %v2501_v43, %v2499_v23  ;;  %v2511_v29 = vmul.f32 %v8206_v39, %v9630_v13  ;;  %8219 = vrcp.f32 %v2449_v51 }
 0x52c   : > { %v8208_v33 = vpop.eup %8207 }
 0x52d   : > { %v2458_v7 = vpop.xlane.xlu0 %2457  ;;  %v2513_v35 = vmul.f32 %v8208_v33, %v9648_v26  ;;  %7647 = vmatmul.mubr.msk.bf16.vlgmr.msra.gmra.mrb[68].mxu1 %vm2173_vm2, %v2535_v58  ;;  %v8210_v49 = vpop.eup %8209 }
 0x52e   : > { %7658 = vmatprep.mubr.msk.bf16.mxu1 %vm8629_vm0, %v8628_v59  ;;  %v2521_v13 = vmul.f32 %v8210_v49, %v9646_v9  ;;  %8221 = vrcp.f32 %v2458_v7 }
 0x52f   : > { %v2538_v22 = vpack.c.bf16 %v2513_v35, %v2511_v29 }
 0x530   : > { %v8212_v28 = vpop.eup %8211 }
 0x531   : > { %v1415_v16 = vpop.permute.xlu0 %1414  ;;  %v8214_v25 = vpop.eup %8213  ;;  %7665 = vmatmul.mubr.msk.bf16.vlgmr.msra.gmra.mrb[60].mxu0 %vm2173_vm2, %v2538_v22  ;;  %v2507_v5 = vmul.f32 %v8212_v28, %v9662_v15 }
 0x532   : > { %v8216_v41 = vpop.eup %8215  ;;  %7675 = vmatpush3.bf16.msra.mxu0 %v1415_v16  ;;  %7676 = vmatprep.mubr.msk.bf16.mxu0 %vm8629_vm0, %v8628_v59  ;;  %v2509_v26 = vmul.f32 %v8214_v25, %v9650_v46 }
 0x533   : > { %v2519_v55 = vmul.f32 %v8216_v41, %v9636_v60  ;;  %7242 = vmatprep.subr.bf16.mxu0 %v7953_v54  ;;  %v7967_v54 = vld [vmem:[%s9069_s4 + $0x78] sm:$0xff]  }
 0x534   : > { %v2537_v19 = vpack.c.bf16 %v2509_v26, %v2507_v5  ;;  %v8218_v53 = vpop.eup %8217 }
 0x535   : > { %v1405_v0 = vpop.permute.xlu0 %1404  ;;  %v2540_v48 = vpack.c.bf16 %v2521_v13, %v2519_v55  ;;  %v8220_v42 = vpop.eup %8219  ;;  %v2515_v9 = vmul.f32 %v8218_v53, %v9670_v17  ;;  %v7956_v55 = vld [vmem:[%s9069_s4 + $0x8] sm:$0xff]  }
 0x536   : > { %7657 = vmatpush3.bf16.msra.mxu1 %v1405_v0  ;;  %v2517_v60 = vmul.f32 %v8220_v42, %v9665_v20  ;;  %v7955_v0 = vld [vmem:[%s9069_s4 + $0x48] sm:$0xff]  }
 0x537   : > { %7668 = vmatprep.subr.bf16.mxu1 %v8628_v59 }
 0x538   : > { %v2539_v46 = vpack.c.bf16 %v2517_v60, %v2515_v9  ;;  %v8222_v40 = vpop.eup %8221  ;;  %v7959_v9 = vld [vmem:[%s9069_s4 + $0x58] sm:$0xff]  }
 0x539   : > { %7659 = vmatmul.mubr.msk.bf16.vlgmr.msra.gmra.mrb[72].mxu1 %vm2173_vm2, %v2537_v19  ;;  %v1411_v15 = vpop.permute.xlu0 %1410  ;;  %7677 = vmatmul.mubr.msk.bf16.vlgmr.msra.gmra.mrb[64].mxu0 %vm2173_vm2, %v2540_v48  ;;  %v2523_v31 = vmul.f32 %v8222_v40, %v9681_v3  ;;  %v7957_v19 = vld [vmem:[%s9069_s4 + $0x50] sm:$0xff]  }
 0x53a   : > { %7669 = vmatpush3.bf16.msra.mxu1 %v1411_v15  ;;  %7670 = vmatprep.mubr.msk.bf16.mxu1 %vm8629_vm0, %v8628_v59  ;;  %v7958_v15 = vld [vmem:[%s9069_s4 + $0x10] sm:$0xff]  }
 0x53b   : > { %7680 = vmatprep.subr.bf16.mxu1 %v8628_v59  ;;  %7243 = vmatpush3.bf16.msra.mxu0 %v7954_v30  ;;  %v7968_v30 = vld [vmem:[%s9069_s4 + $0x38] sm:$0xff]  }
 0x53c   : > { %7244 = vmatprep.subr.bf16.mxu0 %v7955_v0 }
 0x53d   : > { %v1417_v44 = vpop.permute.xlu0 %1416 }
 0x53f   : > { %7245 = vmatpush3.bf16.msra.mxu0 %v7956_v55 }
 0x540   : > { %7246 = vmatprep.subr.bf16.mxu0 %v7957_v19 }
 0x541   : > { %7671 = vmatmul.mubr.msk.bf16.vlgmr.msra.gmra.mrb[76].mxu1 %vm2173_vm2, %v2539_v46 }
 0x542   : > { %7681 = vmatpush3.bf16.msra.mxu1 %v1417_v44  ;;  %7682 = vmatprep.mubr.msk.bf16.mxu1 %vm8629_vm0, %v8628_v59 }
 0x543   : > { %7247 = vmatpush3.bf16.msra.mxu0 %v7958_v15 }
 0x544   : > { %7248 = vmatprep.subr.bf16.mxu0 %v7959_v9 }
 0x55a   : > { %v2461_v38 = vpop.xlane.xlu1 %2460 }
 0x55b   : > { %8223 = vrcp.f32 %v2461_v38  ;;  %v7960_v38 = vld [vmem:[%s9069_s4 + $0x18] sm:$0xff]  }
 0x55c   : > { %7249 = vmatpush3.bf16.msra.mxu0 %v7960_v38 }
 0x565   : > { %v8224_v17 = vpop.eup %8223 }
 0x566   : > { %v2525_v47 = vmul.f32 %v8224_v17, %v9701_v18 }
 0x568   : > { %v9787_v11 = vpop.f32.mrb[36].mxu0  ;;  %v2541_v20 = vpack.c.bf16 %v2525_v47, %v2523_v31 }
 0x569   : > { %v7594_v10 = vpop.f32.mrb[37].mxu0 }
 0x56a   : > { %v9789_v32 = vpop.f32.mrb[38].mxu0  ;;  %7683 = vmatmul.mubr.msk.bf16.vlgmr.msra.gmra.mrb[80].mxu1 %vm2173_vm2, %v2541_v20  ;;  %v7961_v20 = vld [vmem:[%s9069_s4 + $0x60] sm:$0xff]  }
 0x56b   : > { %v7595_v57 = vpop.f32.mrb[39].mxu0  ;;  %4513 = vmatprep.mubr.bf16.mxu1 %v8627_v6  ;;  %v7962_v10 = vld [vmem:[%s9069_s4 + $0x20] sm:$0xff]   ;;  %7250 = vmatprep.subr.bf16.mxu0 %v7961_v20 }
 0x56c   : > { %v7963_v57 = vld [vmem:[%s9069_s4 + $0x68] sm:$0xff]   ;;  %7251 = vmatpush3.bf16.msra.mxu0 %v7962_v10 }
 0x56d   : > { %7252 = vmatprep.subr.bf16.mxu0 %v7963_v57 }
 0x570   : > { %v9793_v59 = vpop.f32.mrb[52].mxu1 }
 0x571   : > { %v7600_v21 = vpop.f32.mrb[53].mxu1 }
 0x572   : > { %v9795_v27 = vpop.f32.mrb[54].mxu1 }
 0x573   : > { %v7601_v3 = vpop.f32.mrb[55].mxu1 }
 0x574   : > { %v7964_v3 = vld [vmem:[%s9069_s4 + $0x28] sm:$0xff]  }
 0x575   : > { %7253 = vmatpush3.bf16.msra.mxu0 %v7964_v3 }
 0x5a3   : > { %v2667_v18 = vpop.f32.mrb[40].mxu0 }
 0x5a4   : > { %v7606_v14 = vpop.f32.mrb[41].mxu0 }
 0x5a5   : > { %v2670_v34 = vpop.f32.mrb[42].mxu0 }
 0x5a6   : > { %v7821_v36 = vpack.i.bf16 %v2670_v34, %v2667_v18  ;;  %v7607_v4 = vpop.f32.mrb[43].mxu0 }
 0x5a8   : > { %7822 = vrot.lane.b32.xlu1 %v7821_v36, %s8632_s10 }
 0x5ab   : > { %v2755_v37 = vpop.f32.mrb[44].mxu0 }
 0x5ac   : > { %v7618_v52 = vpop.f32.mrb[45].mxu0 }
 0x5ad   : > { %v2758_v45 = vpop.f32.mrb[46].mxu0  ;;  %v7966_v52 = vld [vmem:[%s9069_s4 + $0x30] sm:$0xff]  }
 0x5ae   : > { %v7826_v51 = vpack.i.bf16 %v2758_v45, %v2755_v37  ;;  %v7619_v8 = vpop.f32.mrb[47].mxu0  ;;  %v7965_v37 = vld [vmem:[%s9069_s4 + $0x70] sm:$0xff]  }
 0x5af   : > { %7254 = vmatprep.subr.bf16.mxu0 %v7965_v37 }
 0x5b0   : > { %7827 = vrot.lane.b32.xlu0 %v7826_v51, %s8630_s6  ;;  %7255 = vmatpush3.bf16.msra.mxu0 %v7966_v52 }
 0x5b1   : > { %7256 = vmatprep.subr.bf16.mxu0 %v7967_v54 }
 0x5b4   : > { %7257 = vmatpush3.bf16.msra.mxu0 %v7968_v30 }
 0x5dc   : > { %v9801_v12 = vpop.f32.mrb[48].mxu0 }
 0x5dd   : > { %v7630_v24 = vpop.f32.mrb[49].mxu0 }
 0x5de   : > { %v9803_v43 = vpop.f32.mrb[50].mxu0 }
 0x5df   : > { %v7846_v23 = vpack.i.bf16 %v9803_v43, %v9801_v12  ;;  %v7631_v39 = vpop.f32.mrb[51].mxu0 }
 0x5e0   : > { %v9807_v58 = vpop.f32.mrb[56].mxu1 }
 0x5e1   : > { %v7612_v33 = vpop.f32.mrb[57].mxu1 }
 0x5e2   : > { %v9809_v7 = vpop.f32.mrb[58].mxu1 }
 0x5e3   : > { %v7856_v29 = vpack.i.bf16 %v9809_v7, %v9807_v58  ;;  %v7613_v35 = vpop.f32.mrb[59].mxu1 }
 0x5e8   : > { %v9813_v49 = vpop.f32.mrb[52].mxu0 }
 0x5e9   : > { %v7642_v22 = vpop.f32.mrb[53].mxu0 }
 0x5ea   : > { %v9815_v28 = vpop.f32.mrb[54].mxu0 }
 0x5eb   : > { %v7643_v16 = vpop.f32.mrb[55].mxu0 }
 0x5ec   : > { %v9817_v25 = vpop.f32.mrb[60].mxu1 }
 0x5ed   : > { %v7624_v41 = vpop.f32.mrb[61].mxu1 }
 0x5ee   : > { %v9819_v5 = vpop.f32.mrb[62].mxu1 }
 0x5ef   : > { %v7861_v13 = vpack.i.bf16 %v9819_v5, %v9817_v25  ;;  %v7625_v26 = vpop.f32.mrb[63].mxu1 }
 0x5f4   : > { %v9826_v53 = vpop.f32.mrb[64].mxu1 }
 0x5f5   : > { %v7636_v48 = vpop.f32.mrb[65].mxu1 }
 0x5f6   : > { %v2890_v42 = vpop.f32.mrb[66].mxu1 }
 0x5f7   : > { %v7876_v60 = vpack.i.bf16 %v2890_v42, %v9826_v53  ;;  %v7637_v46 = vpop.f32.mrb[67].mxu1 }
 0x5f8   : > { %v3019_v44 = vpop.f32.mrb[56].mxu0 }
 0x5f9   : > { %v7654_v40 = vpop.f32.mrb[57].mxu0 }
 0x5fa   : > { %v3022_v17 = vpop.f32.mrb[58].mxu0 }
 0x5fb   : > { %v7831_v31 = vpack.i.bf16 %v3022_v17, %v3019_v44  ;;  %v7655_v47 = vpop.f32.mrb[59].mxu0 }
 0x5fd   : > { %7832 = vrot.lane.b32.xlu0 %v7831_v31, %s8632_s10 }
 0x600   : > { %v9836_v21 = vpop.f32.mrb[68].mxu1 }
 0x601   : > { %v7648_v18 = vpop.f32.mrb[69].mxu1 }
 0x602   : > { %v9839_v14 = vpop.f32.mrb[70].mxu1 }
 0x603   : > { %v7649_v34 = vpop.f32.mrb[71].mxu1 }
 0x604   : > { %v3107_v36 = vpop.f32.mrb[60].mxu0 }
 0x605   : > { %v7666_v4 = vpop.f32.mrb[61].mxu0 }
 0x606   : > { %v3110_v45 = vpop.f32.mrb[62].mxu0 }
 0x607   : > { %v7836_v51 = vpack.i.bf16 %v3110_v45, %v3107_v36  ;;  %v7667_v8 = vpop.f32.mrb[63].mxu0 }
 0x609   : > { %7837 = vrot.lane.b32.xlu0 %v7836_v51, %s8630_s6 }
 0x60c   : > { %v3063_v24 = vpop.f32.mrb[72].mxu1  ;;  %v3195_v39 = vpop.f32.mrb[64].mxu0 }
 0x60d   : > { %v7660_v33 = vpop.f32.mrb[73].mxu1  ;;  %v7678_v35 = vpop.f32.mrb[65].mxu0 }
 0x60e   : > { %v3066_v22 = vpop.f32.mrb[74].mxu1  ;;  %v3198_v41 = vpop.f32.mrb[66].mxu0 }
 0x60f   : > { %v7851_v16 = vpack.i.bf16 %v3066_v22, %v3063_v24  ;;  %v7661_v26 = vpop.f32.mrb[75].mxu1  ;;  %v7841_v0 = vpack.i.bf16 %v3198_v41, %v3195_v39  ;;  %v7679_v55 = vpop.f32.mrb[67].mxu0 }
 0x611   : > { %7852 = vrot.lane.b32.xlu1 %v7851_v16, %s8632_s10  ;;  %7842 = vrot.lane.b32.xlu0 %v7841_v0, %s8631_s8 }
 0x614   : > { %v3151_v19 = vpop.f32.mrb[76].mxu1 }
 0x615   : > { %v7672_v53 = vpop.f32.mrb[77].mxu1  ;;  %7847 = vrot.lane.b32.xlu0 %v7846_v23, %s8631_s8 }
 0x616   : > { %v3154_v48 = vpop.f32.mrb[78].mxu1 }
 0x617   : > { %v7866_v15 = vpack.i.bf16 %v3154_v48, %v3151_v19  ;;  %v7673_v42 = vpop.f32.mrb[79].mxu1 }
 0x619   : > { %7867 = vrot.lane.b32.xlu1 %v7866_v15, %s8630_s6  ;;  %7857 = vrot.lane.b32.xlu0 %v7856_v29, %s8632_s10 }
 0x61a   : > { %v7823_v17 = vpop.permute.xlu1 %7822 }
 0x61b   : > { %v7825_v47 = vunpack.i.h.bf16 %v7823_v17  ;;  %v7824_v25 = vunpack.i.l.bf16 %v7823_v17 }
 0x61d   : > { %7862 = vrot.lane.b32.xlu0 %v7861_v13, %s8630_s6 }
 0x621   : > { %7877 = vrot.lane.b32.xlu0 %v7876_v60, %s8631_s8 }
 0x622   : > { %v7828_v44 = vpop.permute.xlu0 %7827 }
 0x623   : > { %v7830_v57 = vunpack.i.h.bf16 %v7828_v44  ;;  %v7829_v3 = vunpack.i.l.bf16 %v7828_v44 }
 0x63d   : > { %v3239_v9 = vpop.f32.mrb[80].mxu1 }
 0x63e   : > { %v7684_v12 = vpop.f32.mrb[81].mxu1 }
 0x63f   : > { %v3242_v43 = vpop.f32.mrb[82].mxu1 }
 0x640   : > { %v7871_v23 = vpack.i.bf16 %v3242_v43, %v3239_v9  ;;  %v7685_v46 = vpop.f32.mrb[83].mxu1 }
 0x642   : > { %7872 = vrot.lane.b32.xlu1 %v7871_v23, %s8631_s8 }
 0x66f   : > { %v7833_v38 = vpop.permute.xlu0 %7832 }
 0x670   : > { %v7835_v58 = vunpack.i.h.bf16 %v7833_v38  ;;  %v7834_v7 = vunpack.i.l.bf16 %v7833_v38 }
 0x672   : > { %v3357_v13 = vsel %vm1420_vm1, %v9815_v28, %v7835_v58  ;;  %v3356_v60 = vsel %vm1420_vm1, %v9813_v49, %v7834_v7  ;;  %v3343_v28 = vsel %vm1420_vm1, %v9789_v32, %v7825_v47  ;;  %v3342_v49 = vsel %vm1420_vm1, %v9787_v11, %v7824_v25 }
 0x673   : > { %v3348_v8 = vsel %vm3346_vm3, %v3343_v28, %v7830_v57  ;;  %v3347_v54 = vsel %vm3346_vm3, %v3342_v49, %v7829_v3 }
 0x67b   : > { %v7838_v40 = vpop.permute.xlu0 %7837 }
 0x67c   : > { %v7840_v29 = vunpack.i.h.bf16 %v7838_v40  ;;  %v7839_v31 = vunpack.i.l.bf16 %v7838_v40 }
 0x67e   : > { %v3360_v18 = vsel %vm3346_vm3, %v3356_v60, %v7839_v31  ;;  %v3361_v34 = vsel %vm3346_vm3, %v3357_v13, %v7840_v29 }
 0x683   : > { %v7843_v5 = vpop.permute.xlu0 %7842  ;;  %v7853_v12 = vpop.permute.xlu1 %7852 }
 0x684   : > { %v7845_v20 = vunpack.i.h.bf16 %v7843_v5  ;;  %v7844_v10 = vunpack.i.l.bf16 %v7843_v5  ;;  %v7855_v23 = vunpack.i.h.bf16 %v7853_v12  ;;  %v7854_v46 = vunpack.i.l.bf16 %v7853_v12 }
 0x686   : > { %v3364_v36 = vsel %vm3351_vm4, %v3360_v18, %v7844_v10  ;;  %v3365_v4 = vsel %vm3351_vm4, %v3361_v34, %v7845_v20  ;;  %v3358_v40 = vsel %vm1420_vm1, %v9836_v21, %v7854_v46  ;;  %v6891_v21 = vld [vmem:[%s809_s21] ss:$0 sm:$0xff] }
 0x687   : > { %v7848_v37 = vpop.permute.xlu0 %7847  ;;  %v3369_v52 = vpack.c.bf16 %v3365_v4, %v3364_v36  ;;  %v8241_v18 = vld [vmem:[#allocation2] sm:$0xff]  ;;  %v8242_v36 = vld [vmem:[#allocation2 + $0x8] sm:$0xff] }
 0x688   : > { %v7850_v45 = vunpack.i.h.bf16 %v7848_v37  ;;  %v7849_v51 = vunpack.i.l.bf16 %v7848_v37 }
 0x689   : > { %3539 = vmatprep.mubr.bf16.mxu0 %v3369_v52 }
 0x68a   : > { %v3352_v30 = vsel %vm3351_vm4, %v3347_v54, %v7849_v51  ;;  %v3353_v24 = vsel %vm3351_vm4, %v3348_v8, %v7850_v45 }
 0x68b   : > { %v3368_v39 = vpack.c.bf16 %v3353_v24, %v3352_v30  ;;  %v7858_v33 = vpop.permute.xlu0 %7857  ;;  %v7868_v43 = vpop.permute.xlu1 %7867  ;;  %v8243_v30 = vld [vmem:[#allocation2 + $0x10] sm:$0xff] }
 0x68c   : > { %v7860_v22 = vunpack.i.h.bf16 %v7858_v33  ;;  %v7859_v32 = vunpack.i.l.bf16 %v7858_v33  ;;  %v7870_v44 = vunpack.i.h.bf16 %v7868_v43 }
 0x68d   : > { %3540 = vmatmul.mubr.bf16.vlgmr.msra.gmra.mrb[68].mxu0 %v3368_v39  ;;  %v8244_v39 = vld [vmem:[#allocation2 + $0x18] sm:$0xff] }
 0x68e   : > { %v3345_v26 = vsel %vm1420_vm1, %v9795_v27, %v7860_v22  ;;  %v3344_v0 = vsel %vm1420_vm1, %v9793_v59, %v7859_v32  ;;  %v7869_v27 = vunpack.i.l.bf16 %v7868_v43  ;;  %v3359_v59 = vsel %vm1420_vm1, %v9839_v14, %v7855_v23  ;;  %v3637_v22 = vld [vmem:[%s9077_s3 + $0x40] sm:$0xff]  ;;  %v3630_v32 = vld [vmem:[%s9077_s3 + $0x8] sm:$0xff] }
 0x68f   : > { %v7863_v35 = vpop.permute.xlu0 %7862  ;;  %v3363_v7 = vsel %vm3346_vm3, %v3359_v59, %v7870_v44 }
 0x690   : > { %v7865_v16 = vunpack.i.h.bf16 %v7863_v35  ;;  %v7864_v41 = vunpack.i.l.bf16 %v7863_v35  ;;  %v3362_v29 = vsel %vm3346_vm3, %v3358_v40, %v7869_v27  ;;  %v3629_v35 = vld [vmem:[%s9077_s3] sm:$0xff] }
 0x692   : > { %v3350_v53 = vsel %vm3346_vm3, %v3345_v26, %v7865_v16  ;;  %v3349_v48 = vsel %vm3346_vm3, %v3344_v0, %v7864_v41  ;;  %v6910_v16 = vcombine.low %v3629_v35, %v3637_v22  ;;  %v6911_v41 = vcombine.high %v3629_v35, %v3637_v22  ;;  %v3645_v26 = vld [vmem:[%s9077_s3 + $0x80] sm:$0xff] }
 0x693   : > { %v7878_v11 = vpop.permute.xlu0 %7877  ;;  %v3653_v0 = vld [vmem:[%s9077_s3 + $0xc0] sm:$0xff] }
 0x694   : > { %v7880_v55 = vunpack.i.h.bf16 %v7878_v11  ;;  %v7879_v19 = vunpack.i.l.bf16 %v7878_v11  ;;  %v3638_v11 = vld [vmem:[%s9077_s3 + $0x48] sm:$0xff]  ;;  %4481 = vmatprep.subr.bf16.mxu1 %v6911_v41 }
 0x695   : > { %4482 = vmatpush1.bf16.msra.mxu1 %v6910_v16  ;;  %v3733_v16 = vld [vmem:[%s9077_s3 + $0x340] sm:$0xff]  ;;  %v3726_v41 = vld [vmem:[%s9077_s3 + $0x308] sm:$0xff] }
 0x696   : > { %v3354_v15 = vsel %vm3351_vm4, %v3349_v48, %v7879_v19  ;;  %v3355_v42 = vsel %vm3351_vm4, %v3350_v53, %v7880_v55  ;;  %v6912_v55 = vcombine.low %v3630_v32, %v3638_v11  ;;  %v6913_v19 = vcombine.high %v3630_v32, %v3638_v11  ;;  %v3646_v48 = vld [vmem:[%s9077_s3 + $0x88] sm:$0xff]  ;;  %v3725_v32 = vld [vmem:[%s9077_s3 + $0x300] sm:$0xff] }
 0x697   : > { %v3370_v9 = vpack.c.bf16 %v3355_v42, %v3354_v15  ;;  %v6927_v53 = vcombine.high %v3645_v26, %v3653_v0  ;;  %v3654_v15 = vld [vmem:[%s9077_s3 + $0xc8] sm:$0xff]  ;;  %v7007_v11 = vcombine.high %v3725_v32, %v3733_v16 }
 0x698   : > { %v6929_v42 = vcombine.high %v3646_v48, %v3654_v15  ;;  %4534 = vmatprep.subr.bf16.mxu0 %v6913_v19  ;;  %v6928_v12 = vcombine.low %v3646_v48, %v3654_v15  ;;  %v3749_v48 = vld [vmem:[%s9077_s3 + $0x3c0] sm:$0xff]  ;;  %v3742_v15 = vld [vmem:[%s9077_s3 + $0x388] sm:$0xff] }
 0x699   : > { %4535 = vmatpush1.bf16.msra.mxu0 %v6912_v55  ;;  %4483 = vmatprep.subr.bf16.mxu1 %v6927_v53  ;;  %v3741_v53 = vld [vmem:[%s9077_s3 + $0x380] sm:$0xff] }
 0x69a   : > { %4536 = vmatprep.subr.bf16.mxu0 %v6929_v42  ;;  %v7023_v42 = vcombine.high %v3741_v53, %v3749_v48 }
 0x69d   : > { %4537 = vmatpush1.bf16.msra.mxu0 %v6928_v12  ;;  %v7022_v12 = vcombine.low %v3741_v53, %v3749_v48  ;;  %v3687_v53 = vld [vmem:[%s9077_s3 + $0x1d0] sm:$0xff]  ;;  %v3680_v48 = vld [vmem:[%s9077_s3 + $0x198] sm:$0xff] }
 0x6b4   : > { %v7873_v38 = vpop.permute.xlu1 %7872 }
 0x6b5   : > { %v7875_v17 = vunpack.i.h.bf16 %v7873_v38  ;;  %v7874_v58 = vunpack.i.l.bf16 %v7873_v38 }
 0x6b7   : > { %v3366_v31 = vsel %vm3351_vm4, %v3362_v29, %v7874_v58  ;;  %v3367_v47 = vsel %vm3351_vm4, %v3363_v7, %v7875_v17  ;;  %v3661_v17 = vld [vmem:[%s9077_s3 + $0x100] sm:$0xff]  ;;  %v3662_v7 = vld [vmem:[%s9077_s3 + $0x108] sm:$0xff] }
 0x6b8   : > { %v3371_v25 = vpack.c.bf16 %v3367_v47, %v3366_v31  ;;  %v3669_v58 = vld [vmem:[%s9077_s3 + $0x140] sm:$0xff]  ;;  %v3670_v31 = vld [vmem:[%s9077_s3 + $0x148] sm:$0xff] }
 0x6b9   : > { %v6943_v29 = vcombine.high %v3661_v17, %v3669_v58  ;;  %v6942_v47 = vcombine.low %v3661_v17, %v3669_v58 }
 0x6ba   : > { %3547 = vmatprep.mubr.bf16.mxu0 %v3371_v25  ;;  %v6944_v25 = vcombine.low %v3662_v7, %v3670_v31 }
 0x6bb   : > { %3548 = vmatmul.mubr.bf16.gmra.mrb[72].mxu0 %v3370_v9  ;;  %v6926_v9 = vcombine.low %v3645_v26, %v3653_v0  ;;  %v3734_v26 = vld [vmem:[%s9077_s3 + $0x348] sm:$0xff]  ;;  %v7006_v0 = vcombine.low %v3725_v32, %v3733_v16  ;;  %v3671_v32 = vld [vmem:[%s9077_s3 + $0x150] sm:$0xff]  ;;  %v3664_v16 = vld [vmem:[%s9077_s3 + $0x118] sm:$0xff] }
 0x6bc   : > { %4566 = vmatprep.mubr.bf16.mxu0 %v8627_v6  ;;  %v7008_v55 = vcombine.low %v3726_v41, %v3734_v26  ;;  %v7009_v19 = vcombine.high %v3726_v41, %v3734_v26  ;;  %v3672_v41 = vld [vmem:[%s9077_s3 + $0x158] sm:$0xff] }
 0x6bd   : > { %4484 = vmatpush1.bf16.msra.mxu1 %v6926_v9  ;;  %v3750_v9 = vld [vmem:[%s9077_s3 + $0x3c8] sm:$0xff] }
 0x6be   : > { %4485 = vmatprep.subr.bf16.mxu1 %v6943_v29 }
 0x6c1   : > { %4486 = vmatpush1.bf16.msra.mxu1 %v6942_v47  ;;  %v3639_v47 = vld [vmem:[%s9077_s3 + $0x50] sm:$0xff] }
 0x760   : > { %v7258_v5 = vpop.f32.mrb[68].mxu0 }
 0x761   : > { %v7259_v14 = vpop.f32.mrb[69].mxu0 }
 0x762   : > { %v7260_v13 = vadd.f32 %v7259_v14, %v7258_v5  ;;  %v7261_v60 = vpop.f32.mrb[70].mxu0  ;;  %v6945_v5 = vcombine.high %v3662_v7, %v3670_v31  ;;  %v3685_v14 = vld [vmem:[%s9077_s3 + $0x1c0] sm:$0xff]  ;;  %v3631_v31 = vld [vmem:[%s9077_s3 + $0x10] sm:$0xff] }
 0x763   : > { %v7262_v20 = vpop.f32.mrb[71].mxu0 }
 0x764   : > { %v3542_v10 = vadd.f32 %v7260_v13, %v6891_v21  ;;  %v7263_v57 = vadd.f32 %v7262_v20, %v7261_v60  ;;  %4538 = vmatprep.subr.bf16.mxu0 %v6945_v5  ;;  %v3678_v13 = vld [vmem:[%s9077_s3 + $0x188] sm:$0xff]  ;;  %v6915_v5 = vcombine.high %v3631_v31, %v3639_v47 }
 0x765   : > { %4539 = vmatpush1.bf16.msra.mxu0 %v6944_v25  ;;  %v3686_v20 = vld [vmem:[%s9077_s3 + $0x1c8] sm:$0xff]  ;;  %v3632_v25 = vld [vmem:[%s9077_s3 + $0x18] sm:$0xff] }
 0x766   : > { %v3545_v3 = vadd.f32 %v7263_v57, %v6891_v21  ;;  %v3556_v34 = vadd.f32 %v8241_v18, %v3542_v10  ;;  %v6960_v57 = vcombine.low %v3678_v13, %v3686_v20  ;;  %v3693_v18 = vld [vmem:[%s9077_s3 + $0x200] sm:$0xff] }
 0x768   : > { %3560 = vadd.xlane.f32.xlu1 %v3556_v34  ;;  %v3557_v4 = vadd.f32 %v8242_v36, %v3545_v3  ;;  %v6961_v3 = vcombine.high %v3678_v13, %v3686_v20  ;;  %v3694_v36 = vld [vmem:[%s9077_s3 + $0x208] sm:$0xff] }
 0x76a   : > { %3562 = vadd.xlane.f32.xlu0 %v3557_v4  ;;  %4540 = vmatprep.subr.bf16.mxu0 %v6961_v3 }
 0x76b   : > { %4541 = vmatpush1.bf16.msra.mxu0 %v6960_v57 }
 0x78e   : > { %v7264_v37 = vpop.f32.mrb[72].mxu0 }
 0x78f   : > { %v7265_v52 = vpop.f32.mrb[73].mxu0 }
 0x790   : > { %v7266_v28 = vadd.f32 %v7265_v52, %v7264_v37  ;;  %v7267_v49 = vpop.f32.mrb[74].mxu0  ;;  %v3702_v37 = vld [vmem:[%s9077_s3 + $0x248] sm:$0xff] }
 0x791   : > { %v7268_v45 = vpop.f32.mrb[75].mxu0 }
 0x792   : > { %v3550_v51 = vadd.f32 %v7266_v28, %v6891_v21  ;;  %v7269_v8 = vadd.f32 %v7268_v45, %v7267_v49  ;;  %v6976_v28 = vcombine.low %v3694_v36, %v3702_v37  ;;  %v6977_v49 = vcombine.high %v3694_v36, %v3702_v37  ;;  %v3709_v45 = vld [vmem:[%s9077_s3 + $0x280] sm:$0xff] }
 0x794   : > { %v3553_v54 = vadd.f32 %v7269_v8, %v6891_v21  ;;  %v9901_v24 = vadd.f32 %v8243_v30, %v3550_v51  ;;  %v3677_v21 = vld [vmem:[%s9077_s3 + $0x180] sm:$0xff]  ;;  %4542 = vmatprep.subr.bf16.mxu0 %v6977_v49  ;;  %v3710_v8 = vld [vmem:[%s9077_s3 + $0x288] sm:$0xff] }
 0x795   : > { %v6959_v60 = vcombine.high %v3677_v21, %v3685_v14  ;;  %v6958_v10 = vcombine.low %v3677_v21, %v3685_v14  ;;  %v3717_v51 = vld [vmem:[%s9077_s3 + $0x2c0] sm:$0xff]  ;;  %4543 = vmatpush1.bf16.msra.mxu0 %v6976_v28  ;;  %v3718_v30 = vld [vmem:[%s9077_s3 + $0x2c8] sm:$0xff]  ;;  %v3640_v21 = vld [vmem:[%s9077_s3 + $0x58] sm:$0xff] }
 0x796   : > { %3564 = vadd.xlane.f32.xlu0 %v9901_v24  ;;  %v9904_v33 = vadd.f32 %v8244_v39, %v3553_v54  ;;  %v6991_v54 = vcombine.high %v3709_v45, %v3717_v51  ;;  %v6990_v39 = vcombine.low %v3709_v45, %v3717_v51  ;;  %v6992_v35 = vcombine.low %v3710_v8, %v3718_v30  ;;  %v9973_v28 = vld [vmem:[%s10512_s13] ss:$0 sm:$0xff]  ;;  %v3647_v45 = vld [vmem:[%s9077_s3 + $0x90] sm:$0xff] }
 0x797   : > { %4487 = vmatprep.subr.bf16.mxu1 %v6959_v60  ;;  %v6993_v22 = vcombine.high %v3710_v8, %v3718_v30  ;;  %v6916_v14 = vcombine.low %v3632_v25, %v3640_v21  ;;  %v6917_v13 = vcombine.high %v3632_v25, %v3640_v21  ;;  %v3655_v51 = vld [vmem:[%s9077_s3 + $0xd0] sm:$0xff]  ;;  %v3648_v8 = vld [vmem:[%s9077_s3 + $0x98] sm:$0xff] }
 0x798   : > { %3566 = vadd.xlane.f32.xlu1 %v9904_v33  ;;  %4488 = vmatpush1.bf16.msra.mxu1 %v6958_v10  ;;  %v3719_v25 = vld [vmem:[%s9077_s3 + $0x2d0] sm:$0xff]  ;;  %v3720_v21 = vld [vmem:[%s9077_s3 + $0x2d8] sm:$0xff] }
 0x799   : > { %4544 = vmatprep.subr.bf16.mxu0 %v6993_v22  ;;  %v3663_v22 = vld [vmem:[%s9077_s3 + $0x110] sm:$0xff] }
 0x79a   : > { %4545 = vmatpush1.bf16.msra.mxu0 %v6992_v35 }
 0x79b   : > { %4546 = vmatprep.subr.bf16.mxu0 %v7009_v19  ;;  %v3679_v19 = vld [vmem:[%s9077_s3 + $0x190] sm:$0xff] }
 0x79e   : > { %4547 = vmatpush1.bf16.msra.mxu0 %v7008_v55  ;;  %v6949_v55 = vcombine.high %v3664_v16, %v3672_v41 }
 0x7f5   : > { %v3561_v43 = vpop.xlane.xlu1 %3560 }
 0x7f6   : > { %v3569_v23 = vmul.f32 0.0078125, %v3561_v43  ;;  %v7024_v43 = vcombine.low %v3742_v15, %v3750_v9 }
 0x7f7   : > { %v3563_v46 = vpop.xlane.xlu0 %3562 }
 0x7f8   : > { %v9915_v44 = vsub.f32 %v3556_v34, %v3569_v23  ;;  %v3570_v27 = vmul.f32 0.0078125, %v3563_v46  ;;  %v3701_v34 = vld [vmem:[%s9077_s3 + $0x240] sm:$0xff]  ;;  %v7025_v23 = vcombine.high %v3742_v15, %v3750_v9  ;;  %v3688_v15 = vld [vmem:[%s9077_s3 + $0x1d8] sm:$0xff]  ;;  %v6948_v9 = vcombine.low %v3664_v16, %v3672_v41 }
 0x7f9   : > { %v6974_v52 = vcombine.low %v3693_v18, %v3701_v34 }
 0x7fa   : > { %v9917_v38 = vsub.f32 %v3557_v4, %v3570_v27  ;;  %v3577_v59 = vmul.f32 %v9915_v44, %v9915_v44  ;;  %v6975_v4 = vcombine.high %v3693_v18, %v3701_v34  ;;  %4548 = vmatprep.subr.bf16.mxu0 %v7025_v23  ;;  %v9966_v34 = vld [vmem:[%s812_s1] ss:$0 sm:$0xff]  ;;  %v3695_v23 = vld [vmem:[%s9077_s3 + $0x210] sm:$0xff] }
 0x7fb   : > { %4549 = vmatpush1.bf16.msra.mxu0 %v7024_v43  ;;  %v6965_v43 = vcombine.high %v3680_v48, %v3688_v15 }
 0x7fc   : > { %3581 = vadd.xlane.f32.xlu0 %v3577_v59  ;;  %v3578_v40 = vmul.f32 %v9917_v38, %v9917_v38  ;;  %4489 = vmatprep.subr.bf16.mxu1 %v6975_v4 }
 0x7fd   : > { %4490 = vmatpush1.bf16.msra.mxu1 %v6974_v52  ;;  %4640 = vmatprep.subr.bf16.mxu0 %v6917_v13 }
 0x7fe   : > { %3583 = vadd.xlane.f32.xlu1 %v3578_v40  ;;  %4491 = vmatprep.subr.bf16.mxu1 %v6991_v54  ;;  %v3656_v54 = vld [vmem:[%s9077_s3 + $0xd8] sm:$0xff] }
 0x7ff   : > { %v6933_v35 = vcombine.high %v3648_v8, %v3656_v54  ;;  %v6932_v26 = vcombine.low %v3648_v8, %v3656_v54 }
 0x801   : > { %4492 = vmatpush1.bf16.msra.mxu1 %v6990_v39 }
 0x802   : > { %4493 = vmatprep.subr.bf16.mxu1 %v7007_v11  ;;  %v6930_v11 = vcombine.low %v3647_v45, %v3655_v51 }
 0x805   : > { %4494 = vmatpush1.bf16.msra.mxu1 %v7006_v0  ;;  %v6947_v0 = vcombine.high %v3663_v22, %v3671_v32 }
 0x806   : > { %4495 = vmatprep.subr.bf16.mxu1 %v7023_v42  ;;  %v6946_v42 = vcombine.low %v3663_v22, %v3671_v32 }
 0x809   : > { %4496 = vmatpush1.bf16.msra.mxu1 %v7022_v12  ;;  %v6963_v12 = vcombine.high %v3679_v19, %v3687_v53 }
 0x80a   : > { %4587 = vmatprep.subr.bf16.mxu1 %v6915_v5  ;;  %v3712_v5 = vld [vmem:[%s9077_s3 + $0x298] sm:$0xff] }
 0x823   : > { %v3565_v46 = vpop.xlane.xlu0 %3564 }
 0x824   : > { %v3571_v27 = vmul.f32 0.0078125, %v3565_v46  ;;  %v3703_v46 = vld [vmem:[%s9077_s3 + $0x250] sm:$0xff] }
 0x825   : > { %v3567_v59 = vpop.xlane.xlu1 %3566 }
 0x826   : > { %v9948_v40 = vsub.f32 %v9901_v24, %v3571_v27  ;;  %v3572_v17 = vmul.f32 0.0078125, %v3567_v59  ;;  %v6914_v24 = vcombine.low %v3631_v31, %v3639_v47  ;;  %v3696_v27 = vld [vmem:[%s9077_s3 + $0x218] sm:$0xff]  ;;  %v3711_v47 = vld [vmem:[%s9077_s3 + $0x290] sm:$0xff] }
 0x827   : > { %v3704_v59 = vld [vmem:[%s9077_s3 + $0x258] sm:$0xff]  ;;  %v6995_v13 = vcombine.high %v3711_v47, %v3719_v25 }
 0x828   : > { %v9951_v58 = vsub.f32 %v9904_v33, %v3572_v17  ;;  %v3579_v7 = vmul.f32 %v9948_v40, %v9948_v40  ;;  %v6962_v17 = vcombine.low %v3679_v19, %v3687_v53  ;;  %v6981_v31 = vcombine.high %v3696_v27, %v3704_v59 }
 0x82a   : > { %3585 = vadd.xlane.f32.xlu0 %v3579_v7  ;;  %v3580_v29 = vmul.f32 %v9951_v58, %v9951_v58  ;;  %v6964_v7 = vcombine.low %v3680_v48, %v3688_v15 }
 0x82c   : > { %3587 = vadd.xlane.f32.xlu1 %v3580_v29  ;;  %v6979_v29 = vcombine.high %v3695_v23, %v3703_v46 }
 0x889   : > { %v3582_v33 = vpop.xlane.xlu0 %3581 }
 0x88a   : > { %v3589_v60 = vmul.f32 0.0078125, %v3582_v33  ;;  %v6997_v33 = vcombine.high %v3712_v5, %v3720_v21 }
 0x88b   : > { %v3584_v20 = vpop.xlane.xlu1 %3583 }
 0x88c   : > { %v3593_v10 = vadd.f32 1e-05, %v3589_v60  ;;  %v3590_v57 = vmul.f32 0.0078125, %v3584_v20  ;;  %v3727_v60 = vld [vmem:[%s9077_s3 + $0x310] sm:$0xff] }
 0x88d   : > { %v3735_v20 = vld [vmem:[%s9077_s3 + $0x350] sm:$0xff] }
 0x88e   : > { %8225 = vrsqrt.f32 %v3593_v10  ;;  %v3594_v3 = vadd.f32 1e-05, %v3590_v57  ;;  %v3728_v10 = vld [vmem:[%s9077_s3 + $0x318] sm:$0xff] }
 0x88f   : > { %v3736_v57 = vld [vmem:[%s9077_s3 + $0x358] sm:$0xff] }
 0x890   : > { %8227 = vrsqrt.f32 %v3594_v3  ;;  %v6994_v3 = vcombine.low %v3711_v47, %v3719_v25 }
 0x898   : > { %v8226_v18 = vpop.eup %8225 }
 0x899   : > { %v3601_v36 = vmul.f32 %v8226_v18, %v9915_v44  ;;  %v6996_v18 = vcombine.low %v3712_v5, %v3720_v21  ;;  %v3665_v5 = vld [vmem:[%s9077_s3 + $0x120] sm:$0xff] }
 0x89a   : > { %v8228_v4 = vpop.eup %8227  ;;  %v3673_v21 = vld [vmem:[%s9077_s3 + $0x160] sm:$0xff] }
 0x89b   : > { %v3612_v37 = vmul.f32 %v9966_v34, %v3601_v36  ;;  %v3602_v52 = vmul.f32 %v8228_v4, %v9917_v38  ;;  %v6931_v38 = vcombine.high %v3647_v45, %v3655_v51  ;;  %v7011_v36 = vcombine.high %v3727_v60, %v3735_v20  ;;  %v3744_v45 = vld [vmem:[%s9077_s3 + $0x398] sm:$0xff] }
 0x89c   : > { %v7013_v4 = vcombine.high %v3728_v10, %v3736_v57  ;;  %v3752_v51 = vld [vmem:[%s9077_s3 + $0x3d8] sm:$0xff] }
 0x89d   : > { %v3613_v49 = vmul.f32 %v9966_v34, %v3602_v52  ;;  %v9981_v30 = vadd.f32 %v9973_v28, %v3612_v37  ;;  %v3743_v37 = vld [vmem:[%s9077_s3 + $0x390] sm:$0xff]  ;;  %v7029_v41 = vcombine.high %v3744_v45, %v3752_v51  ;;  %v7028_v48 = vcombine.low %v3744_v45, %v3752_v51  ;;  %v3705_v45 = vld [vmem:[%s9077_s3 + $0x260] sm:$0xff]  ;;  %v3698_v51 = vld [vmem:[%s9077_s3 + $0x228] sm:$0xff] }
 0x89f   : > { %v9984_v44 = vadd.f32 %v9973_v28, %v3613_v49  ;;  %v3751_v49 = vld [vmem:[%s9077_s3 + $0x3d0] sm:$0xff] }
 0x8a0   : > { %v7027_v16 = vcombine.high %v3743_v37, %v3751_v49  ;;  %v7026_v53 = vcombine.low %v3743_v37, %v3751_v49  ;;  %v3697_v49 = vld [vmem:[%s9077_s3 + $0x220] sm:$0xff] }
 0x8a1   : > { %v9988_v39 = vpack.c.bf16 %v9984_v44, %v9981_v30 }
 0x8a3   : > { %4514 = vmatmul.mubr.bf16.vlgmr.msra.gmra.mrb[84].mxu1 %v9988_v39  ;;  %4567 = vmatmul.mubr.bf16.vlgmr.msra.gmra.mrb[76].mxu0 %v9988_v39 }
 0x8a4   : > { %4588 = vmatpush1.bf16.msra.mxu1 %v6914_v24  ;;  %4641 = vmatpush1.bf16.msra.mxu0 %v6916_v14  ;;  %v6978_v24 = vcombine.low %v3695_v23, %v3703_v46  ;;  %v6980_v14 = vcombine.low %v3696_v27, %v3704_v59 }
 0x8a5   : > { %4589 = vmatprep.subr.bf16.mxu1 %v6931_v38  ;;  %4642 = vmatprep.subr.bf16.mxu0 %v6933_v35  ;;  %v7010_v38 = vcombine.low %v3727_v60, %v3735_v20  ;;  %v7012_v35 = vcombine.low %v3728_v10, %v3736_v57  ;;  %v6951_v60 = vcombine.high %v3665_v5, %v3673_v21  ;;  %v3681_v10 = vld [vmem:[%s9077_s3 + $0x1a0] sm:$0xff] }
 0x8a6   : > { %4523 = vmatprep.mubr.bf16.mxu1 %v8627_v6  ;;  %4576 = vmatprep.mubr.bf16.mxu0 %v8627_v6  ;;  %v3689_v57 = vld [vmem:[%s9077_s3 + $0x1e0] sm:$0xff] }
 0x8a7   : > { %v6967_v37 = vcombine.high %v3681_v10, %v3689_v57 }
 0x8a8   : > { %4590 = vmatpush1.bf16.msra.mxu1 %v6930_v11  ;;  %4643 = vmatpush1.bf16.msra.mxu0 %v6932_v26  ;;  %v3633_v11 = vld [vmem:[%s9077_s3 + $0x20] sm:$0xff] }
 0x8a9   : > { %4591 = vmatprep.subr.bf16.mxu1 %v6947_v0  ;;  %4644 = vmatprep.subr.bf16.mxu0 %v6949_v55  ;;  %v3641_v26 = vld [vmem:[%s9077_s3 + $0x60] sm:$0xff]  ;;  %v3634_v0 = vld [vmem:[%s9077_s3 + $0x28] sm:$0xff] }
 0x8aa   : > { %v3642_v55 = vld [vmem:[%s9077_s3 + $0x68] sm:$0xff]  ;;  %v6919_v15 = vcombine.high %v3633_v11, %v3641_v26 }
 0x8ac   : > { %4592 = vmatpush1.bf16.msra.mxu1 %v6946_v42  ;;  %4645 = vmatpush1.bf16.msra.mxu0 %v6948_v9  ;;  %v6921_v42 = vcombine.high %v3634_v0, %v3642_v55 }
 0x8ad   : > { %4593 = vmatprep.subr.bf16.mxu1 %v6963_v12  ;;  %4646 = vmatprep.subr.bf16.mxu0 %v6965_v43 }
 0x8b0   : > { %4594 = vmatpush1.bf16.msra.mxu1 %v6962_v17  ;;  %4647 = vmatpush1.bf16.msra.mxu0 %v6964_v7 }
 0x8b1   : > { %4595 = vmatprep.subr.bf16.mxu1 %v6979_v29  ;;  %4648 = vmatprep.subr.bf16.mxu0 %v6981_v31  ;;  %v3658_v29 = vld [vmem:[%s9077_s3 + $0xe8] sm:$0xff]  ;;  %v6920_v31 = vcombine.low %v3634_v0, %v3642_v55 }
 0x8b4   : > { %4596 = vmatpush1.bf16.msra.mxu1 %v6978_v24  ;;  %4649 = vmatpush1.bf16.msra.mxu0 %v6980_v14  ;;  %v3666_v24 = vld [vmem:[%s9077_s3 + $0x128] sm:$0xff] }
 0x8b5   : > { %4597 = vmatprep.subr.bf16.mxu1 %v6995_v13  ;;  %4650 = vmatprep.subr.bf16.mxu0 %v6997_v33  ;;  %v3674_v14 = vld [vmem:[%s9077_s3 + $0x168] sm:$0xff] }
 0x8b6   : > { %v6953_v20 = vcombine.high %v3666_v24, %v3674_v14 }
 0x8b7   : > { %v3586_v52 = vpop.xlane.xlu0 %3585 }
 0x8b8   : > { %v3591_v8 = vmul.f32 0.0078125, %v3586_v52  ;;  %4598 = vmatpush1.bf16.msra.mxu1 %v6994_v3  ;;  %4651 = vmatpush1.bf16.msra.mxu0 %v6996_v18  ;;  %v3682_v3 = vld [vmem:[%s9077_s3 + $0x1a8] sm:$0xff] }
 0x8b9   : > { %v3588_v54 = vpop.xlane.xlu1 %3587  ;;  %4599 = vmatprep.subr.bf16.mxu1 %v7011_v36  ;;  %4652 = vmatprep.subr.bf16.mxu0 %v7013_v4  ;;  %v3690_v18 = vld [vmem:[%s9077_s3 + $0x1e8] sm:$0xff]  ;;  %v6950_v36 = vcombine.low %v3665_v5, %v3673_v21  ;;  %v6952_v4 = vcombine.low %v3666_v24, %v3674_v14  ;;  %v3636_v5 = vld [vmem:[%s9077_s3 + $0x38] sm:$0xff] }
 0x8ba   : > { %v3595_v22 = vadd.f32 1e-05, %v3591_v8  ;;  %v3592_v32 = vmul.f32 0.0078125, %v3588_v54  ;;  %v6969_v52 = vcombine.high %v3682_v3, %v3690_v18  ;;  %v3706_v8 = vld [vmem:[%s9077_s3 + $0x268] sm:$0xff]  ;;  %v6966_v54 = vcombine.low %v3681_v10, %v3689_v57  ;;  %v3644_v21 = vld [vmem:[%s9077_s3 + $0x78] sm:$0xff] }
 0x8bb   : > { %v6984_v0 = vcombine.low %v3698_v51, %v3706_v8  ;;  %v3652_v10 = vld [vmem:[%s9077_s3 + $0xb8] sm:$0xff] }
 0x8bc   : > { %8229 = vrsqrt.f32 %v3595_v22  ;;  %v3596_v19 = vadd.f32 1e-05, %v3592_v32  ;;  %4600 = vmatpush1.bf16.msra.mxu1 %v7010_v38  ;;  %4653 = vmatpush1.bf16.msra.mxu0 %v7012_v35  ;;  %v6968_v38 = vcombine.low %v3682_v3, %v3690_v18  ;;  %v6983_v35 = vcombine.high %v3697_v49, %v3705_v45  ;;  %v3713_v32 = vld [vmem:[%s9077_s3 + $0x2a0] sm:$0xff]  ;;  %v3660_v57 = vld [vmem:[%s9077_s3 + $0xf8] sm:$0xff] }
 0x8bd   : > { %4601 = vmatprep.subr.bf16.mxu1 %v7027_v16  ;;  %4654 = vmatprep.subr.bf16.mxu0 %v7029_v41  ;;  %v6985_v22 = vcombine.high %v3698_v51, %v3706_v8  ;;  %v3721_v16 = vld [vmem:[%s9077_s3 + $0x2e0] sm:$0xff]  ;;  %v3714_v41 = vld [vmem:[%s9077_s3 + $0x2a8] sm:$0xff]  ;;  %v6924_v18 = vcombine.low %v3636_v5, %v3644_v21  ;;  %v6940_v8 = vcombine.low %v3652_v10, %v3660_v57 }
 0x8be   : > { %8231 = vrsqrt.f32 %v3596_v19  ;;  %v6999_v55 = vcombine.high %v3713_v32, %v3721_v16 }
 0x8c0   : > { %4602 = vmatpush1.bf16.msra.mxu1 %v7026_v53  ;;  %4655 = vmatpush1.bf16.msra.mxu0 %v7028_v48  ;;  %v3729_v53 = vld [vmem:[%s9077_s3 + $0x320] sm:$0xff] }
 0x8c1   : > { %4693 = vmatprep.subr.bf16.mxu1 %v6919_v15  ;;  %4746 = vmatprep.subr.bf16.mxu0 %v6921_v42  ;;  %v3737_v48 = vld [vmem:[%s9077_s3 + $0x360] sm:$0xff]  ;;  %v3730_v15 = vld [vmem:[%s9077_s3 + $0x328] sm:$0xff] }
 0x8c2   : > { %v3738_v42 = vld [vmem:[%s9077_s3 + $0x368] sm:$0xff] }
 0x8c6   : > { %v8230_v9 = vpop.eup %8229 }
 0x8c7   : > { %v3603_v12 = vmul.f32 %v8230_v9, %v9948_v40  ;;  %v3649_v40 = vld [vmem:[%s9077_s3 + $0xa0] sm:$0xff]  ;;  %v6998_v9 = vcombine.low %v3713_v32, %v3721_v16  ;;  %v3684_v32 = vld [vmem:[%s9077_s3 + $0x1b8] sm:$0xff] }
 0x8c8   : > { %v8232_v43 = vpop.eup %8231  ;;  %v3692_v16 = vld [vmem:[%s9077_s3 + $0x1f8] sm:$0xff] }
 0x8c9   : > { %v3614_v23 = vmul.f32 %v9966_v34, %v3603_v12  ;;  %v3604_v46 = vmul.f32 %v8232_v43, %v9951_v58  ;;  %v3657_v58 = vld [vmem:[%s9077_s3 + $0xe0] sm:$0xff]  ;;  %v7015_v43 = vcombine.high %v3729_v53, %v3737_v48 }
 0x8ca   : > { %v6935_v47 = vcombine.high %v3649_v40, %v3657_v58  ;;  %v6934_v13 = vcombine.low %v3649_v40, %v3657_v58  ;;  %v3746_v40 = vld [vmem:[%s9077_s3 + $0x3a8] sm:$0xff] }
 0x8cb   : > { %v3615_v27 = vmul.f32 %v9966_v34, %v3604_v46  ;;  %v10027_v59 = vadd.f32 %v9973_v28, %v3614_v23  ;;  %v3650_v34 = vld [vmem:[%s9077_s3 + $0xa8] sm:$0xff]  ;;  %v7017_v23 = vcombine.high %v3730_v15, %v3738_v42  ;;  %v3745_v46 = vld [vmem:[%s9077_s3 + $0x3a0] sm:$0xff] }
 0x8cc   : > { %v6937_v25 = vcombine.high %v3650_v34, %v3658_v29  ;;  %v6936_v33 = vcombine.low %v3650_v34, %v3658_v29  ;;  %v3754_v58 = vld [vmem:[%s9077_s3 + $0x3e8] sm:$0xff]  ;;  %v7014_v34 = vcombine.low %v3729_v53, %v3737_v48  ;;  %v7016_v29 = vcombine.low %v3730_v15, %v3738_v42  ;;  %v3700_v53 = vld [vmem:[%s9077_s3 + $0x238] sm:$0xff] }
 0x8cd   : > { %v10030_v17 = vadd.f32 %v9973_v28, %v3615_v27  ;;  %v6918_v28 = vcombine.low %v3633_v11, %v3641_v26  ;;  %v3722_v11 = vld [vmem:[%s9077_s3 + $0x2e8] sm:$0xff]  ;;  %v6982_v26 = vcombine.low %v3697_v49, %v3705_v45  ;;  %v3753_v27 = vld [vmem:[%s9077_s3 + $0x3e0] sm:$0xff]  ;;  %v7032_v14 = vcombine.low %v3746_v40, %v3754_v58  ;;  %v3668_v49 = vld [vmem:[%s9077_s3 + $0x138] sm:$0xff] }
 0x8ce   : > { %v7001_v19 = vcombine.high %v3714_v41, %v3722_v11  ;;  %v7000_v12 = vcombine.low %v3714_v41, %v3722_v11  ;;  %v7030_v24 = vcombine.low %v3745_v46, %v3753_v27  ;;  %v3676_v45 = vld [vmem:[%s9077_s3 + $0x178] sm:$0xff]  ;;  %v6972_v42 = vcombine.low %v3684_v32, %v3692_v16 }
 0x8cf   : > { %v10034_v7 = vpack.c.bf16 %v10030_v17, %v10027_v59  ;;  %v6956_v11 = vcombine.low %v3668_v49, %v3676_v45  ;;  %v3708_v48 = vld [vmem:[%s9077_s3 + $0x278] sm:$0xff] }
 0x8d1   : > { %4524 = vmatmul.mubr.bf16.gmra.mrb[88].mxu1 %v10034_v7  ;;  %4577 = vmatmul.mubr.bf16.gmra.mrb[80].mxu0 %v10034_v7 }
 0x8d2   : > { %4619 = vmatprep.mubr.bf16.mxu1 %v8627_v6  ;;  %4672 = vmatprep.mubr.bf16.mxu0 %v8627_v6 }
 0x8d9   : > { %4620 = vmatmul.mubr.bf16.vlgmr.msra.gmra.mrb[92].mxu1 %v9988_v39  ;;  %4673 = vmatmul.mubr.bf16.vlgmr.msra.gmra.mrb[84].mxu0 %v9988_v39 }
 0x8da   : > { %4694 = vmatpush1.bf16.msra.mxu1 %v6918_v28  ;;  %4747 = vmatpush1.bf16.msra.mxu0 %v6920_v31  ;;  %v7031_v28 = vcombine.high %v3745_v46, %v3753_v27  ;;  %v7033_v31 = vcombine.high %v3746_v40, %v3754_v58  ;;  %v3716_v46 = vld [vmem:[%s9077_s3 + $0x2b8] sm:$0xff]  ;;  %v6988_v58 = vcombine.low %v3700_v53, %v3708_v48 }
 0x8db   : > { %4695 = vmatprep.subr.bf16.mxu1 %v6935_v47  ;;  %4748 = vmatprep.subr.bf16.mxu0 %v6937_v25  ;;  %v3635_v47 = vld [vmem:[%s9077_s3 + $0x30] sm:$0xff]  ;;  %v3724_v27 = vld [vmem:[%s9077_s3 + $0x2f8] sm:$0xff] }
 0x8dc   : > { %4629 = vmatprep.mubr.bf16.mxu1 %v8627_v6  ;;  %4682 = vmatprep.mubr.bf16.mxu0 %v8627_v6  ;;  %v3643_v25 = vld [vmem:[%s9077_s3 + $0x70] sm:$0xff] }
 0x8dd   : > { %v6922_v3 = vcombine.low %v3635_v47, %v3643_v25 }
 0x8de   : > { %4696 = vmatpush1.bf16.msra.mxu1 %v6934_v13  ;;  %4749 = vmatpush1.bf16.msra.mxu0 %v6936_v33  ;;  %v6923_v13 = vcombine.high %v3635_v47, %v3643_v25  ;;  %v6925_v33 = vcombine.high %v3636_v5, %v3644_v21  ;;  %v3732_v47 = vld [vmem:[%s9077_s3 + $0x338] sm:$0xff]  ;;  %v7004_v21 = vcombine.low %v3716_v46, %v3724_v27 }
 0x8df   : > { %4697 = vmatprep.subr.bf16.mxu1 %v6951_v60  ;;  %4750 = vmatprep.subr.bf16.mxu0 %v6953_v20  ;;  %v3651_v60 = vld [vmem:[%s9077_s3 + $0xb0] sm:$0xff]  ;;  %v3740_v25 = vld [vmem:[%s9077_s3 + $0x378] sm:$0xff] }
 0x8e0   : > { %v3659_v20 = vld [vmem:[%s9077_s3 + $0xf0] sm:$0xff] }
 0x8e1   : > { %4630 = vmatmul.mubr.bf16.gmra.mrb[96].mxu1 %v10034_v7  ;;  %4683 = vmatmul.mubr.bf16.gmra.mrb[88].mxu0 %v10034_v7  ;;  %v6938_v51 = vcombine.low %v3651_v60, %v3659_v20 }
 0x8e2   : > { %4698 = vmatpush1.bf16.msra.mxu1 %v6950_v36  ;;  %4751 = vmatpush1.bf16.msra.mxu0 %v6952_v4  ;;  %v6939_v36 = vcombine.high %v3651_v60, %v3659_v20  ;;  %v6941_v4 = vcombine.high %v3652_v10, %v3660_v57  ;;  %v3748_v60 = vld [vmem:[%s9077_s3 + $0x3b8] sm:$0xff]  ;;  %v7020_v57 = vcombine.low %v3732_v47, %v3740_v25 }
 0x8e3   : > { %4699 = vmatprep.subr.bf16.mxu1 %v6967_v37  ;;  %4752 = vmatprep.subr.bf16.mxu0 %v6969_v52  ;;  %v3667_v37 = vld [vmem:[%s9077_s3 + $0x130] sm:$0xff]  ;;  %v3756_v20 = vld [vmem:[%s9077_s3 + $0x3f8] sm:$0xff] }
 0x8e4   : > { %4725 = vmatprep.mubr.bf16.mxu1 %v8627_v6  ;;  %4778 = vmatprep.mubr.bf16.mxu0 %v8627_v6  ;;  %v3675_v52 = vld [vmem:[%s9077_s3 + $0x170] sm:$0xff] }
 0x8e5   : > { %v6954_v41 = vcombine.low %v3667_v37, %v3675_v52 }
 0x8e6   : > { %4700 = vmatpush1.bf16.msra.mxu1 %v6966_v54  ;;  %4753 = vmatpush1.bf16.msra.mxu0 %v6968_v38  ;;  %v6955_v54 = vcombine.high %v3667_v37, %v3675_v52  ;;  %v6957_v38 = vcombine.high %v3668_v49, %v3676_v45  ;;  %v7969_v37 = vld [vmem:[%s9086_s27 + $0x40] sm:$0xff]  }
 0x8e7   : > { %4701 = vmatprep.subr.bf16.mxu1 %v6983_v35  ;;  %4754 = vmatprep.subr.bf16.mxu0 %v6985_v22  ;;  %v3683_v35 = vld [vmem:[%s9077_s3 + $0x1b0] sm:$0xff]  ;;  %v7970_v52 = vld [vmem:[%s9086_s27 + $0xc0] sm:$0xff]  }
 0x8e8   : > { %v3691_v22 = vld [vmem:[%s9077_s3 + $0x1f0] sm:$0xff]  ;;  %v7971_v49 = vld [vmem:[%s9086_s27] sm:$0xff]  }
 0x8e9   : > { %v6970_v15 = vcombine.low %v3683_v35, %v3691_v22  ;;  %v7972_v45 = vld [vmem:[%s9086_s27 + $0x80] sm:$0xff]  }
 0x8ea   : > { %4702 = vmatpush1.bf16.msra.mxu1 %v6982_v26  ;;  %4755 = vmatpush1.bf16.msra.mxu0 %v6984_v0  ;;  %v6971_v26 = vcombine.high %v3683_v35, %v3691_v22  ;;  %v6973_v0 = vcombine.high %v3684_v32, %v3692_v16  ;;  %v7977_v35 = vld [vmem:[%s9086_s27 + $0x50] sm:$0xff]   ;;  %v7982_v16 = vld [vmem:[%s9086_s27 + $0xd8] sm:$0xff]  }
 0x8eb   : > { %4703 = vmatprep.subr.bf16.mxu1 %v6999_v55  ;;  %4756 = vmatprep.subr.bf16.mxu0 %v7001_v19  ;;  %v3699_v55 = vld [vmem:[%s9077_s3 + $0x230] sm:$0xff] }
 0x8ec   : > { %v3707_v19 = vld [vmem:[%s9077_s3 + $0x270] sm:$0xff] }
 0x8ed   : > { %v6986_v40 = vcombine.low %v3699_v55, %v3707_v19  ;;  %v7978_v22 = vld [vmem:[%s9086_s27 + $0xd0] sm:$0xff]  }
 0x8ee   : > { %4704 = vmatpush1.bf16.msra.mxu1 %v6998_v9  ;;  %4757 = vmatpush1.bf16.msra.mxu0 %v7000_v12  ;;  %v6987_v9 = vcombine.high %v3699_v55, %v3707_v19  ;;  %v6989_v12 = vcombine.high %v3700_v53, %v3708_v48  ;;  %v7980_v32 = vld [vmem:[%s9086_s27 + $0x90] sm:$0xff]   ;;  %v7987_v55 = vld [vmem:[%s9086_s27 + $0x20] sm:$0xff]   ;;  %v7990_v53 = vld [vmem:[%s9086_s27 + $0xe8] sm:$0xff]  }
 0x8ef   : > { %4705 = vmatprep.subr.bf16.mxu1 %v7015_v43  ;;  %4758 = vmatprep.subr.bf16.mxu0 %v7017_v23  ;;  %v3715_v43 = vld [vmem:[%s9077_s3 + $0x2b0] sm:$0xff]  ;;  %v7988_v19 = vld [vmem:[%s9086_s27 + $0xa0] sm:$0xff]   ;;  %v7991_v48 = vld [vmem:[%s9086_s27 + $0x28] sm:$0xff]  }
 0x8f0   : > { %v3723_v23 = vld [vmem:[%s9077_s3 + $0x2f0] sm:$0xff] }
 0x8f1   : > { %v7002_v5 = vcombine.low %v3715_v43, %v3723_v23 }
 0x8f2   : > { %4706 = vmatpush1.bf16.msra.mxu1 %v7014_v34  ;;  %4759 = vmatpush1.bf16.msra.mxu0 %v7016_v29  ;;  %v7003_v34 = vcombine.high %v3715_v43, %v3723_v23  ;;  %v7005_v29 = vcombine.high %v3716_v46, %v3724_v27  ;;  %v7996_v43 = vld [vmem:[%s9086_s27 + $0xb0] sm:$0xff]   ;;  %v7997_v23 = vld [vmem:[%s9086_s27 + $0x78] sm:$0xff]  }
 0x8f3   : > { %4707 = vmatprep.subr.bf16.mxu1 %v7031_v28  ;;  %4760 = vmatprep.subr.bf16.mxu0 %v7033_v31  ;;  %v3731_v28 = vld [vmem:[%s9077_s3 + $0x330] sm:$0xff]  ;;  %v7998_v46 = vld [vmem:[%s9086_s27 + $0xf8] sm:$0xff]  }
 0x8f4   : > { %v3739_v31 = vld [vmem:[%s9077_s3 + $0x370] sm:$0xff]  ;;  %v7999_v27 = vld [vmem:[%s9086_s27 + $0x38] sm:$0xff]  }
 0x8f5   : > { %v7018_v10 = vcombine.low %v3731_v28, %v3739_v31 }
 0x8f6   : > { %4708 = vmatpush1.bf16.msra.mxu1 %v7030_v24  ;;  %4761 = vmatpush1.bf16.msra.mxu0 %v7032_v14  ;;  %v7019_v24 = vcombine.high %v3731_v28, %v3739_v31  ;;  %v7021_v14 = vcombine.high %v3732_v47, %v3740_v25 }
 0x8f7   : > { %4799 = vmatprep.subr.bf16.mxu1 %v6923_v13  ;;  %4852 = vmatprep.subr.bf16.mxu0 %v6925_v33  ;;  %v3747_v13 = vld [vmem:[%s9077_s3 + $0x3b0] sm:$0xff] }
 0x8f8   : > { %v3755_v33 = vld [vmem:[%s9077_s3 + $0x3f0] sm:$0xff]  ;;  %s10513_s3 = scalar_lea.vmem [#allocation14], %s9057_s0 }
 0x8f9   : > { %4726 = vmatmul.mubr.bf16.vlgmr.msra.gmra.mrb[100].mxu1 %v9988_v39  ;;  %4779 = vmatmul.mubr.bf16.vlgmr.msra.gmra.mrb[92].mxu0 %v9988_v39 }
 0x8fa   : > { %4800 = vmatpush1.bf16.msra.mxu1 %v6922_v3  ;;  %4853 = vmatpush1.bf16.msra.mxu0 %v6924_v18  ;;  %v7035_v3 = vcombine.high %v3747_v13, %v3755_v33  ;;  %v7037_v18 = vcombine.high %v3748_v60, %v3756_v20 }
 0x8fb   : > { %4801 = vmatprep.subr.bf16.mxu1 %v6939_v36  ;;  %4854 = vmatprep.subr.bf16.mxu0 %v6941_v4  ;;  %v7034_v36 = vcombine.low %v3747_v13, %v3755_v33  ;;  %v7036_v4 = vcombine.low %v3748_v60, %v3756_v20 }
 0x8fc   : > { %4735 = vmatprep.mubr.bf16.mxu1 %v8627_v6  ;;  %4788 = vmatprep.mubr.bf16.mxu0 %v8627_v6 }
 0x8fe   : > { %4802 = vmatpush1.bf16.msra.mxu1 %v6938_v51  ;;  %4855 = vmatpush1.bf16.msra.mxu0 %v6940_v8  ;;  %v7973_v51 = vld [vmem:[%s9086_s27 + $0x48] sm:$0xff]  }
 0x8ff   : > { %4803 = vmatprep.subr.bf16.mxu1 %v6955_v54  ;;  %4856 = vmatprep.subr.bf16.mxu0 %v6957_v38  ;;  %v7974_v8 = vld [vmem:[%s9086_s27 + $0xc8] sm:$0xff]  }
 0x900   : > { %v7975_v54 = vld [vmem:[%s9086_s27 + $0x8] sm:$0xff]  }
 0x901   : > { %4736 = vmatmul.mubr.bf16.gmra.mrb[104].mxu1 %v10034_v7  ;;  %4789 = vmatmul.mubr.bf16.gmra.mrb[96].mxu0 %v10034_v7  ;;  %v7976_v38 = vld [vmem:[%s9086_s27 + $0x88] sm:$0xff]  }
 0x902   : > { %4804 = vmatpush1.bf16.msra.mxu1 %v6954_v41  ;;  %4857 = vmatpush1.bf16.msra.mxu0 %v6956_v11  ;;  %v7983_v41 = vld [vmem:[%s9086_s27 + $0x18] sm:$0xff]  }
 0x903   : > { %4805 = vmatprep.subr.bf16.mxu1 %v6971_v26  ;;  %4858 = vmatprep.subr.bf16.mxu0 %v6973_v0  ;;  %v7984_v11 = vld [vmem:[%s9086_s27 + $0x98] sm:$0xff]   ;;  %v7985_v26 = vld [vmem:[%s9086_s27 + $0x60] sm:$0xff]  }
 0x904   : > { %4831 = vmatprep.mubr.bf16.mxu1 %v8627_v6  ;;  %4884 = vmatprep.mubr.bf16.mxu0 %v8627_v6  ;;  %v7986_v0 = vld [vmem:[%s9086_s27 + $0xe0] sm:$0xff]  }
 0x906   : > { %4806 = vmatpush1.bf16.msra.mxu1 %v6970_v15  ;;  %4859 = vmatpush1.bf16.msra.mxu0 %v6972_v42  ;;  %v7992_v15 = vld [vmem:[%s9086_s27 + $0xa8] sm:$0xff]   ;;  %v7993_v42 = vld [vmem:[%s9086_s27 + $0x70] sm:$0xff]  }
 0x907   : > { %4807 = vmatprep.subr.bf16.mxu1 %v6987_v9  ;;  %4860 = vmatprep.subr.bf16.mxu0 %v6989_v12  ;;  %v7994_v9 = vld [vmem:[%s9086_s27 + $0xf0] sm:$0xff]  }
 0x908   : > { %v7995_v12 = vld [vmem:[%s9086_s27 + $0x30] sm:$0xff]  }
 0x90a   : > { %4808 = vmatpush1.bf16.msra.mxu1 %v6986_v40  ;;  %4861 = vmatpush1.bf16.msra.mxu0 %v6988_v58  ;;  %v8000_v40 = vld [vmem:[%s9086_s27 + $0xb8] sm:$0xff]   ;;  %v8001_v58 = vld [vmem:[%s9086_s27 + $0x140] sm:$0xff]  }
 0x90b   : > { %4809 = vmatprep.subr.bf16.mxu1 %v7003_v34  ;;  %4862 = vmatprep.subr.bf16.mxu0 %v7005_v29  ;;  %v8002_v34 = vld [vmem:[%s9086_s27 + $0x1c0] sm:$0xff]  }
 0x90c   : > { %v10157_v29 = vld [vmem:[%s9084_s24] sm:$0xff] }
 0x90d   : > { %v10161_v28 = vrot.slane %v10157_v29, %v9196_v63  ;;  %v10165_v31 = vrot.slane %v10157_v29, %v9193_v62  ;;  %v10169_v47 = vrot.slane %v10157_v29, %v9205_v2  ;;  %v10173_v25 = vrot.slane %v10157_v29, %v9202_v1 }
 0x90e   : > { %4810 = vmatpush1.bf16.msra.mxu1 %v7002_v5  ;;  %4863 = vmatpush1.bf16.msra.mxu0 %v7004_v21 }
 0x90f   : > { %4811 = vmatprep.subr.bf16.mxu1 %v7019_v24  ;;  %4864 = vmatprep.subr.bf16.mxu0 %v7021_v14 }
 0x912   : > { %4812 = vmatpush1.bf16.msra.mxu1 %v7018_v10  ;;  %4865 = vmatpush1.bf16.msra.mxu0 %v7020_v57 }
 0x913   : > { %4813 = vmatprep.subr.bf16.mxu1 %v7035_v3  ;;  %4866 = vmatprep.subr.bf16.mxu0 %v7037_v18 }
 0x916   : > { %4814 = vmatpush1.bf16.msra.mxu1 %v7034_v36  ;;  %4867 = vmatpush1.bf16.msra.mxu0 %v7036_v4 }
 0x917   : > { %7270 = vmatprep.subr.bf16.mxu1 %v7969_v37  ;;  %7298 = vmatprep.subr.bf16.mxu0 %v7970_v52 }
 0x919   : > { %4832 = vmatmul.mubr.bf16.vlgmr.msra.gmra.mrb[108].mxu1 %v9988_v39  ;;  %4885 = vmatmul.mubr.bf16.vlgmr.msra.gmra.mrb[100].mxu0 %v9988_v39  ;;  %v7979_v39 = vld [vmem:[%s9086_s27 + $0x10] sm:$0xff]  }
 0x91a   : > { %4841 = vmatprep.mubr.bf16.mxu1 %v8627_v6  ;;  %4894 = vmatprep.mubr.bf16.mxu0 %v8627_v6  ;;  %v7981_v6 = vld [vmem:[%s9086_s27 + $0x58] sm:$0xff]  }
 0x91b   : > { %7271 = vmatpush3.bf16.msra.mxu1 %v7971_v49  ;;  %7299 = vmatpush3.bf16.msra.mxu0 %v7972_v45 }
 0x91c   : > { %7272 = vmatprep.subr.bf16.mxu1 %v7973_v51  ;;  %7300 = vmatprep.subr.bf16.mxu0 %v7974_v8 }
 0x91f   : > { %7273 = vmatpush3.bf16.msra.mxu1 %v7975_v54  ;;  %7301 = vmatpush3.bf16.msra.mxu0 %v7976_v38 }
 0x920   : > { %7274 = vmatprep.subr.bf16.mxu1 %v7977_v35  ;;  %7302 = vmatprep.subr.bf16.mxu0 %v7978_v22 }
 0x921   : > { %4842 = vmatmul.mubr.bf16.gmra.mrb[112].mxu1 %v10034_v7  ;;  %4895 = vmatmul.mubr.bf16.gmra.mrb[104].mxu0 %v10034_v7  ;;  %v7989_v7 = vld [vmem:[%s9086_s27 + $0x68] sm:$0xff]  }
 0x923   : > { %7275 = vmatpush3.bf16.msra.mxu1 %v7979_v39  ;;  %7303 = vmatpush3.bf16.msra.mxu0 %v7980_v32 }
 0x924   : > { %7276 = vmatprep.subr.bf16.mxu1 %v7981_v6  ;;  %7304 = vmatprep.subr.bf16.mxu0 %v7982_v16 }
 0x927   : > { %7277 = vmatpush3.bf16.msra.mxu1 %v7983_v41  ;;  %7305 = vmatpush3.bf16.msra.mxu0 %v7984_v11  ;;  %v8003_v41 = vld [vmem:[%s9086_s27 + $0x100] sm:$0xff]  }
 0x928   : > { %7278 = vmatprep.subr.bf16.mxu1 %v7985_v26  ;;  %7306 = vmatprep.subr.bf16.mxu0 %v7986_v0  ;;  %v8004_v11 = vld [vmem:[%s9086_s27 + $0x180] sm:$0xff]   ;;  %v8005_v26 = vld [vmem:[%s9086_s27 + $0x148] sm:$0xff]  }
 0x929   : > { %v8006_v0 = vld [vmem:[%s9086_s27 + $0x1c8] sm:$0xff]  }
 0x92b   : > { %7279 = vmatpush3.bf16.msra.mxu1 %v7987_v55  ;;  %7307 = vmatpush3.bf16.msra.mxu0 %v7988_v19  ;;  %v8007_v55 = vld [vmem:[%s9086_s27 + $0x108] sm:$0xff]  }
 0x92c   : > { %7280 = vmatprep.subr.bf16.mxu1 %v7989_v7  ;;  %7308 = vmatprep.subr.bf16.mxu0 %v7990_v53  ;;  %v8008_v19 = vld [vmem:[%s9086_s27 + $0x188] sm:$0xff]   ;;  %v8009_v7 = vld [vmem:[%s9086_s27 + $0x150] sm:$0xff]  }
 0x92d   : > { %v8010_v53 = vld [vmem:[%s9086_s27 + $0x1d0] sm:$0xff]  }
 0x92f   : > { %7281 = vmatpush3.bf16.msra.mxu1 %v7991_v48  ;;  %7309 = vmatpush3.bf16.msra.mxu0 %v7992_v15  ;;  %v8011_v48 = vld [vmem:[%s9086_s27 + $0x110] sm:$0xff]  }
 0x930   : > { %7282 = vmatprep.subr.bf16.mxu1 %v7993_v42  ;;  %7310 = vmatprep.subr.bf16.mxu0 %v7994_v9  ;;  %v8012_v15 = vld [vmem:[%s9086_s27 + $0x190] sm:$0xff]   ;;  %v8013_v42 = vld [vmem:[%s9086_s27 + $0x158] sm:$0xff]  }
 0x931   : > { %v8014_v9 = vld [vmem:[%s9086_s27 + $0x1d8] sm:$0xff]  }
 0x933   : > { %7283 = vmatpush3.bf16.msra.mxu1 %v7995_v12  ;;  %7311 = vmatpush3.bf16.msra.mxu0 %v7996_v43  ;;  %v8015_v12 = vld [vmem:[%s9086_s27 + $0x118] sm:$0xff]  }
 0x934   : > { %7284 = vmatprep.subr.bf16.mxu1 %v7997_v23  ;;  %7312 = vmatprep.subr.bf16.mxu0 %v7998_v46  ;;  %v8016_v43 = vld [vmem:[%s9086_s27 + $0x198] sm:$0xff]   ;;  %v8017_v23 = vld [vmem:[%s9086_s27 + $0x160] sm:$0xff]  }
 0x935   : > { %v8018_v46 = vld [vmem:[%s9086_s27 + $0x1e0] sm:$0xff]  }
 0x937   : > { %7285 = vmatpush3.bf16.msra.mxu1 %v7999_v27  ;;  %7313 = vmatpush3.bf16.msra.mxu0 %v8000_v40  ;;  %v8019_v27 = vld [vmem:[%s9086_s27 + $0x120] sm:$0xff]  }
 0x938   : > { %7326 = vmatprep.subr.bf16.mxu1 %v8001_v58  ;;  %7354 = vmatprep.subr.bf16.mxu0 %v8002_v34  ;;  %v8020_v40 = vld [vmem:[%s9086_s27 + $0x1a0] sm:$0xff]   ;;  %v8021_v58 = vld [vmem:[%s9086_s27 + $0x168] sm:$0xff]  }
 0x939   : > { %v8022_v34 = vld [vmem:[%s9086_s27 + $0x1e8] sm:$0xff]  }
 0x976   : > { %v4515_v5 = vpop.f32.mrb[84].mxu1  ;;  %v4568_v21 = vpop.f32.mrb[76].mxu0 }
 0x977   : > { %v4516_v24 = vadd.f32 %v4515_v5, %v10161_v28  ;;  %v4569_v14 = vadd.f32 %v4568_v21, %v10165_v31  ;;  %v4517_v13 = vpop.f32.mrb[85].mxu1  ;;  %v4570_v33 = vpop.f32.mrb[77].mxu0  ;;  %v8023_v5 = vld [vmem:[%s9086_s27 + $0x128] sm:$0xff]  }
 0x978   : > { %v4518_v60 = vadd.f32 %v4517_v13, %v10169_v47  ;;  %v4571_v20 = vadd.f32 %v4570_v33, %v10173_v25  ;;  %v4519_v10 = vpop.f32.mrb[86].mxu1  ;;  %v4572_v57 = vpop.f32.mrb[78].mxu0  ;;  %v8024_v21 = vld [vmem:[%s9086_s27 + $0x1a8] sm:$0xff]   ;;  %v8027_v13 = vld [vmem:[%s9086_s27 + $0x130] sm:$0xff]  }
 0x979   : > { %v4520_v3 = vadd.f32 %v4519_v10, %v10161_v28  ;;  %v4573_v18 = vadd.f32 %v4572_v57, %v10165_v31  ;;  %v4521_v36 = vpop.f32.mrb[87].mxu1  ;;  %v4574_v4 = vpop.f32.mrb[79].mxu0  ;;  %v4905_v49 = vmax.f32 %v4516_v24, 0.0  ;;  %v4907_v45 = vmax.f32 %v4569_v14, 0.0  ;;  %v8025_v24 = vld [vmem:[%s9086_s27 + $0x170] sm:$0xff]   ;;  %v8031_v10 = vld [vmem:[%s9086_s27 + $0x138] sm:$0xff]  }
 0x97a   : > { %v4522_v37 = vadd.f32 %v4521_v36, %v10169_v47  ;;  %v4575_v52 = vadd.f32 %v4574_v4, %v10173_v25  ;;  %v4906_v54 = vmax.f32 %v4518_v60, 0.0  ;;  %v4908_v38 = vmax.f32 %v4571_v20, 0.0  ;;  %v8026_v14 = vld [vmem:[%s9086_s27 + $0x1f0] sm:$0xff]   ;;  %v8029_v60 = vld [vmem:[%s9086_s27 + $0x178] sm:$0xff]  }
 0x97b   : > { %v4921_v51 = vmax.f32 %v4520_v3, 0.0  ;;  %v4923_v8 = vmax.f32 %v4573_v18, 0.0  ;;  %v8028_v33 = vld [vmem:[%s9086_s27 + $0x1b0] sm:$0xff]   ;;  %v8030_v20 = vld [vmem:[%s9086_s27 + $0x1f8] sm:$0xff]   ;;  %v8033_v3 = vld [vmem:[%s9086_s27 + $0x240] sm:$0xff]   ;;  %v3787_v36 = vsub.s32 6, %v9190_v61 }
 0x97c   : > { %v4922_v35 = vmax.f32 %v4522_v37, 0.0  ;;  %v4924_v22 = vmax.f32 %v4575_v52, 0.0  ;;  %v8032_v57 = vld [vmem:[%s9086_s27 + $0x1b8] sm:$0xff]   ;;  %v8034_v18 = vld [vmem:[%s9086_s27 + $0x2c0] sm:$0xff]   ;;  %v3791_v52 = vsub.s32 7, %v9190_v61 }
 0x97d   : > { %v4969_v39 = vpack.c.bf16 %v4921_v51, %v4905_v49  ;;  %v4971_v32 = vpack.c.bf16 %v4923_v8, %v4907_v45 }
 0x97e   : > { %v4970_v6 = vpack.c.bf16 %v4922_v35, %v4906_v54  ;;  %v4972_v16 = vpack.c.bf16 %v4924_v22, %v4908_v38 }
 0x980   : > { %6064 = vmatprep.mubr.bf16.mxu1 %v4970_v6  ;;  %6113 = vmatprep.mubr.bf16.mxu0 %v4972_v16 }
 0x981   : > { %6065 = vmatmul.mubr.bf16.vlgmr.msra.gmra.mrb[116].mxu1 %v4969_v39  ;;  %6114 = vmatmul.mubr.bf16.vlgmr.msra.gmra.mrb[108].mxu0 %v4971_v32 }
 0x982   : > { %7327 = vmatpush3.bf16.msra.mxu1 %v8003_v41  ;;  %7355 = vmatpush3.bf16.msra.mxu0 %v8004_v11  ;;  %v10225_v41 = vrot.slane %v10157_v29, %v9266_v50  ;;  %v10230_v11 = vrot.slane %v10157_v29, %v3787_v36 }
 0x983   : > { %7328 = vmatprep.subr.bf16.mxu1 %v8005_v26  ;;  %7356 = vmatprep.subr.bf16.mxu0 %v8006_v0 }
 0x986   : > { %7329 = vmatpush3.bf16.msra.mxu1 %v8007_v55  ;;  %7357 = vmatpush3.bf16.msra.mxu0 %v8008_v19 }
 0x987   : > { %7330 = vmatprep.subr.bf16.mxu1 %v8009_v7  ;;  %7358 = vmatprep.subr.bf16.mxu0 %v8010_v53 }
 0x98a   : > { %7331 = vmatpush3.bf16.msra.mxu1 %v8011_v48  ;;  %7359 = vmatpush3.bf16.msra.mxu0 %v8012_v15 }
 0x98b   : > { %7332 = vmatprep.subr.bf16.mxu1 %v8013_v42  ;;  %7360 = vmatprep.subr.bf16.mxu0 %v8014_v9 }
 0x98e   : > { %7333 = vmatpush3.bf16.msra.mxu1 %v8015_v12  ;;  %7361 = vmatpush3.bf16.msra.mxu0 %v8016_v43 }
 0x98f   : > { %7334 = vmatprep.subr.bf16.mxu1 %v8017_v23  ;;  %7362 = vmatprep.subr.bf16.mxu0 %v8018_v46 }
 0x992   : > { %7335 = vmatpush3.bf16.msra.mxu1 %v8019_v27  ;;  %7363 = vmatpush3.bf16.msra.mxu0 %v8020_v40 }
 0x993   : > { %7336 = vmatprep.subr.bf16.mxu1 %v8021_v58  ;;  %7364 = vmatprep.subr.bf16.mxu0 %v8022_v34 }
 0x996   : > { %7337 = vmatpush3.bf16.msra.mxu1 %v8023_v5  ;;  %7365 = vmatpush3.bf16.msra.mxu0 %v8024_v21 }
 0x997   : > { %7338 = vmatprep.subr.bf16.mxu1 %v8025_v24  ;;  %7366 = vmatprep.subr.bf16.mxu0 %v8026_v14 }
 0x99a   : > { %7339 = vmatpush3.bf16.msra.mxu1 %v8027_v13  ;;  %7367 = vmatpush3.bf16.msra.mxu0 %v8028_v33 }
 0x99b   : > { %7340 = vmatprep.subr.bf16.mxu1 %v8029_v60  ;;  %7368 = vmatprep.subr.bf16.mxu0 %v8030_v20 }
 0x99e   : > { %7341 = vmatpush3.bf16.msra.mxu1 %v8031_v10  ;;  %7369 = vmatpush3.bf16.msra.mxu0 %v8032_v57 }
 0x99f   : > { %7382 = vmatprep.subr.bf16.mxu1 %v8033_v3  ;;  %7410 = vmatprep.subr.bf16.mxu0 %v8034_v18 }
 0x9a4   : > { %v4525_v4 = vpop.f32.mrb[88].mxu1  ;;  %v4578_v37 = vpop.f32.mrb[80].mxu0 }
 0x9a5   : > { %v4526_v49 = vadd.f32 %v4525_v4, %v10161_v28  ;;  %v4579_v45 = vadd.f32 %v4578_v37, %v10165_v31  ;;  %v4527_v51 = vpop.f32.mrb[89].mxu1  ;;  %v4580_v8 = vpop.f32.mrb[81].mxu0 }
 0x9a6   : > { %v4528_v54 = vadd.f32 %v4527_v51, %v10169_v47  ;;  %v4581_v38 = vadd.f32 %v4580_v8, %v10173_v25  ;;  %v4529_v35 = vpop.f32.mrb[90].mxu1  ;;  %v4582_v22 = vpop.f32.mrb[82].mxu0 }
 0x9a7   : > { %v4530_v39 = vadd.f32 %v4529_v35, %v10161_v28  ;;  %v4583_v32 = vadd.f32 %v4582_v22, %v10165_v31  ;;  %v4531_v6 = vpop.f32.mrb[91].mxu1  ;;  %v4584_v16 = vpop.f32.mrb[83].mxu0  ;;  %v10236_v28 = vrot.slane %v10157_v29, %v9275_v56  ;;  %v10241_v31 = vrot.slane %v10157_v29, %v3791_v52 }
 0x9a8   : > { %v4532_v26 = vadd.f32 %v4531_v6, %v10169_v47  ;;  %v4585_v0 = vadd.f32 %v4584_v16, %v10173_v25  ;;  %v4937_v55 = vmax.f32 %v4526_v49, 0.0  ;;  %v4939_v19 = vmax.f32 %v4579_v45, 0.0  ;;  %v8036_v6 = vld [vmem:[%s9086_s27 + $0x280] sm:$0xff]  }
 0x9a9   : > { %v4953_v7 = vmax.f32 %v4530_v39, 0.0  ;;  %v4955_v53 = vmax.f32 %v4583_v32, 0.0  ;;  %v4938_v48 = vmax.f32 %v4528_v54, 0.0  ;;  %v4940_v15 = vmax.f32 %v4581_v38, 0.0  ;;  %v8035_v32 = vld [vmem:[%s9086_s27 + $0x200] sm:$0xff]  }
 0x9aa   : > { %v4954_v42 = vmax.f32 %v4532_v26, 0.0  ;;  %v4956_v9 = vmax.f32 %v4585_v0, 0.0 }
 0x9ab   : > { %v4985_v47 = vpack.c.bf16 %v4953_v7, %v4937_v55  ;;  %v4987_v12 = vpack.c.bf16 %v4955_v53, %v4939_v19  ;;  %v8037_v19 = vld [vmem:[%s9086_s27 + $0x248] sm:$0xff]  }
 0x9ac   : > { %v4986_v25 = vpack.c.bf16 %v4954_v42, %v4938_v48  ;;  %v4988_v43 = vpack.c.bf16 %v4956_v9, %v4940_v15  ;;  %v4621_v23 = vpop.f32.mrb[92].mxu1  ;;  %v4674_v46 = vpop.f32.mrb[84].mxu0  ;;  %v8038_v7 = vld [vmem:[%s9086_s27 + $0x2c8] sm:$0xff]  }
 0x9ad   : > { %v4622_v27 = vadd.f32 %v4621_v23, %v10225_v41  ;;  %v4675_v40 = vadd.f32 %v4674_v46, %v10230_v11  ;;  %v4623_v29 = vpop.f32.mrb[93].mxu1  ;;  %v4676_v58 = vpop.f32.mrb[85].mxu0  ;;  %v8039_v46 = vld [vmem:[%s9086_s27 + $0x208] sm:$0xff]  }
 0x9ae   : > { %v4624_v34 = vadd.f32 %v4623_v29, %v10236_v28  ;;  %v4677_v5 = vadd.f32 %v4676_v58, %v10241_v31  ;;  %v4625_v21 = vpop.f32.mrb[94].mxu1  ;;  %v4678_v24 = vpop.f32.mrb[86].mxu0  ;;  %6072 = vmatprep.mubr.bf16.mxu1 %v4986_v25  ;;  %6121 = vmatprep.mubr.bf16.mxu0 %v4988_v43 }
 0x9af   : > { %v4626_v14 = vadd.f32 %v4625_v21, %v10225_v41  ;;  %v4679_v13 = vadd.f32 %v4678_v24, %v10230_v11  ;;  %v4627_v33 = vpop.f32.mrb[95].mxu1  ;;  %v4680_v60 = vpop.f32.mrb[87].mxu0  ;;  %6073 = vmatmul.mubr.bf16.gmra.mrb[120].mxu1 %v4985_v47  ;;  %6122 = vmatmul.mubr.bf16.gmra.mrb[112].mxu0 %v4987_v12  ;;  %v4909_v57 = vmax.f32 %v4622_v27, 0.0  ;;  %v4911_v3 = vmax.f32 %v4675_v40, 0.0  ;;  %v8040_v27 = vld [vmem:[%s9086_s27 + $0x288] sm:$0xff]  }
 0x9b0   : > { %v4628_v20 = vadd.f32 %v4627_v33, %v10236_v28  ;;  %v4681_v10 = vadd.f32 %v4680_v60, %v10241_v31  ;;  %v4910_v37 = vmax.f32 %v4624_v34, 0.0  ;;  %v4912_v49 = vmax.f32 %v4677_v5, 0.0  ;;  %v8042_v34 = vld [vmem:[%s9086_s27 + $0x2d0] sm:$0xff]  }
 0x9b1   : > { %v4925_v18 = vmax.f32 %v4626_v14, 0.0  ;;  %v4927_v4 = vmax.f32 %v4679_v13, 0.0  ;;  %v8043_v60 = vld [vmem:[%s9086_s27 + $0x210] sm:$0xff]  }
 0x9b2   : > { %v4926_v45 = vmax.f32 %v4628_v20, 0.0  ;;  %v4928_v51 = vmax.f32 %v4681_v10, 0.0  ;;  %v8044_v20 = vld [vmem:[%s9086_s27 + $0x290] sm:$0xff]   ;;  %v8045_v10 = vld [vmem:[%s9086_s27 + $0x258] sm:$0xff]  }
 0x9b3   : > { %v4973_v8 = vpack.c.bf16 %v4925_v18, %v4909_v57  ;;  %v4975_v54 = vpack.c.bf16 %v4927_v4, %v4911_v3  ;;  %v8046_v57 = vld [vmem:[%s9086_s27 + $0x2d8] sm:$0xff]   ;;  %v8049_v4 = vld [vmem:[%s9086_s27 + $0x260] sm:$0xff]  }
 0x9b4   : > { %v4974_v38 = vpack.c.bf16 %v4926_v45, %v4910_v37  ;;  %v4976_v35 = vpack.c.bf16 %v4928_v51, %v4912_v49  ;;  %v4631_v22 = vpop.f32.mrb[96].mxu1  ;;  %v4684_v39 = vpop.f32.mrb[88].mxu0  ;;  %v8047_v3 = vld [vmem:[%s9086_s27 + $0x218] sm:$0xff]   ;;  %v8050_v37 = vld [vmem:[%s9086_s27 + $0x2e0] sm:$0xff]   ;;  %v8053_v51 = vld [vmem:[%s9086_s27 + $0x268] sm:$0xff]  }
 0x9b5   : > { %v4632_v16 = vadd.f32 %v4631_v22, %v10225_v41  ;;  %v4685_v26 = vadd.f32 %v4684_v39, %v10230_v11  ;;  %v4633_v0 = vpop.f32.mrb[97].mxu1  ;;  %v4686_v55 = vpop.f32.mrb[89].mxu0  ;;  %v8048_v18 = vld [vmem:[%s9086_s27 + $0x298] sm:$0xff]   ;;  %v8051_v49 = vld [vmem:[%s9086_s27 + $0x220] sm:$0xff]  }
 0x9b6   : > { %v4634_v53 = vadd.f32 %v4633_v0, %v10236_v28  ;;  %v4687_v48 = vadd.f32 %v4686_v55, %v10241_v31  ;;  %v4635_v15 = vpop.f32.mrb[98].mxu1  ;;  %v4688_v42 = vpop.f32.mrb[90].mxu0  ;;  %6162 = vmatprep.mubr.bf16.mxu1 %v4974_v38  ;;  %6211 = vmatprep.mubr.bf16.mxu0 %v4976_v35  ;;  %v8052_v45 = vld [vmem:[%s9086_s27 + $0x2a0] sm:$0xff]   ;;  %v8055_v38 = vld [vmem:[%s9086_s27 + $0x228] sm:$0xff]  }
 0x9b7   : > { %v4636_v9 = vadd.f32 %v4635_v15, %v10225_v41  ;;  %v4689_v47 = vadd.f32 %v4688_v42, %v10230_v11  ;;  %v4637_v12 = vpop.f32.mrb[99].mxu1  ;;  %v4690_v25 = vpop.f32.mrb[91].mxu0  ;;  %6163 = vmatmul.mubr.bf16.vlgmr.msra.gmra.mrb[124].mxu1 %v4973_v8  ;;  %6212 = vmatmul.mubr.bf16.vlgmr.msra.gmra.mrb[116].mxu0 %v4975_v54  ;;  %v4941_v40 = vmax.f32 %v4632_v16, 0.0  ;;  %v4943_v29 = vmax.f32 %v4685_v26, 0.0  ;;  %v8041_v11 = vld [vmem:[%s9086_s27 + $0x250] sm:$0xff]   ;;  %v8054_v8 = vld [vmem:[%s9086_s27 + $0x2e8] sm:$0xff]  }
 0x9b8   : > { %v4638_v43 = vadd.f32 %v4637_v12, %v10236_v28  ;;  %v4691_v23 = vadd.f32 %v4690_v25, %v10241_v31  ;;  %7383 = vmatpush3.bf16.msra.mxu1 %v8035_v32  ;;  %7411 = vmatpush3.bf16.msra.mxu0 %v8036_v6  ;;  %v4942_v5 = vmax.f32 %v4634_v53, 0.0  ;;  %v4944_v28 = vmax.f32 %v4687_v48, 0.0  ;;  %v10280_v54 = vld [vmem:[%s9084_s24 + $0x8] sm:$0xff]  ;;  %v8057_v32 = vld [vmem:[%s9086_s27 + $0x270] sm:$0xff]   ;;  %s10514_s24 = scalar_lea.vmem [#allocation15], %s9057_s0 }
 0x9b9   : > { %v4957_v58 = vmax.f32 %v4636_v9, 0.0  ;;  %v4959_v41 = vmax.f32 %v4689_v47, 0.0  ;;  %7384 = vmatprep.subr.bf16.mxu1 %v8037_v19  ;;  %7412 = vmatprep.subr.bf16.mxu0 %v8038_v7  ;;  %v8056_v35 = vld [vmem:[%s9086_s27 + $0x2a8] sm:$0xff]   ;;  %v10286_v22 = vrot.slane %v10280_v54, %v9196_v63  ;;  %v10290_v39 = vrot.slane %v10280_v54, %v9193_v62  ;;  %v8058_v6 = vld [vmem:[%s9086_s27 + $0x2f0] sm:$0xff]   ;;  %v8062_v15 = vld [vmem:[%s9086_s27 + $0x2f8] sm:$0xff]  }
 0x9ba   : > { %v4958_v21 = vmax.f32 %v4638_v43, 0.0  ;;  %v4960_v31 = vmax.f32 %v4691_v23, 0.0  ;;  %v10296_v16 = vrot.slane %v10280_v54, %v9205_v2  ;;  %v10300_v26 = vrot.slane %v10280_v54, %v9202_v1  ;;  %v8059_v63 = vld [vmem:[%s9086_s27 + $0x230] sm:$0xff]   ;;  %v8061_v2 = vld [vmem:[%s9086_s27 + $0x278] sm:$0xff]  }
 0x9bb   : > { %v4989_v24 = vpack.c.bf16 %v4957_v58, %v4941_v40  ;;  %v4991_v14 = vpack.c.bf16 %v4959_v41, %v4943_v29  ;;  %v8060_v19 = vld [vmem:[%s9086_s27 + $0x2b0] sm:$0xff]   ;;  %v8063_v40 = vld [vmem:[%s9086_s27 + $0x238] sm:$0xff]  }
 0x9bc   : > { %v4990_v13 = vpack.c.bf16 %v4958_v21, %v4942_v5  ;;  %v4992_v33 = vpack.c.bf16 %v4960_v31, %v4944_v28  ;;  %7385 = vmatpush3.bf16.msra.mxu1 %v8039_v46  ;;  %7413 = vmatpush3.bf16.msra.mxu0 %v8040_v27  ;;  %v8064_v29 = vld [vmem:[%s9086_s27 + $0x2b8] sm:$0xff]   ;;  %v8065_v5 = vld [vmem:[%s9086_s27 + $0x340] sm:$0xff]  }
 0x9bd   : > { %7386 = vmatprep.subr.bf16.mxu1 %v8041_v11  ;;  %7414 = vmatprep.subr.bf16.mxu0 %v8042_v34  ;;  %v8066_v28 = vld [vmem:[%s9086_s27 + $0x3c0] sm:$0xff]  }
 0x9be   : > { %6170 = vmatprep.mubr.bf16.mxu1 %v4990_v13  ;;  %6219 = vmatprep.mubr.bf16.mxu0 %v4992_v33 }
 0x9bf   : > { %6171 = vmatmul.mubr.bf16.gmra.mrb[128].mxu1 %v4989_v24  ;;  %6220 = vmatmul.mubr.bf16.gmra.mrb[120].mxu0 %v4991_v14 }
 0x9c0   : > { %7387 = vmatpush3.bf16.msra.mxu1 %v8043_v60  ;;  %7415 = vmatpush3.bf16.msra.mxu0 %v8044_v20 }
 0x9c1   : > { %7388 = vmatprep.subr.bf16.mxu1 %v8045_v10  ;;  %7416 = vmatprep.subr.bf16.mxu0 %v8046_v57 }
 0x9c4   : > { %7389 = vmatpush3.bf16.msra.mxu1 %v8047_v3  ;;  %7417 = vmatpush3.bf16.msra.mxu0 %v8048_v18  ;;  %v8067_v3 = vld [vmem:[%s9086_s27 + $0x300] sm:$0xff]  }
 0x9c5   : > { %7390 = vmatprep.subr.bf16.mxu1 %v8049_v4  ;;  %7418 = vmatprep.subr.bf16.mxu0 %v8050_v37  ;;  %v8068_v18 = vld [vmem:[%s9086_s27 + $0x380] sm:$0xff]  }
 0x9c8   : > { %7391 = vmatpush3.bf16.msra.mxu1 %v8051_v49  ;;  %7419 = vmatpush3.bf16.msra.mxu0 %v8052_v45 }
 0x9c9   : > { %7392 = vmatprep.subr.bf16.mxu1 %v8053_v51  ;;  %7420 = vmatprep.subr.bf16.mxu0 %v8054_v8  ;;  %v8069_v51 = vld [vmem:[%s9086_s27 + $0x348] sm:$0xff]  }
 0x9ca   : > { %v8070_v8 = vld [vmem:[%s9086_s27 + $0x3c8] sm:$0xff]  }
 0x9cc   : > { %v4727_v0 = vpop.f32.mrb[100].mxu1  ;;  %v4780_v55 = vpop.f32.mrb[92].mxu0  ;;  %7393 = vmatpush3.bf16.msra.mxu1 %v8055_v38  ;;  %7421 = vmatpush3.bf16.msra.mxu0 %v8056_v35 }
 0x9cd   : > { %v4728_v62 = vadd.f32 %v4727_v0, %v10286_v22  ;;  %v4781_v7 = vadd.f32 %v4780_v55, %v10290_v39  ;;  %v4729_v53 = vpop.f32.mrb[101].mxu1  ;;  %v4782_v48 = vpop.f32.mrb[93].mxu0  ;;  %7394 = vmatprep.subr.bf16.mxu1 %v8057_v32  ;;  %7422 = vmatprep.subr.bf16.mxu0 %v8058_v6 }
 0x9ce   : > { %v4730_v1 = vadd.f32 %v4729_v53, %v10296_v16  ;;  %v4783_v42 = vadd.f32 %v4782_v48, %v10300_v26  ;;  %v4731_v9 = vpop.f32.mrb[102].mxu1  ;;  %v4784_v47 = vpop.f32.mrb[94].mxu0  ;;  %v8071_v53 = vld [vmem:[%s9086_s27 + $0x308] sm:$0xff]  }
 0x9cf   : > { %v4732_v12 = vadd.f32 %v4731_v9, %v10286_v22  ;;  %v4785_v25 = vadd.f32 %v4784_v47, %v10290_v39  ;;  %v4733_v43 = vpop.f32.mrb[103].mxu1  ;;  %v4786_v23 = vpop.f32.mrb[95].mxu0  ;;  %v4913_v58 = vmax.f32 %v4728_v62, 0.0  ;;  %v4915_v41 = vmax.f32 %v4781_v7, 0.0  ;;  %v8072_v48 = vld [vmem:[%s9086_s27 + $0x388] sm:$0xff]  }
 0x9d0   : > { %v4734_v46 = vadd.f32 %v4733_v43, %v10296_v16  ;;  %v4787_v27 = vadd.f32 %v4786_v23, %v10300_v26  ;;  %7395 = vmatpush3.bf16.msra.mxu1 %v8059_v63  ;;  %7423 = vmatpush3.bf16.msra.mxu0 %v8060_v19  ;;  %v4914_v21 = vmax.f32 %v4730_v1, 0.0  ;;  %v4916_v31 = vmax.f32 %v4783_v42, 0.0  ;;  %v8074_v42 = vld [vmem:[%s9086_s27 + $0x3d0] sm:$0xff]  }
 0x9d1   : > { %v4929_v11 = vmax.f32 %v4732_v12, 0.0  ;;  %v4931_v34 = vmax.f32 %v4785_v25, 0.0  ;;  %7396 = vmatprep.subr.bf16.mxu1 %v8061_v2  ;;  %7424 = vmatprep.subr.bf16.mxu0 %v8062_v15 }
 0x9d2   : > { %v4930_v24 = vmax.f32 %v4734_v46, 0.0  ;;  %v4932_v14 = vmax.f32 %v4787_v27, 0.0  ;;  %v8075_v46 = vld [vmem:[%s9086_s27 + $0x310] sm:$0xff]  }
 0x9d3   : > { %v4977_v13 = vpack.c.bf16 %v4929_v11, %v4913_v58  ;;  %v4979_v33 = vpack.c.bf16 %v4931_v34, %v4915_v41  ;;  %v8076_v27 = vld [vmem:[%s9086_s27 + $0x390] sm:$0xff]   ;;  %v8079_v58 = vld [vmem:[%s9086_s27 + $0x318] sm:$0xff]   ;;  %v8081_v11 = vld [vmem:[%s9086_s27 + $0x360] sm:$0xff]  }
 0x9d4   : > { %v4978_v60 = vpack.c.bf16 %v4930_v24, %v4914_v21  ;;  %v4980_v20 = vpack.c.bf16 %v4932_v14, %v4916_v31  ;;  %v4737_v10 = vpop.f32.mrb[104].mxu1  ;;  %v4790_v57 = vpop.f32.mrb[96].mxu0  ;;  %7397 = vmatpush3.bf16.msra.mxu1 %v8063_v40  ;;  %7425 = vmatpush3.bf16.msra.mxu0 %v8064_v29  ;;  %v8077_v40 = vld [vmem:[%s9086_s27 + $0x358] sm:$0xff]   ;;  %v8082_v34 = vld [vmem:[%s9086_s27 + $0x3e0] sm:$0xff]   ;;  %v8085_v21 = vld [vmem:[%s9086_s27 + $0x368] sm:$0xff]  }
 0x9d5   : > { %v4738_v4 = vadd.f32 %v4737_v10, %v10286_v22  ;;  %v4791_v37 = vadd.f32 %v4790_v57, %v10290_v39  ;;  %v4739_v49 = vpop.f32.mrb[105].mxu1  ;;  %v4792_v45 = vpop.f32.mrb[97].mxu0  ;;  %7438 = vmatprep.subr.bf16.mxu1 %v8065_v5  ;;  %7466 = vmatprep.subr.bf16.mxu0 %v8066_v28  ;;  %v8078_v29 = vld [vmem:[%s9086_s27 + $0x3d8] sm:$0xff]   ;;  %v8083_v5 = vld [vmem:[%s9086_s27 + $0x320] sm:$0xff]   ;;  %v8086_v31 = vld [vmem:[%s9086_s27 + $0x3e8] sm:$0xff]   ;;  %v10357_v10 = vrot.slane %v10280_v54, %v9275_v56 }
 0x9d6   : > { %v4740_v38 = vadd.f32 %v4739_v49, %v10296_v16  ;;  %v4793_v35 = vadd.f32 %v4792_v45, %v10300_v26  ;;  %v4741_v32 = vpop.f32.mrb[106].mxu1  ;;  %v4794_v6 = vpop.f32.mrb[98].mxu0  ;;  %6260 = vmatprep.mubr.bf16.mxu1 %v4978_v60  ;;  %6309 = vmatprep.mubr.bf16.mxu0 %v4980_v20  ;;  %v8080_v41 = vld [vmem:[%s9086_s27 + $0x398] sm:$0xff]   ;;  %v8084_v28 = vld [vmem:[%s9086_s27 + $0x3a0] sm:$0xff]   ;;  %v8087_v24 = vld [vmem:[%s9086_s27 + $0x328] sm:$0xff]   ;;  %v10362_v57 = vrot.slane %v10280_v54, %v3791_v52 }
 0x9d7   : > { %v4742_v0 = vadd.f32 %v4741_v32, %v10286_v22  ;;  %v4795_v55 = vadd.f32 %v4794_v6, %v10290_v39  ;;  %v4743_v63 = vpop.f32.mrb[107].mxu1  ;;  %v4796_v19 = vpop.f32.mrb[99].mxu0  ;;  %6261 = vmatmul.mubr.bf16.vlgmr.msra.gmra.mrb[132].mxu1 %v4977_v13  ;;  %6310 = vmatmul.mubr.bf16.vlgmr.msra.gmra.mrb[124].mxu0 %v4979_v33  ;;  %v4945_v2 = vmax.f32 %v4738_v4, 0.0  ;;  %v4947_v15 = vmax.f32 %v4791_v37, 0.0  ;;  %v8073_v39 = vld [vmem:[%s9086_s27 + $0x350] sm:$0xff]   ;;  %v8088_v14 = vld [vmem:[%s9086_s27 + $0x3a8] sm:$0xff]  }
 0x9d8   : > { %v4744_v62 = vadd.f32 %v4743_v63, %v10296_v16  ;;  %v4797_v7 = vadd.f32 %v4796_v19, %v10300_v26  ;;  %7439 = vmatpush3.bf16.msra.mxu1 %v8067_v3  ;;  %7467 = vmatpush3.bf16.msra.mxu0 %v8068_v18  ;;  %v4946_v9 = vmax.f32 %v4740_v38, 0.0  ;;  %v4948_v16 = vmax.f32 %v4793_v35, 0.0  ;;  %v8089_v60 = vld [vmem:[%s9086_s27 + $0x370] sm:$0xff]   ;;  %v8093_v56 = vld [vmem:[%s9086_s27 + $0x378] sm:$0xff]  }
 0x9d9   : > { %v4961_v1 = vmax.f32 %v4742_v0, 0.0  ;;  %v4963_v22 = vmax.f32 %v4795_v55, 0.0  ;;  %7440 = vmatprep.subr.bf16.mxu1 %v8069_v51  ;;  %7468 = vmatprep.subr.bf16.mxu0 %v8070_v8  ;;  %v3812_v13 = vrot.slane %v10280_v54, %v9266_v50  ;;  %v3820_v33 = vrot.slane %v10280_v54, %v3787_v36  ;;  %v8090_v20 = vld [vmem:[%s9086_s27 + $0x3f0] sm:$0xff]   ;;  %v8094_v51 = vld [vmem:[%s9086_s27 + $0x3f8] sm:$0xff]  }
 0x9da   : > { %v4962_v47 = vmax.f32 %v4744_v62, 0.0  ;;  %v4964_v26 = vmax.f32 %v4797_v7, 0.0  ;;  %v8091_v50 = vld [vmem:[%s9086_s27 + $0x330] sm:$0xff]   ;;  %v8095_v63 = vld [vmem:[%s9086_s27 + $0x338] sm:$0xff]  }
 0x9db   : > { %v4993_v12 = vpack.c.bf16 %v4961_v1, %v4945_v2  ;;  %v4995_v25 = vpack.c.bf16 %v4963_v22, %v4947_v15  ;;  %v8092_v4 = vld [vmem:[%s9086_s27 + $0x3b0] sm:$0xff]   ;;  %v8096_v19 = vld [vmem:[%s9086_s27 + $0x3b8] sm:$0xff]   ;;  %s10515_s27 = sld [smem:[#allocation26_spill]] }
 0x9dc   : > { %v4994_v43 = vpack.c.bf16 %v4962_v47, %v4946_v9  ;;  %v4996_v23 = vpack.c.bf16 %v4964_v26, %v4948_v16  ;;  %7441 = vmatpush3.bf16.msra.mxu1 %v8071_v53  ;;  %7469 = vmatpush3.bf16.msra.mxu0 %v8072_v48 }
 0x9dd   : > { %7442 = vmatprep.subr.bf16.mxu1 %v8073_v39  ;;  %7470 = vmatprep.subr.bf16.mxu0 %v8074_v42 }
 0x9de   : > { %6268 = vmatprep.mubr.bf16.mxu1 %v4994_v43  ;;  %6317 = vmatprep.mubr.bf16.mxu0 %v4996_v23 }
 0x9df   : > { %6269 = vmatmul.mubr.bf16.gmra.mrb[136].mxu1 %v4993_v12  ;;  %6318 = vmatmul.mubr.bf16.gmra.mrb[128].mxu0 %v4995_v25 }
 0x9e0   : > { %7443 = vmatpush3.bf16.msra.mxu1 %v8075_v46  ;;  %7471 = vmatpush3.bf16.msra.mxu0 %v8076_v27 }
 0x9e1   : > { %7444 = vmatprep.subr.bf16.mxu1 %v8077_v40  ;;  %7472 = vmatprep.subr.bf16.mxu0 %v8078_v29  ;;  %p7169_p10 = scmp.ne.s32.totalorder %s10515_s27, 1 }
 0x9e4   : > { %7445 = vmatpush3.bf16.msra.mxu1 %v8079_v58  ;;  %7473 = vmatpush3.bf16.msra.mxu0 %v8080_v41 }
 0x9e5   : > { %7446 = vmatprep.subr.bf16.mxu1 %v8081_v11  ;;  %7474 = vmatprep.subr.bf16.mxu0 %v8082_v34 }
 0x9e8   : > { %7447 = vmatpush3.bf16.msra.mxu1 %v8083_v5  ;;  %7475 = vmatpush3.bf16.msra.mxu0 %v8084_v28 }
 0x9e9   : > { %7448 = vmatprep.subr.bf16.mxu1 %v8085_v21  ;;  %7476 = vmatprep.subr.bf16.mxu0 %v8086_v31 }
 0x9ec   : > { %v4833_v3 = vpop.f32.mrb[108].mxu1  ;;  %v4886_v18 = vpop.f32.mrb[100].mxu0  ;;  %7449 = vmatpush3.bf16.msra.mxu1 %v8087_v24  ;;  %7477 = vmatpush3.bf16.msra.mxu0 %v8088_v14 }
 0x9ed   : > { %v4834_v36 = vadd.f32 %v4833_v3, %v3812_v13  ;;  %v4887_v37 = vadd.f32 %v4886_v18, %v3820_v33  ;;  %v4835_v49 = vpop.f32.mrb[109].mxu1  ;;  %v4888_v45 = vpop.f32.mrb[101].mxu0  ;;  %7450 = vmatprep.subr.bf16.mxu1 %v8089_v60  ;;  %7478 = vmatprep.subr.bf16.mxu0 %v8090_v20 }
 0x9ee   : > { %v4836_v61 = vadd.f32 %v4835_v49, %v10357_v10  ;;  %v4889_v52 = vadd.f32 %v4888_v45, %v10362_v57  ;;  %v4837_v54 = vpop.f32.mrb[110].mxu1  ;;  %v4890_v8 = vpop.f32.mrb[102].mxu0 }
 0x9ef   : > { %v4838_v38 = vadd.f32 %v4837_v54, %v3812_v13  ;;  %v4891_v35 = vadd.f32 %v4890_v8, %v3820_v33  ;;  %v4839_v32 = vpop.f32.mrb[111].mxu1  ;;  %v4892_v6 = vpop.f32.mrb[103].mxu0  ;;  %v4917_v62 = vmax.f32 %v4834_v36, 0.0  ;;  %v4919_v7 = vmax.f32 %v4887_v37, 0.0 }
 0x9f0   : > { %v4840_v0 = vadd.f32 %v4839_v32, %v10357_v10  ;;  %v4893_v55 = vadd.f32 %v4892_v6, %v10362_v57  ;;  %7451 = vmatpush3.bf16.msra.mxu1 %v8091_v50  ;;  %7479 = vmatpush3.bf16.msra.mxu0 %v8092_v4  ;;  %v4918_v2 = vmax.f32 %v4836_v61, 0.0  ;;  %v4920_v15 = vmax.f32 %v4889_v52, 0.0 }
 0x9f1   : > { %v4933_v53 = vmax.f32 %v4838_v38, 0.0  ;;  %v4935_v48 = vmax.f32 %v4891_v35, 0.0  ;;  %7452 = vmatprep.subr.bf16.mxu1 %v8093_v56  ;;  %7480 = vmatprep.subr.bf16.mxu0 %v8094_v51 }
 0x9f2   : > { %v4934_v1 = vmax.f32 %v4840_v0, 0.0  ;;  %v4936_v22 = vmax.f32 %v4893_v55, 0.0 }
 0x9f3   : > { %v4981_v39 = vpack.c.bf16 %v4933_v53, %v4917_v62  ;;  %v4983_v42 = vpack.c.bf16 %v4935_v48, %v4919_v7 }
 0x9f4   : > { %v4982_v9 = vpack.c.bf16 %v4934_v1, %v4918_v2  ;;  %v4984_v16 = vpack.c.bf16 %v4936_v22, %v4920_v15  ;;  %v4843_v47 = vpop.f32.mrb[112].mxu1  ;;  %v4896_v26 = vpop.f32.mrb[104].mxu0  ;;  %7453 = vmatpush3.bf16.msra.mxu1 %v8095_v63  ;;  %7481 = vmatpush3.bf16.msra.mxu0 %v8096_v19 }
 0x9f5   : > { %v4844_v12 = vadd.f32 %v4843_v47, %v3812_v13  ;;  %v4897_v25 = vadd.f32 %v4896_v26, %v3820_v33  ;;  %v4845_v43 = vpop.f32.mrb[113].mxu1  ;;  %v4898_v23 = vpop.f32.mrb[105].mxu0 }
 0x9f6   : > { %v4846_v46 = vadd.f32 %v4845_v43, %v10357_v10  ;;  %v4899_v27 = vadd.f32 %v4898_v23, %v10362_v57  ;;  %v4847_v40 = vpop.f32.mrb[114].mxu1  ;;  %v4900_v29 = vpop.f32.mrb[106].mxu0  ;;  %6358 = vmatprep.mubr.bf16.mxu1 %v4982_v9  ;;  %6407 = vmatprep.mubr.bf16.mxu0 %v4984_v16 }
 0x9f7   : > { %v4848_v58 = vadd.f32 %v4847_v40, %v3812_v13  ;;  %v4901_v41 = vadd.f32 %v4900_v29, %v3820_v33  ;;  %v4849_v11 = vpop.f32.mrb[115].mxu1  ;;  %v4902_v34 = vpop.f32.mrb[107].mxu0  ;;  %6359 = vmatmul.mubr.bf16.vlgmr.msra.gmra.mrb[140].mxu1 %v4981_v39  ;;  %6408 = vmatmul.mubr.bf16.vlgmr.msra.gmra.mrb[132].mxu0 %v4983_v42  ;;  %v4949_v21 = vmax.f32 %v4844_v12, 0.0  ;;  %v4951_v31 = vmax.f32 %v4897_v25, 0.0 }
 0x9f8   : > { %v4850_v5 = vadd.f32 %v4849_v11, %v10357_v10  ;;  %v4903_v28 = vadd.f32 %v4902_v34, %v10362_v57  ;;  %v4950_v60 = vmax.f32 %v4846_v46, 0.0  ;;  %v4952_v20 = vmax.f32 %v4899_v27, 0.0  ;;  %v7038_v57 = vld [vmem:[%s10513_s3] ss:$0 sm:$0xff] }
 0x9f9   : > { %v4965_v24 = vmax.f32 %v4848_v58, 0.0  ;;  %v4967_v14 = vmax.f32 %v4901_v41, 0.0 }
 0x9fa   : > { %v4966_v3 = vmax.f32 %v4850_v5, 0.0  ;;  %v4968_v18 = vmax.f32 %v4903_v28, 0.0 }
 0x9fb   : > { %v4997_v50 = vpack.c.bf16 %v4965_v24, %v4949_v21  ;;  %v4999_v13 = vpack.c.bf16 %v4967_v14, %v4951_v31 }
 0x9fc   : > { %v4998_v33 = vpack.c.bf16 %v4966_v3, %v4950_v60  ;;  %v5000_v4 = vpack.c.bf16 %v4968_v18, %v4952_v20 }
 0x9fe   : > { %6366 = vmatprep.mubr.bf16.mxu1 %v4998_v33  ;;  %6415 = vmatprep.mubr.bf16.mxu0 %v5000_v4 }
 0x9ff   : > { %6367 = vmatmul.mubr.bf16.gmra.mrb[144].mxu1 %v4997_v50  ;;  %6416 = vmatmul.mubr.bf16.gmra.mrb[136].mxu0 %v4999_v13 }
 0xa54   : > { %v7286_v10 = vpop.f32.mrb[116].mxu1  ;;  %v7314_v36 = vpop.f32.mrb[108].mxu0 }
 0xa55   : > { %v7287_v37 = vpop.f32.mrb[117].mxu1  ;;  %v7315_v49 = vpop.f32.mrb[109].mxu0 }
 0xa56   : > { %v7288_v45 = vadd.f32 %v7287_v37, %v7286_v10  ;;  %v7316_v56 = vadd.f32 %v7315_v49, %v7314_v36  ;;  %v7289_v51 = vpop.f32.mrb[118].mxu1  ;;  %v7317_v61 = vpop.f32.mrb[110].mxu0 }
 0xa57   : > { %v7290_v52 = vpop.f32.mrb[119].mxu1  ;;  %v7318_v54 = vpop.f32.mrb[111].mxu0 }
 0xa58   : > { %v6067_v8 = vadd.f32 %v7288_v45, %v7038_v57  ;;  %v7291_v38 = vadd.f32 %v7290_v52, %v7289_v51  ;;  %v7319_v35 = vadd.f32 %v7318_v54, %v7317_v61 }
 0xa5a   : > { %v6116_v32 = vadd.f32 %v7316_v56, %v6067_v8  ;;  %v6070_v6 = vadd.f32 %v7291_v38, %v7038_v57 }
 0xa5c   : > { %v6119_v0 = vadd.f32 %v7319_v35, %v6070_v6 }
 0xa82   : > { %v7292_v55 = vpop.f32.mrb[120].mxu1  ;;  %v7320_v63 = vpop.f32.mrb[112].mxu0 }
 0xa83   : > { %v7293_v19 = vpop.f32.mrb[121].mxu1  ;;  %v7321_v62 = vpop.f32.mrb[113].mxu0 }
 0xa84   : > { %v7294_v7 = vadd.f32 %v7293_v19, %v7292_v55  ;;  %v7322_v53 = vadd.f32 %v7321_v62, %v7320_v63  ;;  %v7295_v48 = vpop.f32.mrb[122].mxu1  ;;  %v7323_v2 = vpop.f32.mrb[114].mxu0 }
 0xa85   : > { %v7296_v15 = vpop.f32.mrb[123].mxu1  ;;  %v7324_v1 = vpop.f32.mrb[115].mxu0 }
 0xa86   : > { %v6075_v22 = vadd.f32 %v7294_v7, %v7038_v57  ;;  %v7297_v39 = vadd.f32 %v7296_v15, %v7295_v48  ;;  %v7325_v42 = vadd.f32 %v7324_v1, %v7323_v2 }
 0xa88   : > { %v6124_v9 = vadd.f32 %v7322_v53, %v6075_v22  ;;  %v6078_v16 = vadd.f32 %v7297_v39, %v7038_v57 }
 0xa8a   : > { %v6127_v47 = vadd.f32 %v7325_v42, %v6078_v16  ;;  %v7342_v26 = vpop.f32.mrb[124].mxu1  ;;  %v7370_v12 = vpop.f32.mrb[116].mxu0 }
 0xa8b   : > { %v7343_v25 = vpop.f32.mrb[125].mxu1  ;;  %v7371_v43 = vpop.f32.mrb[117].mxu0 }
 0xa8c   : > { %v7344_v23 = vadd.f32 %v7343_v25, %v7342_v26  ;;  %v7372_v46 = vadd.f32 %v7371_v43, %v7370_v12  ;;  %v7345_v27 = vpop.f32.mrb[126].mxu1  ;;  %v7373_v40 = vpop.f32.mrb[118].mxu0 }
 0xa8d   : > { %v7346_v29 = vpop.f32.mrb[127].mxu1  ;;  %v7374_v58 = vpop.f32.mrb[119].mxu0 }
 0xa8e   : > { %v6165_v41 = vadd.f32 %v7344_v23, %v6116_v32  ;;  %v7347_v11 = vadd.f32 %v7346_v29, %v7345_v27  ;;  %v7375_v34 = vadd.f32 %v7374_v58, %v7373_v40 }
 0xa90   : > { %v6214_v5 = vadd.f32 %v7372_v46, %v6165_v41  ;;  %v6168_v28 = vadd.f32 %v7347_v11, %v6119_v0 }
 0xa92   : > { %v6217_v21 = vadd.f32 %v7375_v34, %v6168_v28  ;;  %v7348_v31 = vpop.f32.mrb[128].mxu1  ;;  %v7376_v24 = vpop.f32.mrb[120].mxu0 }
 0xa93   : > { %v7349_v14 = vpop.f32.mrb[129].mxu1  ;;  %v7377_v60 = vpop.f32.mrb[121].mxu0 }
 0xa94   : > { %v7350_v20 = vadd.f32 %v7349_v14, %v7348_v31  ;;  %v7378_v3 = vadd.f32 %v7377_v60, %v7376_v24  ;;  %v7351_v18 = vpop.f32.mrb[130].mxu1  ;;  %v7379_v50 = vpop.f32.mrb[122].mxu0 }
 0xa95   : > { %v7352_v13 = vpop.f32.mrb[131].mxu1  ;;  %v7380_v33 = vpop.f32.mrb[123].mxu0 }
 0xa96   : > { %v6173_v4 = vadd.f32 %v7350_v20, %v6124_v9  ;;  %v7353_v10 = vadd.f32 %v7352_v13, %v7351_v18  ;;  %v7381_v36 = vadd.f32 %v7380_v33, %v7379_v50 }
 0xa98   : > { %v6222_v57 = vadd.f32 %v7378_v3, %v6173_v4  ;;  %v6176_v37 = vadd.f32 %v7353_v10, %v6127_v47 }
 0xa9a   : > { %v6225_v49 = vadd.f32 %v7381_v36, %v6176_v37 }
 0xaaa   : > { %v7398_v45 = vpop.f32.mrb[132].mxu1  ;;  %v7426_v56 = vpop.f32.mrb[124].mxu0 }
 0xaab   : > { %v7399_v51 = vpop.f32.mrb[133].mxu1  ;;  %v7427_v61 = vpop.f32.mrb[125].mxu0 }
 0xaac   : > { %v7400_v52 = vadd.f32 %v7399_v51, %v7398_v45  ;;  %v7428_v54 = vadd.f32 %v7427_v61, %v7426_v56  ;;  %v7401_v8 = vpop.f32.mrb[134].mxu1  ;;  %v7429_v38 = vpop.f32.mrb[126].mxu0 }
 0xaad   : > { %v7402_v35 = vpop.f32.mrb[135].mxu1  ;;  %v7430_v32 = vpop.f32.mrb[127].mxu0 }
 0xaae   : > { %v6263_v6 = vadd.f32 %v7400_v52, %v6214_v5  ;;  %v7403_v0 = vadd.f32 %v7402_v35, %v7401_v8  ;;  %v7431_v55 = vadd.f32 %v7430_v32, %v7429_v38 }
 0xab0   : > { %v6312_v63 = vadd.f32 %v7428_v54, %v6263_v6  ;;  %v6266_v19 = vadd.f32 %v7403_v0, %v6217_v21 }
 0xab2   : > { %v6315_v62 = vadd.f32 %v7431_v55, %v6266_v19  ;;  %v7404_v7 = vpop.f32.mrb[136].mxu1  ;;  %v7432_v53 = vpop.f32.mrb[128].mxu0 }
 0xab3   : > { %v7405_v48 = vpop.f32.mrb[137].mxu1  ;;  %v7433_v2 = vpop.f32.mrb[129].mxu0 }
 0xab4   : > { %v7406_v15 = vadd.f32 %v7405_v48, %v7404_v7  ;;  %v7434_v1 = vadd.f32 %v7433_v2, %v7432_v53  ;;  %v7407_v22 = vpop.f32.mrb[138].mxu1  ;;  %v7435_v39 = vpop.f32.mrb[130].mxu0 }
 0xab5   : > { %v7408_v42 = vpop.f32.mrb[139].mxu1  ;;  %v7436_v9 = vpop.f32.mrb[131].mxu0 }
 0xab6   : > { %v6271_v16 = vadd.f32 %v7406_v15, %v6222_v57  ;;  %v7409_v47 = vadd.f32 %v7408_v42, %v7407_v22  ;;  %v7437_v26 = vadd.f32 %v7436_v9, %v7435_v39 }
 0xab8   : > { %v6320_v12 = vadd.f32 %v7434_v1, %v6271_v16  ;;  %v6274_v25 = vadd.f32 %v7409_v47, %v6225_v49 }
 0xaba   : > { %v6323_v43 = vadd.f32 %v7437_v26, %v6274_v25 }
 0xaca   : > { %v7454_v23 = vpop.f32.mrb[140].mxu1  ;;  %v7482_v46 = vpop.f32.mrb[132].mxu0 }
 0xacb   : > { %v7455_v27 = vpop.f32.mrb[141].mxu1  ;;  %v7483_v40 = vpop.f32.mrb[133].mxu0 }
 0xacc   : > { %v7456_v29 = vadd.f32 %v7455_v27, %v7454_v23  ;;  %v7484_v58 = vadd.f32 %v7483_v40, %v7482_v46  ;;  %v7457_v41 = vpop.f32.mrb[142].mxu1  ;;  %v7485_v11 = vpop.f32.mrb[134].mxu0  ;;  %v7167_v46 = vld [vmem:[%s10514_s24] ss:$0 sm:$0xff] }
 0xacd   : > { %v7458_v34 = vpop.f32.mrb[143].mxu1  ;;  %v7486_v5 = vpop.f32.mrb[135].mxu0 }
 0xace   : > { %v6361_v28 = vadd.f32 %v7456_v29, %v6312_v63  ;;  %v7459_v21 = vadd.f32 %v7458_v34, %v7457_v41  ;;  %v7487_v31 = vadd.f32 %v7486_v5, %v7485_v11  ;;  %v7168_v29 = vld [vmem:[%s708_s16] ss:$0 sm:$0xff] }
 0xad0   : > { %v6410_v24 = vadd.f32 %v7484_v58, %v6361_v28  ;;  %v6364_v14 = vadd.f32 %v7459_v21, %v6315_v62 }
 0xad2   : > { %v6413_v60 = vadd.f32 %v7487_v31, %v6364_v14  ;;  %v7460_v20 = vpop.f32.mrb[144].mxu1  ;;  %v7488_v3 = vpop.f32.mrb[136].mxu0  ;;  %v6424_v18 = vadd.f32 %v6410_v24, %v9981_v30 }
 0xad3   : > { %v7461_v50 = vpop.f32.mrb[145].mxu1  ;;  %v7489_v13 = vpop.f32.mrb[137].mxu0 }
 0xad4   : > { %v7462_v33 = vadd.f32 %v7461_v50, %v7460_v20  ;;  %v7490_v4 = vadd.f32 %v7489_v13, %v7488_v3  ;;  %v7463_v10 = vpop.f32.mrb[146].mxu1  ;;  %v7491_v36 = vpop.f32.mrb[138].mxu0  ;;  %6428 = vadd.xlane.f32.xlu0 %v6424_v18  ;;  %v6425_v57 = vadd.f32 %v6413_v60, %v9984_v44 }
 0xad5   : > { %v7464_v37 = vpop.f32.mrb[147].mxu1  ;;  %v7492_v49 = vpop.f32.mrb[139].mxu0 }
 0xad6   : > { %v6369_v45 = vadd.f32 %v7462_v33, %v6320_v12  ;;  %v7465_v56 = vadd.f32 %v7464_v37, %v7463_v10  ;;  %v7493_v51 = vadd.f32 %v7492_v49, %v7491_v36  ;;  %6430 = vadd.xlane.f32.xlu1 %v6425_v57 }
 0xad8   : > { %v6418_v61 = vadd.f32 %v7490_v4, %v6369_v45  ;;  %v6372_v52 = vadd.f32 %v7465_v56, %v6323_v43 }
 0xada   : > { %v6421_v54 = vadd.f32 %v7493_v51, %v6372_v52  ;;  %v6426_v30 = vadd.f32 %v6418_v61, %v10027_v59 }
 0xadc   : > { %6432 = vadd.xlane.f32.xlu0 %v6426_v30  ;;  %v6427_v8 = vadd.f32 %v6421_v54, %v10030_v17 }
 0xade   : > { %6434 = vadd.xlane.f32.xlu1 %v6427_v8 }
 0xb61   : > { %v6429_v38 = vpop.xlane.xlu0 %6428 }
 0xb62   : > { %v6436_v35 = vmul.f32 0.0078125, %v6429_v38 }
 0xb63   : > { %v6431_v32 = vpop.xlane.xlu1 %6430 }
 0xb64   : > { %v6440_v6 = vsub.f32 %v6424_v18, %v6436_v35  ;;  %v6437_v44 = vmul.f32 0.0078125, %v6431_v32 }
 0xb66   : > { %v6441_v0 = vsub.f32 %v6425_v57, %v6437_v44  ;;  %v6444_v55 = vmul.f32 %v6440_v6, %v6440_v6 }
 0xb68   : > { %6448 = vadd.xlane.f32.xlu0 %v6444_v55  ;;  %v6445_v63 = vmul.f32 %v6441_v0, %v6441_v0 }
 0xb69   : > { %v6433_v19 = vpop.xlane.xlu0 %6432 }
 0xb6a   : > { %v6438_v62 = vmul.f32 0.0078125, %v6433_v19  ;;  %6450 = vadd.xlane.f32.xlu1 %v6445_v63 }
 0xb6b   : > { %v6435_v7 = vpop.xlane.xlu1 %6434 }
 0xb6c   : > { %v6442_v53 = vsub.f32 %v6426_v30, %v6438_v62  ;;  %v6439_v48 = vmul.f32 0.0078125, %v6435_v7 }
 0xb6e   : > { %v6443_v59 = vsub.f32 %v6427_v8, %v6439_v48  ;;  %v6446_v2 = vmul.f32 %v6442_v53, %v6442_v53 }
 0xb70   : > { %6452 = vadd.xlane.f32.xlu0 %v6446_v2  ;;  %v6447_v17 = vmul.f32 %v6443_v59, %v6443_v59 }
 0xb72   : > { %6454 = vadd.xlane.f32.xlu1 %v6447_v17 }
 0xbf5   : > { %v6449_v15 = vpop.xlane.xlu0 %6448 }
 0xbf6   : > { %v6456_v1 = vmul.f32 0.0078125, %v6449_v15 }
 0xbf7   : > { %v6451_v22 = vpop.xlane.xlu1 %6450 }
 0xbf8   : > { %v6460_v39 = vadd.f32 1e-05, %v6456_v1  ;;  %v6457_v42 = vmul.f32 0.0078125, %v6451_v22 }
 0xbfa   : > { %8233 = vrsqrt.f32 %v6460_v39  ;;  %v6461_v9 = vadd.f32 1e-05, %v6457_v42 }
 0xbfc   : > { %8235 = vrsqrt.f32 %v6461_v9 }
 0xbfd   : > { %v6453_v16 = vpop.xlane.xlu0 %6452 }
 0xbfe   : > { %v6458_v47 = vmul.f32 0.0078125, %v6453_v16 }
 0xbff   : > { %v6455_v26 = vpop.xlane.xlu1 %6454 }
 0xc00   : > { %v6462_v12 = vadd.f32 1e-05, %v6458_v47  ;;  %v6459_v25 = vmul.f32 0.0078125, %v6455_v26 }
 0xc02   : > { %8237 = vrsqrt.f32 %v6462_v12  ;;  %v6463_v43 = vadd.f32 1e-05, %v6459_v25 }
 0xc04   : > { %v8234_v23 = vpop.eup %8233  ;;  %8239 = vrsqrt.f32 %v6463_v43 }
 0xc05   : > { %v6468_v27 = vmul.f32 %v8234_v23, %v6440_v6 }
 0xc06   : > { %v8236_v40 = vpop.eup %8235 }
 0xc07   : > { %v6479_v58 = vmul.f32 %v7167_v46, %v6468_v27  ;;  %v6469_v41 = vmul.f32 %v8236_v40, %v6441_v0 }
 0xc09   : > { %v6490_v11 = vadd.f32 %v7168_v29, %v6479_v58  ;;  %v6480_v34 = vmul.f32 %v7167_v46, %v6469_v41 }
 0xc0b   : > { %6494 = vst [vmem:[#allocation2] sm:$0xff] %v6490_v11  ;;  %v6491_v5 = vadd.f32 %v7168_v29, %v6480_v34  ;;  %6502 = vst [vmem:[#allocation18] sm:$0xff] (!%p7169_p10), %v6490_v11 }
 0xc0c   : > { %v8238_v28 = vpop.eup %8237 }
 0xc0d   : > { %6495 = vst [vmem:[#allocation2 + $0x8] sm:$0xff] %v6491_v5  ;;  %v6470_v21 = vmul.f32 %v8238_v28, %v6442_v53  ;;  %6503 = vst [vmem:[#allocation18 + $0x8] sm:$0xff] (!%p7169_p10), %v6491_v5 }
 0xc0e   : > { %v8240_v31 = vpop.eup %8239 }
 0xc0f   : > { %v6481_v24 = vmul.f32 %v7167_v46, %v6470_v21  ;;  %v6471_v14 = vmul.f32 %v8240_v31, %v6443_v59  ;;  %6501 = sbr.rel (%p7169_p10) target bundleno = 3094 (0xc16), region = 116 }
 0xc11   : > { %v6492_v60 = vadd.f32 %v7168_v29, %v6481_v24  ;;  %v6482_v20 = vmul.f32 %v7167_v46, %v6471_v14 }
 0xc13   : > { %6496 = vst [vmem:[#allocation2 + $0x10] sm:$0xff] %v6492_v60  ;;  %v6493_v3 = vadd.f32 %v7168_v29, %v6482_v20  ;;  %6504 = vst [vmem:[#allocation18 + $0x10] sm:$0xff] (!%p7169_p10), %v6492_v60 }
 0xc15   : > { %6497 = vst [vmem:[#allocation2 + $0x18] sm:$0xff] %v6493_v3  ;;  %6505 = vst [vmem:[#allocation18 + $0x18] sm:$0xff] (!%p7169_p10), %v6493_v3 }
 0xc16 PF: > { %p7757_p5 = scmp.eq.s32.totalorder %s8735_s14, 1  ;;  %s8633_s0 = smov [#allocation18]  }
 0xc17   : > { %s6515_s16 = sshll.u32 %s8633_s0, 4  ;;  %s6516_s16 = int_to_ptr.vmem [resolvable:$true] %s6515_s16 }
 0xc18   : > { %s8515_s7 = scalar_lea.vmem %s6516_s16, 512  ;;  %p8522_p6 = scmp.lt.s32.totalorder %s6516_s16, %s6516_s16 }
 0xc19   : > { %p8516_p2 = scmp.ne.s32.totalorder %s6516_s16, %s8515_s7  ;;  %p8523_p9 = scmp.lt.s32.totalorder %s8515_s7, %s8515_s7 }
 0xc1b   : > { %p8517_p13 = pnand %p8516_p2, %p7757_p5  ;;  %p8524_p3 = por %p8523_p9, %p8522_p6 }
 0xc1d   : > { %p8518_p11 = pneg %p8517_p13 }
 0xc1f   : > { %p8525_p0 = pnand %p8524_p3, %p8518_p11 }
 0xc21   : > { %8528 = shalt.err (!%p8525_p0)
}
 0xc22   : > { %s10516_s18 = sld [smem:[#allocation41_spill]] }
 0xc28   : > { %s8529_s15 = scalar_lea.hbm %s10516_s18, 512 }
 0xc29   : > { %p8530_p4 = scmp.ne.s32.totalorder %s10516_s18, %s8529_s15  ;;  %p8535_p7 = scmp.lt.u32.totalorder %s8529_s15, %s10516_s18 }
 0xc2b   : > { %p8531_p8 = pnand %p8530_p4, %p7757_p5 }
 0xc2d   : > { %p8532_p12 = pneg %p8531_p8 }
 0xc2f   : > { %p8537_p1 = pnand %p8535_p7, %p8532_p12 }
 0xc31   : > { %8540 = shalt.err (!%p8537_p1)
}
 0xc32   : > { %s8634_s19 = smov 128   ;;  %s8635_s6 = smov 8  }
 0xc33   : > { %7725 = dma.vmem_to_hbm [thread:$0]  (%p7757_p5), %s6516_s16, 512, %s10516_s18, [#allocation5], %s8634_s19, %s8634_s19, %s8635_s6  }
 0xc34   : > { %8586 = dma.done.wait (%p7757_p5), [#allocation5], 512  }
 0xc35   : > { %8588 = vsyncadd (%p7757_p5), [#allocation5], 4294966784 }
 0xc36 PF: > { %s10517_s28 = sld [smem:[#allocation27_spill]]  ;;  %s10518_s4 = sld [smem:[#allocation25_spill]] }
 0xc37   : > { %s10519_s27 = sld [smem:[#allocation29_spill]]  ;;  %s10520_s20 = sld [smem:[#allocation28_spill]] }
 0xc38   : > { %s10521_s25 = smov %s8595_s26 }
 0xc3c   : > { %s39_s30 = sadd.s32 1, %s10517_s28   ;;  %s10522_s26 = smov %s10518_s4 }
 0xc3d   : > { %p36_p10 = scmp.ge.s32.totalorder %s39_s30, 4   ;;  %s10523_s28 = smov %s8607_s29 }
 0xc3e   : > { %s10524_s29 = smov %s10520_s20 }
 0xc3f   :  { %38 = sbr.rel (!%p36_p10) target bundleno = 26 (0x1a), region = 226 }
 0xc46   :  { %6531 = vsyncpa [#allocation4], 1 }
 0xc47   :  { %6533 = vsyncpa [#allocation4 + $0x1], 1 }
 0xc48   :  { %6534 = vsyncpa [#allocation7], 1 }
 0xc49   :  { %6536 = vsyncpa [#allocation7 + $0x1], 1 }
 0xc4a   :  { %6537 = vsyncpa [#allocation10], 1 }
 0xc4b   :  { %6539 = vsyncpa [#allocation10 + $0x1], 1 }
 0xc4c   :  { %6540 = vsyncpa [#allocation13], 1 }
 0xc4d   :  { %6542 = vsyncpa [#allocation13 + $0x1], 1 }
 0xc4e   :  { %6543 = vsyncpa [#allocation16], 1 }
 0xc4f   :  { %6545 = vsyncpa [#allocation16 + $0x1], 1 }
 0xc50   :  { %6546 = vsyncpa [#allocation5], 1 }
 0xc51   :  { %6548 = vsyncpa [#allocation5 + $0x1], 1 }

</bundles_post_ra>
